<compile_context>
chip_gen: v5e
topology: v5e:2x2
jax: 0.10.0
libtpu: 0.0.40
codegen_flags: <defaults>
</compile_context>

<pallas_src>
import jax
import jax.numpy as jnp
from jax import lax
from jax.experimental import pallas as pl
from jax.experimental.pallas import tpu as pltpu

_KS = 7                    # conv kernel size
_PAD = (_KS - 1) // 2      # = 3
_ROW_OFF = 8               # sublane-aligned interior row offset inside scratch (>= _PAD)
_COL_OFF = 128             # lane-aligned    interior col offset inside scratch (>= _PAD)


def _scratch_shape(bt, h, w):
    # Interior plane lives at [_ROW_OFF:_ROW_OFF+h, _COL_OFF:_COL_OFF+w];
    # the 3-wide zero halo needed by the 7x7 conv surrounds it.
    return (bt, h + _ROW_OFF + _PAD, w + _COL_OFF + _PAD)


def _tree_sum(terms):
    # Balanced-tree reduction -> short dependency chain (ILP).
    while len(terms) > 1:
        nxt = [terms[i] + terms[i + 1] for i in range(0, len(terms) - 1, 2)]
        if len(terms) % 2:
            nxt.append(terms[-1])
        terms = nxt
    return terms[0]


def _attention_gate_kernel(x_ref, w_ref, b_ref, o_ref, pmax_ref, pmean_ref):
    """x_ref:  (Bt, C, H, W)  unpadded input block (VMEM)
       w_ref:  (98,)          BN-folded conv taps (SMEM scalars)
       b_ref:  (1,)           BN-folded bias (SMEM scalar)
       o_ref:  (Bt, C, H, W)  output block (VMEM)
       pmax_ref / pmean_ref: zero-padded ZPool planes (VMEM scratch)
    """
    bt, c, h, w = x_ref.shape
    x = x_ref[...]
    xf = x.astype(jnp.float32)

    # ZPool over the channel axis: pure VPU elementwise reduction over C planes.
    xmax = jnp.max(xf, axis=1)                 # (bt, h, w)
    xmean = jnp.mean(xf, axis=1)               # (bt, h, w)

    # Zero the scratch every step (no state carried across the parallel grid
    # axis), then drop the planes at the aligned interior offset.  Both stores
    # are aligned masked stores.
    pmax_ref[...] = jnp.zeros_like(pmax_ref)
    pmean_ref[...] = jnp.zeros_like(pmean_ref)
    pmax_ref[:, _ROW_OFF:_ROW_OFF + h, _COL_OFF:_COL_OFF + w] = xmax
    pmean_ref[:, _ROW_OFF:_ROW_OFF + h, _COL_OFF:_COL_OFF + w] = xmean

    def conv_plane(pref, plane_idx):
        # Hoist the 7 lane-shifted slabs once per plane; each slab is reused by
        # all 7 ky taps, so cross-lane slice work is 7x smaller than per-tap.
        cols = [pref[:, :, _COL_OFF - _PAD + kx:_COL_OFF - _PAD + kx + w]
                for kx in range(_KS)]
        rows = []
        for ky in range(_KS):
            y0 = _ROW_OFF - _PAD + ky
            s = None
            for kx in range(_KS):
                tap = w_ref[plane_idx * _KS * _KS + ky * _KS + kx]   # SMEM scalar
                term = cols[kx][:, y0:y0 + h, :] * tap
                s = term if s is None else s + term
            rows.append(s)                       # independent per-row partials
        return _tree_sum(rows)

    z = conv_plane(pmax_ref, 0) + conv_plane(pmean_ref, 1) + b_ref[0]

    # sigmoid: exp on the EUP; exact reciprocal keeps the self-test tight.
    scale = 1.0 / (1.0 + jnp.exp(-z))            # (bt, h, w)

    # Gate: read x directly (no un-pad slice), broadcast over channels, store once.
    o_ref[...] = (xf * scale[:, None, :, :]).astype(o_ref.dtype)


def _plan_blocks(B, C, H, W, itemsize):
    """Pick the per-step batch block Bt and an explicit VMEM budget."""
    def per_step_bytes(bt):
        io_block = bt * C * H * W * itemsize
        pipelined = 2 * 2 * io_block                      # in + out, double-buffered
        sb, sh, sw = _scratch_shape(bt, H, W)
        padded = sb * (-(-sh // 8) * 8) * (-(-sw // 128) * 128) * 4
        working = 2 * bt * C * H * W * 4                  # f32 working copies in-body
        return pipelined + 2 * padded + working

    budget = 24 * 1024 * 1024
    bt = 1
    for cand in range(1, B + 1):
        if B % cand:
            continue
        # keep >= 2 grid steps when B >= 2 so both v7x TensorCores stay busy.
        if per_step_bytes(cand) <= budget and (B == 1 or B // cand >= 2):
            bt = cand
    need = per_step_bytes(bt)
    # Explicit scoped-VMEM limit (v7x physical VMEM is only 64 MiB).
    vmem_limit = int(max(32 * 1024 * 1024, min(need + (8 << 20), 120 * 1024 * 1024)))
    return bt, vmem_limit


def attention_gate_forward(x, conv_w, gamma, beta, running_mean, running_var,
                           eps=1e-5):
    """AttentionGate forward: x * sigmoid(BN(conv7x7(ZPool(x)))), eval-mode BN."""
    B, C, H, W = x.shape
    assert conv_w.shape == (1, 2, _KS, _KS)

    # Fold eval-mode BatchNorm2d(1) into the conv:  BN(conv(.)) = a*conv(.) + b.
    a = (gamma / jnp.sqrt(running_var + eps)).astype(jnp.float32)           # (1,)
    w_folded = (conv_w[0].astype(jnp.float32) * a[0]).reshape(-1)           # (98,)
    b_folded = (beta.astype(jnp.float32)
                - running_mean.astype(jnp.float32) * a).reshape(1)          # (1,)

    bt, vmem_limit = _plan_blocks(B, C, H, W, x.dtype.itemsize)

    return pl.pallas_call(
        _attention_gate_kernel,
        out_shape=jax.ShapeDtypeStruct((B, C, H, W), x.dtype),
        grid_spec=pltpu.PrefetchScalarGridSpec(
            num_scalar_prefetch=0,
            grid=(B // bt,),
            in_specs=[
                # x consumed unpadded/untransformed: one HBM read of x, one HBM
                # write of the output, nothing else.  Last two block dims equal
                # the full array dims, so any H, W satisfies the (8,128) rule.
                pl.BlockSpec((bt, C, H, W), lambda b: (b, 0, 0, 0)),
                pl.BlockSpec(memory_space=pltpu.MemorySpace.SMEM),   # 98 folded taps
                pl.BlockSpec(memory_space=pltpu.MemorySpace.SMEM),   # folded bias
            ],
            out_specs=pl.BlockSpec((bt, C, H, W), lambda b: (b, 0, 0, 0)),
            scratch_shapes=[
                pltpu.VMEM(_scratch_shape(bt, H, W), jnp.float32),   # padded max-plane
                pltpu.VMEM(_scratch_shape(bt, H, W), jnp.float32),   # padded mean-plane
            ],
        ),
        compiler_params=pltpu.CompilerParams(
            dimension_semantics=("parallel",),        # batch blocks -> megacore
            vmem_limit_bytes=vmem_limit,
        ),
    )(x, w_folded, b_folded)


class AttentionGate:
    """Mirror of the PyTorch module: ZPool -> Conv2d(2,1,7,p=3) -> BN -> sigmoid -> x*scale."""

    def __init__(self, bn=True, key=None):
        if key is None:
            key = jax.random.PRNGKey(0)
        fan_in = 2 * _KS * _KS
        self.weight = (jax.random.normal(key, (1, 2, _KS, _KS), jnp.float32)
                       * (1.0 / fan_in ** 0.5))
        self.bn = bn
        self.eps = 1e-5
        self.gamma = jnp.ones((1,), jnp.float32)
        self.beta = jnp.zeros((1,), jnp.float32)
        self.running_mean = jnp.zeros((1,), jnp.float32)
        self.running_var = jnp.ones((1,), jnp.float32)
        # TODO(synk): training-mode BatchNorm (batch statistics + running-stat
        # updates) is not implemented; eval-mode running stats are folded in.

    def __call__(self, x):
        if self.bn:
            return attention_gate_forward(x, self.weight, self.gamma, self.beta,
                                          self.running_mean, self.running_var,
                                          eps=self.eps)
        ones = jnp.ones((1,), jnp.float32)
        zeros = jnp.zeros((1,), jnp.float32)
        return attention_gate_forward(x, self.weight, ones, zeros, zeros, ones,
                                      eps=0.0)


def _reference_attention_gate(x, conv_w, gamma, beta, running_mean, running_var,
                              eps=1e-5):
    """Pure-JAX (XLA) reference for the eval-mode AttentionGate forward."""
    xmax = jnp.max(x, axis=1, keepdims=True)
    xmean = jnp.mean(x, axis=1, keepdims=True)
    xc = jnp.concatenate([xmax, xmean], axis=1)            # (B, 2, H, W)
    z = lax.conv_general_dilated(
        xc, conv_w, window_strides=(1, 1),
        padding=((_PAD, _PAD), (_PAD, _PAD)),
        dimension_numbers=("NCHW", "OIHW", "NCHW"),
        precision=lax.Precision.HIGHEST)                    # (B, 1, H, W)
    a = gamma / jnp.sqrt(running_var + eps)
    z = a.reshape(1, 1, 1, 1) * z + (beta - running_mean * a).reshape(1, 1, 1, 1)
    return x * jax.nn.sigmoid(z)


if __name__ == "__main__":
    root = jax.random.PRNGKey(0)
    kx, kw, kg, kb, km, kv = jax.random.split(root, 6)

    B, C, H, W = 2, 4, 16, 16
    x = jax.random.normal(kx, (B, C, H, W), dtype=jnp.float32)

    gate = AttentionGate(bn=True, key=kw)
    # Non-trivial (as-if-trained) BN statistics so the wrapper fold is exercised.
    gate.gamma = 1.0 + 0.1 * jax.random.normal(kg, (1,), dtype=jnp.float32)
    gate.beta = 0.1 * jax.random.normal(kb, (1,), dtype=jnp.float32)
    gate.running_mean = 0.1 * jax.random.normal(km, (1,), dtype=jnp.float32)
    gate.running_var = 1.0 + 0.1 * jnp.abs(jax.random.normal(kv, (1,), dtype=jnp.float32))

    out = jax.block_until_ready(gate(x))

    ref = _reference_attention_gate(x, gate.weight, gate.gamma, gate.beta,
                                    gate.running_mean, gate.running_var,
                                    gate.eps)
    assert out.shape == (B, C, H, W)
    assert out.dtype == jnp.float32
    max_err = float(jnp.max(jnp.abs(out - ref)))
    assert jnp.allclose(out, ref, rtol=1e-4, atol=1e-5), f"max abs err {max_err}"

    print("KERNEL_OK")
</pallas_src>

<mosaic_0001>
module attributes {stable_mosaic.version = 11 : i64} {
  func.func @_attention_gate_kernel(%arg0: i32, %arg1: memref<1x4x16x16xf32, #tpu.memory_space<vmem>>, %arg2: memref<98xf32, #tpu.memory_space<smem>>, %arg3: memref<1xf32, #tpu.memory_space<smem>>, %arg4: memref<1x4x16x16xf32, #tpu.memory_space<vmem>>, %arg5: memref<1x27x147xf32, #tpu.memory_space<vmem>>, %arg6: memref<1x27x147xf32, #tpu.memory_space<vmem>>) attributes {dimension_semantics = [#tpu.dimension_semantics<parallel>], iteration_bounds = array<i64: 2>, scalar_prefetch = 0 : i64, scratch_operands = 2 : i64, tpu.core_type = #tpu.core_type<tc>, window_params = [{transform_indices = @transform_0, window_bounds = array<i64: 1, 4, 16, 16>}, {transform_indices = @transform_1, window_bounds = array<i64: 98>}, {transform_indices = @transform_2, window_bounds = array<i64: 1>}, {transform_indices = @transform_3, window_bounds = array<i64: 1, 4, 16, 16>}]} {
    %c0 = arith.constant 0 : index
    %c0_0 = arith.constant 0 : index
    %c0_1 = arith.constant 0 : index
    %c0_2 = arith.constant 0 : index
    %0 = vector.load %arg1[%c0, %c0_0, %c0_1, %c0_2] : memref<1x4x16x16xf32, #tpu.memory_space<vmem>>, vector<1x4x16x16xf32>
    %cst = arith.constant dense<0xFF800000> : vector<1x16x16xf32>
    %1 = vector.multi_reduction <maximumf>, %0, %cst [1] : vector<1x4x16x16xf32> to vector<1x16x16xf32>
    %cst_3 = arith.constant dense<0.000000e+00> : vector<1x16x16xf32>
    %2 = vector.multi_reduction <add>, %0, %cst_3 [1] : vector<1x4x16x16xf32> to vector<1x16x16xf32>
    %cst_4 = arith.constant 4.000000e+00 : f32
    %3 = vector.broadcast %cst_4 : f32 to vector<1x16x16xf32>
    %4 = arith.divf %2, %3 : vector<1x16x16xf32>
    %cst_5 = arith.constant 0.000000e+00 : f32
    %5 = vector.broadcast %cst_5 : f32 to vector<1x27x147xf32>
    %c0_6 = arith.constant 0 : index
    %c0_7 = arith.constant 0 : index
    %c0_8 = arith.constant 0 : index
    %6 = vector.load %arg5[%c0_6, %c0_7, %c0_8] : memref<1x27x147xf32, #tpu.memory_space<vmem>>, vector<1x27x147xf32>
    tpu.vector_store %arg5[%c0_6, %c0_7, %c0_8], %5 {strides = array<i32>} : memref<1x27x147xf32, #tpu.memory_space<vmem>>, vector<1x27x147xf32>,
    %cst_9 = arith.constant 0.000000e+00 : f32
    %7 = vector.broadcast %cst_9 : f32 to vector<1x27x147xf32>
    %c0_10 = arith.constant 0 : index
    %c0_11 = arith.constant 0 : index
    %c0_12 = arith.constant 0 : index
    %8 = vector.load %arg6[%c0_10, %c0_11, %c0_12] : memref<1x27x147xf32, #tpu.memory_space<vmem>>, vector<1x27x147xf32>
    tpu.vector_store %arg6[%c0_10, %c0_11, %c0_12], %7 {strides = array<i32>} : memref<1x27x147xf32, #tpu.memory_space<vmem>>, vector<1x27x147xf32>,
    %c0_13 = arith.constant 0 : index
    %c8 = arith.constant 8 : index
    %c128 = arith.constant 128 : index
    %9 = vector.load %arg5[%c0_13, %c8, %c128] : memref<1x27x147xf32, #tpu.memory_space<vmem>>, vector<1x16x16xf32>
    tpu.vector_store %arg5[%c0_13, %c8, %c128], %1 {strides = array<i32>} : memref<1x27x147xf32, #tpu.memory_space<vmem>>, vector<1x16x16xf32>,
    %c0_14 = arith.constant 0 : index
    %c8_15 = arith.constant 8 : index
    %c128_16 = arith.constant 128 : index
    %10 = vector.load %arg6[%c0_14, %c8_15, %c128_16] : memref<1x27x147xf32, #tpu.memory_space<vmem>>, vector<1x16x16xf32>
    tpu.vector_store %arg6[%c0_14, %c8_15, %c128_16], %4 {strides = array<i32>} : memref<1x27x147xf32, #tpu.memory_space<vmem>>, vector<1x16x16xf32>,
    %c0_17 = arith.constant 0 : index
    %c0_18 = arith.constant 0 : index
    %c125 = arith.constant 125 : index
    %11 = vector.load %arg5[%c0_17, %c0_18, %c125] : memref<1x27x147xf32, #tpu.memory_space<vmem>>, vector<1x27x16xf32>
    %c0_19 = arith.constant 0 : index
    %c0_20 = arith.constant 0 : index
    %c126 = arith.constant 126 : index
    %12 = vector.load %arg5[%c0_19, %c0_20, %c126] : memref<1x27x147xf32, #tpu.memory_space<vmem>>, vector<1x27x16xf32>
    %c0_21 = arith.constant 0 : index
    %c0_22 = arith.constant 0 : index
    %c127 = arith.constant 127 : index
    %13 = vector.load %arg5[%c0_21, %c0_22, %c127] : memref<1x27x147xf32, #tpu.memory_space<vmem>>, vector<1x27x16xf32>
    %c0_23 = arith.constant 0 : index
    %c0_24 = arith.constant 0 : index
    %c128_25 = arith.constant 128 : index
    %14 = vector.load %arg5[%c0_23, %c0_24, %c128_25] : memref<1x27x147xf32, #tpu.memory_space<vmem>>, vector<1x27x16xf32>
    %c0_26 = arith.constant 0 : index
    %c0_27 = arith.constant 0 : index
    %c129 = arith.constant 129 : index
    %15 = vector.load %arg5[%c0_26, %c0_27, %c129] : memref<1x27x147xf32, #tpu.memory_space<vmem>>, vector<1x27x16xf32>
    %c0_28 = arith.constant 0 : index
    %c0_29 = arith.constant 0 : index
    %c130 = arith.constant 130 : index
    %16 = vector.load %arg5[%c0_28, %c0_29, %c130] : memref<1x27x147xf32, #tpu.memory_space<vmem>>, vector<1x27x16xf32>
    %c0_30 = arith.constant 0 : index
    %c0_31 = arith.constant 0 : index
    %c131 = arith.constant 131 : index
    %17 = vector.load %arg5[%c0_30, %c0_31, %c131] : memref<1x27x147xf32, #tpu.memory_space<vmem>>, vector<1x27x16xf32>
    %c0_32 = arith.constant 0 : index
    %18 = memref.load %arg2[%c0_32] : memref<98xf32, #tpu.memory_space<smem>>
    %19 = vector.extract_strided_slice %11 {offsets = [0, 5, 0], sizes = [1, 16, 16], strides = [1, 1, 1]} : vector<1x27x16xf32> to vector<1x16x16xf32>
    %20 = vector.broadcast %18 : f32 to vector<1x16x16xf32>
    %21 = arith.mulf %19, %20 : vector<1x16x16xf32>
    %c1 = arith.constant 1 : index
    %22 = memref.load %arg2[%c1] : memref<98xf32, #tpu.memory_space<smem>>
    %23 = vector.extract_strided_slice %12 {offsets = [0, 5, 0], sizes = [1, 16, 16], strides = [1, 1, 1]} : vector<1x27x16xf32> to vector<1x16x16xf32>
    %24 = vector.broadcast %22 : f32 to vector<1x16x16xf32>
    %25 = arith.mulf %23, %24 : vector<1x16x16xf32>
    %26 = arith.addf %21, %25 : vector<1x16x16xf32>
    %c2 = arith.constant 2 : index
    %27 = memref.load %arg2[%c2] : memref<98xf32, #tpu.memory_space<smem>>
    %28 = vector.extract_strided_slice %13 {offsets = [0, 5, 0], sizes = [1, 16, 16], strides = [1, 1, 1]} : vector<1x27x16xf32> to vector<1x16x16xf32>
    %29 = vector.broadcast %27 : f32 to vector<1x16x16xf32>
    %30 = arith.mulf %28, %29 : vector<1x16x16xf32>
    %31 = arith.addf %26, %30 : vector<1x16x16xf32>
    %c3 = arith.constant 3 : index
    %32 = memref.load %arg2[%c3] : memref<98xf32, #tpu.memory_space<smem>>
    %33 = vector.extract_strided_slice %14 {offsets = [0, 5, 0], sizes = [1, 16, 16], strides = [1, 1, 1]} : vector<1x27x16xf32> to vector<1x16x16xf32>
    %34 = vector.broadcast %32 : f32 to vector<1x16x16xf32>
    %35 = arith.mulf %33, %34 : vector<1x16x16xf32>
    %36 = arith.addf %31, %35 : vector<1x16x16xf32>
    %c4 = arith.constant 4 : index
    %37 = memref.load %arg2[%c4] : memref<98xf32, #tpu.memory_space<smem>>
    %38 = vector.extract_strided_slice %15 {offsets = [0, 5, 0], sizes = [1, 16, 16], strides = [1, 1, 1]} : vector<1x27x16xf32> to vector<1x16x16xf32>
    %39 = vector.broadcast %37 : f32 to vector<1x16x16xf32>
    %40 = arith.mulf %38, %39 : vector<1x16x16xf32>
    %41 = arith.addf %36, %40 : vector<1x16x16xf32>
    %c5 = arith.constant 5 : index
    %42 = memref.load %arg2[%c5] : memref<98xf32, #tpu.memory_space<smem>>
    %43 = vector.extract_strided_slice %16 {offsets = [0, 5, 0], sizes = [1, 16, 16], strides = [1, 1, 1]} : vector<1x27x16xf32> to vector<1x16x16xf32>
    %44 = vector.broadcast %42 : f32 to vector<1x16x16xf32>
    %45 = arith.mulf %43, %44 : vector<1x16x16xf32>
    %46 = arith.addf %41, %45 : vector<1x16x16xf32>
    %c6 = arith.constant 6 : index
    %47 = memref.load %arg2[%c6] : memref<98xf32, #tpu.memory_space<smem>>
    %48 = vector.extract_strided_slice %17 {offsets = [0, 5, 0], sizes = [1, 16, 16], strides = [1, 1, 1]} : vector<1x27x16xf32> to vector<1x16x16xf32>
    %49 = vector.broadcast %47 : f32 to vector<1x16x16xf32>
    %50 = arith.mulf %48, %49 : vector<1x16x16xf32>
    %51 = arith.addf %46, %50 : vector<1x16x16xf32>
    %c7 = arith.constant 7 : index
    %52 = memref.load %arg2[%c7] : memref<98xf32, #tpu.memory_space<smem>>
    %53 = vector.extract_strided_slice %11 {offsets = [0, 6, 0], sizes = [1, 16, 16], strides = [1, 1, 1]} : vector<1x27x16xf32> to vector<1x16x16xf32>
    %54 = vector.broadcast %52 : f32 to vector<1x16x16xf32>
    %55 = arith.mulf %53, %54 : vector<1x16x16xf32>
    %c8_33 = arith.constant 8 : index
    %56 = memref.load %arg2[%c8_33] : memref<98xf32, #tpu.memory_space<smem>>
    %57 = vector.extract_strided_slice %12 {offsets = [0, 6, 0], sizes = [1, 16, 16], strides = [1, 1, 1]} : vector<1x27x16xf32> to vector<1x16x16xf32>
    %58 = vector.broadcast %56 : f32 to vector<1x16x16xf32>
    %59 = arith.mulf %57, %58 : vector<1x16x16xf32>
    %60 = arith.addf %55, %59 : vector<1x16x16xf32>
    %c9 = arith.constant 9 : index
    %61 = memref.load %arg2[%c9] : memref<98xf32, #tpu.memory_space<smem>>
    %62 = vector.extract_strided_slice %13 {offsets = [0, 6, 0], sizes = [1, 16, 16], strides = [1, 1, 1]} : vector<1x27x16xf32> to vector<1x16x16xf32>
    %63 = vector.broadcast %61 : f32 to vector<1x16x16xf32>
    %64 = arith.mulf %62, %63 : vector<1x16x16xf32>
    %65 = arith.addf %60, %64 : vector<1x16x16xf32>
    %c10 = arith.constant 10 : index
    %66 = memref.load %arg2[%c10] : memref<98xf32, #tpu.memory_space<smem>>
    %67 = vector.extract_strided_slice %14 {offsets = [0, 6, 0], sizes = [1, 16, 16], strides = [1, 1, 1]} : vector<1x27x16xf32> to vector<1x16x16xf32>
    %68 = vector.broadcast %66 : f32 to vector<1x16x16xf32>
    %69 = arith.mulf %67, %68 : vector<1x16x16xf32>
    %70 = arith.addf %65, %69 : vector<1x16x16xf32>
    %c11 = arith.constant 11 : index
    %71 = memref.load %arg2[%c11] : memref<98xf32, #tpu.memory_space<smem>>
    %72 = vector.extract_strided_slice %15 {offsets = [0, 6, 0], sizes = [1, 16, 16], strides = [1, 1, 1]} : vector<1x27x16xf32> to vector<1x16x16xf32>
    %73 = vector.broadcast %71 : f32 to vector<1x16x16xf32>
    %74 = arith.mulf %72, %73 : vector<1x16x16xf32>
    %75 = arith.addf %70, %74 : vector<1x16x16xf32>
    %c12 = arith.constant 12 : index
    %76 = memref.load %arg2[%c12] : memref<98xf32, #tpu.memory_space<smem>>
    %77 = vector.extract_strided_slice %16 {offsets = [0, 6, 0], sizes = [1, 16, 16], strides = [1, 1, 1]} : vector<1x27x16xf32> to vector<1x16x16xf32>
    %78 = vector.broadcast %76 : f32 to vector<1x16x16xf32>
    %79 = arith.mulf %77, %78 : vector<1x16x16xf32>
    %80 = arith.addf %75, %79 : vector<1x16x16xf32>
    %c13 = arith.constant 13 : index
    %81 = memref.load %arg2[%c13] : memref<98xf32, #tpu.memory_space<smem>>
    %82 = vector.extract_strided_slice %17 {offsets = [0, 6, 0], sizes = [1, 16, 16], strides = [1, 1, 1]} : vector<1x27x16xf32> to vector<1x16x16xf32>
    %83 = vector.broadcast %81 : f32 to vector<1x16x16xf32>
    %84 = arith.mulf %82, %83 : vector<1x16x16xf32>
    %85 = arith.addf %80, %84 : vector<1x16x16xf32>
    %c14 = arith.constant 14 : index
    %86 = memref.load %arg2[%c14] : memref<98xf32, #tpu.memory_space<smem>>
    %87 = vector.extract_strided_slice %11 {offsets = [0, 7, 0], sizes = [1, 16, 16], strides = [1, 1, 1]} : vector<1x27x16xf32> to vector<1x16x16xf32>
    %88 = vector.broadcast %86 : f32 to vector<1x16x16xf32>
    %89 = arith.mulf %87, %88 : vector<1x16x16xf32>
    %c15 = arith.constant 15 : index
    %90 = memref.load %arg2[%c15] : memref<98xf32, #tpu.memory_space<smem>>
    %91 = vector.extract_strided_slice %12 {offsets = [0, 7, 0], sizes = [1, 16, 16], strides = [1, 1, 1]} : vector<1x27x16xf32> to vector<1x16x16xf32>
    %92 = vector.broadcast %90 : f32 to vector<1x16x16xf32>
    %93 = arith.mulf %91, %92 : vector<1x16x16xf32>
    %94 = arith.addf %89, %93 : vector<1x16x16xf32>
    %c16 = arith.constant 16 : index
    %95 = memref.load %arg2[%c16] : memref<98xf32, #tpu.memory_space<smem>>
    %96 = vector.extract_strided_slice %13 {offsets = [0, 7, 0], sizes = [1, 16, 16], strides = [1, 1, 1]} : vector<1x27x16xf32> to vector<1x16x16xf32>
    %97 = vector.broadcast %95 : f32 to vector<1x16x16xf32>
    %98 = arith.mulf %96, %97 : vector<1x16x16xf32>
    %99 = arith.addf %94, %98 : vector<1x16x16xf32>
    %c17 = arith.constant 17 : index
    %100 = memref.load %arg2[%c17] : memref<98xf32, #tpu.memory_space<smem>>
    %101 = vector.extract_strided_slice %14 {offsets = [0, 7, 0], sizes = [1, 16, 16], strides = [1, 1, 1]} : vector<1x27x16xf32> to vector<1x16x16xf32>
    %102 = vector.broadcast %100 : f32 to vector<1x16x16xf32>
    %103 = arith.mulf %101, %102 : vector<1x16x16xf32>
    %104 = arith.addf %99, %103 : vector<1x16x16xf32>
    %c18 = arith.constant 18 : index
    %105 = memref.load %arg2[%c18] : memref<98xf32, #tpu.memory_space<smem>>
    %106 = vector.extract_strided_slice %15 {offsets = [0, 7, 0], sizes = [1, 16, 16], strides = [1, 1, 1]} : vector<1x27x16xf32> to vector<1x16x16xf32>
    %107 = vector.broadcast %105 : f32 to vector<1x16x16xf32>
    %108 = arith.mulf %106, %107 : vector<1x16x16xf32>
    %109 = arith.addf %104, %108 : vector<1x16x16xf32>
    %c19 = arith.constant 19 : index
    %110 = memref.load %arg2[%c19] : memref<98xf32, #tpu.memory_space<smem>>
    %111 = vector.extract_strided_slice %16 {offsets = [0, 7, 0], sizes = [1, 16, 16], strides = [1, 1, 1]} : vector<1x27x16xf32> to vector<1x16x16xf32>
    %112 = vector.broadcast %110 : f32 to vector<1x16x16xf32>
    %113 = arith.mulf %111, %112 : vector<1x16x16xf32>
    %114 = arith.addf %109, %113 : vector<1x16x16xf32>
    %c20 = arith.constant 20 : index
    %115 = memref.load %arg2[%c20] : memref<98xf32, #tpu.memory_space<smem>>
    %116 = vector.extract_strided_slice %17 {offsets = [0, 7, 0], sizes = [1, 16, 16], strides = [1, 1, 1]} : vector<1x27x16xf32> to vector<1x16x16xf32>
    %117 = vector.broadcast %115 : f32 to vector<1x16x16xf32>
    %118 = arith.mulf %116, %117 : vector<1x16x16xf32>
    %119 = arith.addf %114, %118 : vector<1x16x16xf32>
    %c21 = arith.constant 21 : index
    %120 = memref.load %arg2[%c21] : memref<98xf32, #tpu.memory_space<smem>>
    %121 = vector.extract_strided_slice %11 {offsets = [0, 8, 0], sizes = [1, 16, 16], strides = [1, 1, 1]} : vector<1x27x16xf32> to vector<1x16x16xf32>
    %122 = vector.broadcast %120 : f32 to vector<1x16x16xf32>
    %123 = arith.mulf %121, %122 : vector<1x16x16xf32>
    %c22 = arith.constant 22 : index
    %124 = memref.load %arg2[%c22] : memref<98xf32, #tpu.memory_space<smem>>
    %125 = vector.extract_strided_slice %12 {offsets = [0, 8, 0], sizes = [1, 16, 16], strides = [1, 1, 1]} : vector<1x27x16xf32> to vector<1x16x16xf32>
    %126 = vector.broadcast %124 : f32 to vector<1x16x16xf32>
    %127 = arith.mulf %125, %126 : vector<1x16x16xf32>
    %128 = arith.addf %123, %127 : vector<1x16x16xf32>
    %c23 = arith.constant 23 : index
    %129 = memref.load %arg2[%c23] : memref<98xf32, #tpu.memory_space<smem>>
    %130 = vector.extract_strided_slice %13 {offsets = [0, 8, 0], sizes = [1, 16, 16], strides = [1, 1, 1]} : vector<1x27x16xf32> to vector<1x16x16xf32>
    %131 = vector.broadcast %129 : f32 to vector<1x16x16xf32>
    %132 = arith.mulf %130, %131 : vector<1x16x16xf32>
    %133 = arith.addf %128, %132 : vector<1x16x16xf32>
    %c24 = arith.constant 24 : index
    %134 = memref.load %arg2[%c24] : memref<98xf32, #tpu.memory_space<smem>>
    %135 = vector.extract_strided_slice %14 {offsets = [0, 8, 0], sizes = [1, 16, 16], strides = [1, 1, 1]} : vector<1x27x16xf32> to vector<1x16x16xf32>
    %136 = vector.broadcast %134 : f32 to vector<1x16x16xf32>
    %137 = arith.mulf %135, %136 : vector<1x16x16xf32>
    %138 = arith.addf %133, %137 : vector<1x16x16xf32>
    %c25 = arith.constant 25 : index
    %139 = memref.load %arg2[%c25] : memref<98xf32, #tpu.memory_space<smem>>
    %140 = vector.extract_strided_slice %15 {offsets = [0, 8, 0], sizes = [1, 16, 16], strides = [1, 1, 1]} : vector<1x27x16xf32> to vector<1x16x16xf32>
    %141 = vector.broadcast %139 : f32 to vector<1x16x16xf32>
    %142 = arith.mulf %140, %141 : vector<1x16x16xf32>
    %143 = arith.addf %138, %142 : vector<1x16x16xf32>
    %c26 = arith.constant 26 : index
    %144 = memref.load %arg2[%c26] : memref<98xf32, #tpu.memory_space<smem>>
    %145 = vector.extract_strided_slice %16 {offsets = [0, 8, 0], sizes = [1, 16, 16], strides = [1, 1, 1]} : vector<1x27x16xf32> to vector<1x16x16xf32>
    %146 = vector.broadcast %144 : f32 to vector<1x16x16xf32>
    %147 = arith.mulf %145, %146 : vector<1x16x16xf32>
    %148 = arith.addf %143, %147 : vector<1x16x16xf32>
    %c27 = arith.constant 27 : index
    %149 = memref.load %arg2[%c27] : memref<98xf32, #tpu.memory_space<smem>>
    %150 = vector.extract_strided_slice %17 {offsets = [0, 8, 0], sizes = [1, 16, 16], strides = [1, 1, 1]} : vector<1x27x16xf32> to vector<1x16x16xf32>
    %151 = vector.broadcast %149 : f32 to vector<1x16x16xf32>
    %152 = arith.mulf %150, %151 : vector<1x16x16xf32>
    %153 = arith.addf %148, %152 : vector<1x16x16xf32>
    %c28 = arith.constant 28 : index
    %154 = memref.load %arg2[%c28] : memref<98xf32, #tpu.memory_space<smem>>
    %155 = vector.extract_strided_slice %11 {offsets = [0, 9, 0], sizes = [1, 16, 16], strides = [1, 1, 1]} : vector<1x27x16xf32> to vector<1x16x16xf32>
    %156 = vector.broadcast %154 : f32 to vector<1x16x16xf32>
    %157 = arith.mulf %155, %156 : vector<1x16x16xf32>
    %c29 = arith.constant 29 : index
    %158 = memref.load %arg2[%c29] : memref<98xf32, #tpu.memory_space<smem>>
    %159 = vector.extract_strided_slice %12 {offsets = [0, 9, 0], sizes = [1, 16, 16], strides = [1, 1, 1]} : vector<1x27x16xf32> to vector<1x16x16xf32>
    %160 = vector.broadcast %158 : f32 to vector<1x16x16xf32>
    %161 = arith.mulf %159, %160 : vector<1x16x16xf32>
    %162 = arith.addf %157, %161 : vector<1x16x16xf32>
    %c30 = arith.constant 30 : index
    %163 = memref.load %arg2[%c30] : memref<98xf32, #tpu.memory_space<smem>>
    %164 = vector.extract_strided_slice %13 {offsets = [0, 9, 0], sizes = [1, 16, 16], strides = [1, 1, 1]} : vector<1x27x16xf32> to vector<1x16x16xf32>
    %165 = vector.broadcast %163 : f32 to vector<1x16x16xf32>
    %166 = arith.mulf %164, %165 : vector<1x16x16xf32>
    %167 = arith.addf %162, %166 : vector<1x16x16xf32>
    %c31 = arith.constant 31 : index
    %168 = memref.load %arg2[%c31] : memref<98xf32, #tpu.memory_space<smem>>
    %169 = vector.extract_strided_slice %14 {offsets = [0, 9, 0], sizes = [1, 16, 16], strides = [1, 1, 1]} : vector<1x27x16xf32> to vector<1x16x16xf32>
    %170 = vector.broadcast %168 : f32 to vector<1x16x16xf32>
    %171 = arith.mulf %169, %170 : vector<1x16x16xf32>
    %172 = arith.addf %167, %171 : vector<1x16x16xf32>
    %c32 = arith.constant 32 : index
    %173 = memref.load %arg2[%c32] : memref<98xf32, #tpu.memory_space<smem>>
    %174 = vector.extract_strided_slice %15 {offsets = [0, 9, 0], sizes = [1, 16, 16], strides = [1, 1, 1]} : vector<1x27x16xf32> to vector<1x16x16xf32>
    %175 = vector.broadcast %173 : f32 to vector<1x16x16xf32>
    %176 = arith.mulf %174, %175 : vector<1x16x16xf32>
    %177 = arith.addf %172, %176 : vector<1x16x16xf32>
    %c33 = arith.constant 33 : index
    %178 = memref.load %arg2[%c33] : memref<98xf32, #tpu.memory_space<smem>>
    %179 = vector.extract_strided_slice %16 {offsets = [0, 9, 0], sizes = [1, 16, 16], strides = [1, 1, 1]} : vector<1x27x16xf32> to vector<1x16x16xf32>
    %180 = vector.broadcast %178 : f32 to vector<1x16x16xf32>
    %181 = arith.mulf %179, %180 : vector<1x16x16xf32>
    %182 = arith.addf %177, %181 : vector<1x16x16xf32>
    %c34 = arith.constant 34 : index
    %183 = memref.load %arg2[%c34] : memref<98xf32, #tpu.memory_space<smem>>
    %184 = vector.extract_strided_slice %17 {offsets = [0, 9, 0], sizes = [1, 16, 16], strides = [1, 1, 1]} : vector<1x27x16xf32> to vector<1x16x16xf32>
    %185 = vector.broadcast %183 : f32 to vector<1x16x16xf32>
    %186 = arith.mulf %184, %185 : vector<1x16x16xf32>
    %187 = arith.addf %182, %186 : vector<1x16x16xf32>
    %c35 = arith.constant 35 : index
    %188 = memref.load %arg2[%c35] : memref<98xf32, #tpu.memory_space<smem>>
    %189 = vector.extract_strided_slice %11 {offsets = [0, 10, 0], sizes = [1, 16, 16], strides = [1, 1, 1]} : vector<1x27x16xf32> to vector<1x16x16xf32>
    %190 = vector.broadcast %188 : f32 to vector<1x16x16xf32>
    %191 = arith.mulf %189, %190 : vector<1x16x16xf32>
    %c36 = arith.constant 36 : index
    %192 = memref.load %arg2[%c36] : memref<98xf32, #tpu.memory_space<smem>>
    %193 = vector.extract_strided_slice %12 {offsets = [0, 10, 0], sizes = [1, 16, 16], strides = [1, 1, 1]} : vector<1x27x16xf32> to vector<1x16x16xf32>
    %194 = vector.broadcast %192 : f32 to vector<1x16x16xf32>
    %195 = arith.mulf %193, %194 : vector<1x16x16xf32>
    %196 = arith.addf %191, %195 : vector<1x16x16xf32>
    %c37 = arith.constant 37 : index
    %197 = memref.load %arg2[%c37] : memref<98xf32, #tpu.memory_space<smem>>
    %198 = vector.extract_strided_slice %13 {offsets = [0, 10, 0], sizes = [1, 16, 16], strides = [1, 1, 1]} : vector<1x27x16xf32> to vector<1x16x16xf32>
    %199 = vector.broadcast %197 : f32 to vector<1x16x16xf32>
    %200 = arith.mulf %198, %199 : vector<1x16x16xf32>
    %201 = arith.addf %196, %200 : vector<1x16x16xf32>
    %c38 = arith.constant 38 : index
    %202 = memref.load %arg2[%c38] : memref<98xf32, #tpu.memory_space<smem>>
    %203 = vector.extract_strided_slice %14 {offsets = [0, 10, 0], sizes = [1, 16, 16], strides = [1, 1, 1]} : vector<1x27x16xf32> to vector<1x16x16xf32>
    %204 = vector.broadcast %202 : f32 to vector<1x16x16xf32>
    %205 = arith.mulf %203, %204 : vector<1x16x16xf32>
    %206 = arith.addf %201, %205 : vector<1x16x16xf32>
    %c39 = arith.constant 39 : index
    %207 = memref.load %arg2[%c39] : memref<98xf32, #tpu.memory_space<smem>>
    %208 = vector.extract_strided_slice %15 {offsets = [0, 10, 0], sizes = [1, 16, 16], strides = [1, 1, 1]} : vector<1x27x16xf32> to vector<1x16x16xf32>
    %209 = vector.broadcast %207 : f32 to vector<1x16x16xf32>
    %210 = arith.mulf %208, %209 : vector<1x16x16xf32>
    %211 = arith.addf %206, %210 : vector<1x16x16xf32>
    %c40 = arith.constant 40 : index
    %212 = memref.load %arg2[%c40] : memref<98xf32, #tpu.memory_space<smem>>
    %213 = vector.extract_strided_slice %16 {offsets = [0, 10, 0], sizes = [1, 16, 16], strides = [1, 1, 1]} : vector<1x27x16xf32> to vector<1x16x16xf32>
    %214 = vector.broadcast %212 : f32 to vector<1x16x16xf32>
    %215 = arith.mulf %213, %214 : vector<1x16x16xf32>
    %216 = arith.addf %211, %215 : vector<1x16x16xf32>
    %c41 = arith.constant 41 : index
    %217 = memref.load %arg2[%c41] : memref<98xf32, #tpu.memory_space<smem>>
    %218 = vector.extract_strided_slice %17 {offsets = [0, 10, 0], sizes = [1, 16, 16], strides = [1, 1, 1]} : vector<1x27x16xf32> to vector<1x16x16xf32>
    %219 = vector.broadcast %217 : f32 to vector<1x16x16xf32>
    %220 = arith.mulf %218, %219 : vector<1x16x16xf32>
    %221 = arith.addf %216, %220 : vector<1x16x16xf32>
    %c42 = arith.constant 42 : index
    %222 = memref.load %arg2[%c42] : memref<98xf32, #tpu.memory_space<smem>>
    %223 = vector.extract_strided_slice %11 {offsets = [0, 11, 0], sizes = [1, 16, 16], strides = [1, 1, 1]} : vector<1x27x16xf32> to vector<1x16x16xf32>
    %224 = vector.broadcast %222 : f32 to vector<1x16x16xf32>
    %225 = arith.mulf %223, %224 : vector<1x16x16xf32>
    %c43 = arith.constant 43 : index
    %226 = memref.load %arg2[%c43] : memref<98xf32, #tpu.memory_space<smem>>
    %227 = vector.extract_strided_slice %12 {offsets = [0, 11, 0], sizes = [1, 16, 16], strides = [1, 1, 1]} : vector<1x27x16xf32> to vector<1x16x16xf32>
    %228 = vector.broadcast %226 : f32 to vector<1x16x16xf32>
    %229 = arith.mulf %227, %228 : vector<1x16x16xf32>
    %230 = arith.addf %225, %229 : vector<1x16x16xf32>
    %c44 = arith.constant 44 : index
    %231 = memref.load %arg2[%c44] : memref<98xf32, #tpu.memory_space<smem>>
    %232 = vector.extract_strided_slice %13 {offsets = [0, 11, 0], sizes = [1, 16, 16], strides = [1, 1, 1]} : vector<1x27x16xf32> to vector<1x16x16xf32>
    %233 = vector.broadcast %231 : f32 to vector<1x16x16xf32>
    %234 = arith.mulf %232, %233 : vector<1x16x16xf32>
    %235 = arith.addf %230, %234 : vector<1x16x16xf32>
    %c45 = arith.constant 45 : index
    %236 = memref.load %arg2[%c45] : memref<98xf32, #tpu.memory_space<smem>>
    %237 = vector.extract_strided_slice %14 {offsets = [0, 11, 0], sizes = [1, 16, 16], strides = [1, 1, 1]} : vector<1x27x16xf32> to vector<1x16x16xf32>
    %238 = vector.broadcast %236 : f32 to vector<1x16x16xf32>
    %239 = arith.mulf %237, %238 : vector<1x16x16xf32>
    %240 = arith.addf %235, %239 : vector<1x16x16xf32>
    %c46 = arith.constant 46 : index
    %241 = memref.load %arg2[%c46] : memref<98xf32, #tpu.memory_space<smem>>
    %242 = vector.extract_strided_slice %15 {offsets = [0, 11, 0], sizes = [1, 16, 16], strides = [1, 1, 1]} : vector<1x27x16xf32> to vector<1x16x16xf32>
    %243 = vector.broadcast %241 : f32 to vector<1x16x16xf32>
    %244 = arith.mulf %242, %243 : vector<1x16x16xf32>
    %245 = arith.addf %240, %244 : vector<1x16x16xf32>
    %c47 = arith.constant 47 : index
    %246 = memref.load %arg2[%c47] : memref<98xf32, #tpu.memory_space<smem>>
    %247 = vector.extract_strided_slice %16 {offsets = [0, 11, 0], sizes = [1, 16, 16], strides = [1, 1, 1]} : vector<1x27x16xf32> to vector<1x16x16xf32>
    %248 = vector.broadcast %246 : f32 to vector<1x16x16xf32>
    %249 = arith.mulf %247, %248 : vector<1x16x16xf32>
    %250 = arith.addf %245, %249 : vector<1x16x16xf32>
    %c48 = arith.constant 48 : index
    %251 = memref.load %arg2[%c48] : memref<98xf32, #tpu.memory_space<smem>>
    %252 = vector.extract_strided_slice %17 {offsets = [0, 11, 0], sizes = [1, 16, 16], strides = [1, 1, 1]} : vector<1x27x16xf32> to vector<1x16x16xf32>
    %253 = vector.broadcast %251 : f32 to vector<1x16x16xf32>
    %254 = arith.mulf %252, %253 : vector<1x16x16xf32>
    %255 = arith.addf %250, %254 : vector<1x16x16xf32>
    %256 = arith.addf %51, %85 : vector<1x16x16xf32>
    %257 = arith.addf %119, %153 : vector<1x16x16xf32>
    %258 = arith.addf %187, %221 : vector<1x16x16xf32>
    %259 = arith.addf %256, %257 : vector<1x16x16xf32>
    %260 = arith.addf %258, %255 : vector<1x16x16xf32>
    %261 = arith.addf %259, %260 : vector<1x16x16xf32>
    %c0_34 = arith.constant 0 : index
    %c0_35 = arith.constant 0 : index
    %c125_36 = arith.constant 125 : index
    %262 = vector.load %arg6[%c0_34, %c0_35, %c125_36] : memref<1x27x147xf32, #tpu.memory_space<vmem>>, vector<1x27x16xf32>
    %c0_37 = arith.constant 0 : index
    %c0_38 = arith.constant 0 : index
    %c126_39 = arith.constant 126 : index
    %263 = vector.load %arg6[%c0_37, %c0_38, %c126_39] : memref<1x27x147xf32, #tpu.memory_space<vmem>>, vector<1x27x16xf32>
    %c0_40 = arith.constant 0 : index
    %c0_41 = arith.constant 0 : index
    %c127_42 = arith.constant 127 : index
    %264 = vector.load %arg6[%c0_40, %c0_41, %c127_42] : memref<1x27x147xf32, #tpu.memory_space<vmem>>, vector<1x27x16xf32>
    %c0_43 = arith.constant 0 : index
    %c0_44 = arith.constant 0 : index
    %c128_45 = arith.constant 128 : index
    %265 = vector.load %arg6[%c0_43, %c0_44, %c128_45] : memref<1x27x147xf32, #tpu.memory_space<vmem>>, vector<1x27x16xf32>
    %c0_46 = arith.constant 0 : index
    %c0_47 = arith.constant 0 : index
    %c129_48 = arith.constant 129 : index
    %266 = vector.load %arg6[%c0_46, %c0_47, %c129_48] : memref<1x27x147xf32, #tpu.memory_space<vmem>>, vector<1x27x16xf32>
    %c0_49 = arith.constant 0 : index
    %c0_50 = arith.constant 0 : index
    %c130_51 = arith.constant 130 : index
    %267 = vector.load %arg6[%c0_49, %c0_50, %c130_51] : memref<1x27x147xf32, #tpu.memory_space<vmem>>, vector<1x27x16xf32>
    %c0_52 = arith.constant 0 : index
    %c0_53 = arith.constant 0 : index
    %c131_54 = arith.constant 131 : index
    %268 = vector.load %arg6[%c0_52, %c0_53, %c131_54] : memref<1x27x147xf32, #tpu.memory_space<vmem>>, vector<1x27x16xf32>
    %c49 = arith.constant 49 : index
    %269 = memref.load %arg2[%c49] : memref<98xf32, #tpu.memory_space<smem>>
    %270 = vector.extract_strided_slice %262 {offsets = [0, 5, 0], sizes = [1, 16, 16], strides = [1, 1, 1]} : vector<1x27x16xf32> to vector<1x16x16xf32>
    %271 = vector.broadcast %269 : f32 to vector<1x16x16xf32>
    %272 = arith.mulf %270, %271 : vector<1x16x16xf32>
    %c50 = arith.constant 50 : index
    %273 = memref.load %arg2[%c50] : memref<98xf32, #tpu.memory_space<smem>>
    %274 = vector.extract_strided_slice %263 {offsets = [0, 5, 0], sizes = [1, 16, 16], strides = [1, 1, 1]} : vector<1x27x16xf32> to vector<1x16x16xf32>
    %275 = vector.broadcast %273 : f32 to vector<1x16x16xf32>
    %276 = arith.mulf %274, %275 : vector<1x16x16xf32>
    %277 = arith.addf %272, %276 : vector<1x16x16xf32>
    %c51 = arith.constant 51 : index
    %278 = memref.load %arg2[%c51] : memref<98xf32, #tpu.memory_space<smem>>
    %279 = vector.extract_strided_slice %264 {offsets = [0, 5, 0], sizes = [1, 16, 16], strides = [1, 1, 1]} : vector<1x27x16xf32> to vector<1x16x16xf32>
    %280 = vector.broadcast %278 : f32 to vector<1x16x16xf32>
    %281 = arith.mulf %279, %280 : vector<1x16x16xf32>
    %282 = arith.addf %277, %281 : vector<1x16x16xf32>
    %c52 = arith.constant 52 : index
    %283 = memref.load %arg2[%c52] : memref<98xf32, #tpu.memory_space<smem>>
    %284 = vector.extract_strided_slice %265 {offsets = [0, 5, 0], sizes = [1, 16, 16], strides = [1, 1, 1]} : vector<1x27x16xf32> to vector<1x16x16xf32>
    %285 = vector.broadcast %283 : f32 to vector<1x16x16xf32>
    %286 = arith.mulf %284, %285 : vector<1x16x16xf32>
    %287 = arith.addf %282, %286 : vector<1x16x16xf32>
    %c53 = arith.constant 53 : index
    %288 = memref.load %arg2[%c53] : memref<98xf32, #tpu.memory_space<smem>>
    %289 = vector.extract_strided_slice %266 {offsets = [0, 5, 0], sizes = [1, 16, 16], strides = [1, 1, 1]} : vector<1x27x16xf32> to vector<1x16x16xf32>
    %290 = vector.broadcast %288 : f32 to vector<1x16x16xf32>
    %291 = arith.mulf %289, %290 : vector<1x16x16xf32>
    %292 = arith.addf %287, %291 : vector<1x16x16xf32>
    %c54 = arith.constant 54 : index
    %293 = memref.load %arg2[%c54] : memref<98xf32, #tpu.memory_space<smem>>
    %294 = vector.extract_strided_slice %267 {offsets = [0, 5, 0], sizes = [1, 16, 16], strides = [1, 1, 1]} : vector<1x27x16xf32> to vector<1x16x16xf32>
    %295 = vector.broadcast %293 : f32 to vector<1x16x16xf32>
    %296 = arith.mulf %294, %295 : vector<1x16x16xf32>
    %297 = arith.addf %292, %296 : vector<1x16x16xf32>
    %c55 = arith.constant 55 : index
    %298 = memref.load %arg2[%c55] : memref<98xf32, #tpu.memory_space<smem>>
    %299 = vector.extract_strided_slice %268 {offsets = [0, 5, 0], sizes = [1, 16, 16], strides = [1, 1, 1]} : vector<1x27x16xf32> to vector<1x16x16xf32>
    %300 = vector.broadcast %298 : f32 to vector<1x16x16xf32>
    %301 = arith.mulf %299, %300 : vector<1x16x16xf32>
    %302 = arith.addf %297, %301 : vector<1x16x16xf32>
    %c56 = arith.constant 56 : index
    %303 = memref.load %arg2[%c56] : memref<98xf32, #tpu.memory_space<smem>>
    %304 = vector.extract_strided_slice %262 {offsets = [0, 6, 0], sizes = [1, 16, 16], strides = [1, 1, 1]} : vector<1x27x16xf32> to vector<1x16x16xf32>
    %305 = vector.broadcast %303 : f32 to vector<1x16x16xf32>
    %306 = arith.mulf %304, %305 : vector<1x16x16xf32>
    %c57 = arith.constant 57 : index
    %307 = memref.load %arg2[%c57] : memref<98xf32, #tpu.memory_space<smem>>
    %308 = vector.extract_strided_slice %263 {offsets = [0, 6, 0], sizes = [1, 16, 16], strides = [1, 1, 1]} : vector<1x27x16xf32> to vector<1x16x16xf32>
    %309 = vector.broadcast %307 : f32 to vector<1x16x16xf32>
    %310 = arith.mulf %308, %309 : vector<1x16x16xf32>
    %311 = arith.addf %306, %310 : vector<1x16x16xf32>
    %c58 = arith.constant 58 : index
    %312 = memref.load %arg2[%c58] : memref<98xf32, #tpu.memory_space<smem>>
    %313 = vector.extract_strided_slice %264 {offsets = [0, 6, 0], sizes = [1, 16, 16], strides = [1, 1, 1]} : vector<1x27x16xf32> to vector<1x16x16xf32>
    %314 = vector.broadcast %312 : f32 to vector<1x16x16xf32>
    %315 = arith.mulf %313, %314 : vector<1x16x16xf32>
    %316 = arith.addf %311, %315 : vector<1x16x16xf32>
    %c59 = arith.constant 59 : index
    %317 = memref.load %arg2[%c59] : memref<98xf32, #tpu.memory_space<smem>>
    %318 = vector.extract_strided_slice %265 {offsets = [0, 6, 0], sizes = [1, 16, 16], strides = [1, 1, 1]} : vector<1x27x16xf32> to vector<1x16x16xf32>
    %319 = vector.broadcast %317 : f32 to vector<1x16x16xf32>
    %320 = arith.mulf %318, %319 : vector<1x16x16xf32>
    %321 = arith.addf %316, %320 : vector<1x16x16xf32>
    %c60 = arith.constant 60 : index
    %322 = memref.load %arg2[%c60] : memref<98xf32, #tpu.memory_space<smem>>
    %323 = vector.extract_strided_slice %266 {offsets = [0, 6, 0], sizes = [1, 16, 16], strides = [1, 1, 1]} : vector<1x27x16xf32> to vector<1x16x16xf32>
    %324 = vector.broadcast %322 : f32 to vector<1x16x16xf32>
    %325 = arith.mulf %323, %324 : vector<1x16x16xf32>
    %326 = arith.addf %321, %325 : vector<1x16x16xf32>
    %c61 = arith.constant 61 : index
    %327 = memref.load %arg2[%c61] : memref<98xf32, #tpu.memory_space<smem>>
    %328 = vector.extract_strided_slice %267 {offsets = [0, 6, 0], sizes = [1, 16, 16], strides = [1, 1, 1]} : vector<1x27x16xf32> to vector<1x16x16xf32>
    %329 = vector.broadcast %327 : f32 to vector<1x16x16xf32>
    %330 = arith.mulf %328, %329 : vector<1x16x16xf32>
    %331 = arith.addf %326, %330 : vector<1x16x16xf32>
    %c62 = arith.constant 62 : index
    %332 = memref.load %arg2[%c62] : memref<98xf32, #tpu.memory_space<smem>>
    %333 = vector.extract_strided_slice %268 {offsets = [0, 6, 0], sizes = [1, 16, 16], strides = [1, 1, 1]} : vector<1x27x16xf32> to vector<1x16x16xf32>
    %334 = vector.broadcast %332 : f32 to vector<1x16x16xf32>
    %335 = arith.mulf %333, %334 : vector<1x16x16xf32>
    %336 = arith.addf %331, %335 : vector<1x16x16xf32>
    %c63 = arith.constant 63 : index
    %337 = memref.load %arg2[%c63] : memref<98xf32, #tpu.memory_space<smem>>
    %338 = vector.extract_strided_slice %262 {offsets = [0, 7, 0], sizes = [1, 16, 16], strides = [1, 1, 1]} : vector<1x27x16xf32> to vector<1x16x16xf32>
    %339 = vector.broadcast %337 : f32 to vector<1x16x16xf32>
    %340 = arith.mulf %338, %339 : vector<1x16x16xf32>
    %c64 = arith.constant 64 : index
    %341 = memref.load %arg2[%c64] : memref<98xf32, #tpu.memory_space<smem>>
    %342 = vector.extract_strided_slice %263 {offsets = [0, 7, 0], sizes = [1, 16, 16], strides = [1, 1, 1]} : vector<1x27x16xf32> to vector<1x16x16xf32>
    %343 = vector.broadcast %341 : f32 to vector<1x16x16xf32>
    %344 = arith.mulf %342, %343 : vector<1x16x16xf32>
    %345 = arith.addf %340, %344 : vector<1x16x16xf32>
    %c65 = arith.constant 65 : index
    %346 = memref.load %arg2[%c65] : memref<98xf32, #tpu.memory_space<smem>>
    %347 = vector.extract_strided_slice %264 {offsets = [0, 7, 0], sizes = [1, 16, 16], strides = [1, 1, 1]} : vector<1x27x16xf32> to vector<1x16x16xf32>
    %348 = vector.broadcast %346 : f32 to vector<1x16x16xf32>
    %349 = arith.mulf %347, %348 : vector<1x16x16xf32>
    %350 = arith.addf %345, %349 : vector<1x16x16xf32>
    %c66 = arith.constant 66 : index
    %351 = memref.load %arg2[%c66] : memref<98xf32, #tpu.memory_space<smem>>
    %352 = vector.extract_strided_slice %265 {offsets = [0, 7, 0], sizes = [1, 16, 16], strides = [1, 1, 1]} : vector<1x27x16xf32> to vector<1x16x16xf32>
    %353 = vector.broadcast %351 : f32 to vector<1x16x16xf32>
    %354 = arith.mulf %352, %353 : vector<1x16x16xf32>
    %355 = arith.addf %350, %354 : vector<1x16x16xf32>
    %c67 = arith.constant 67 : index
    %356 = memref.load %arg2[%c67] : memref<98xf32, #tpu.memory_space<smem>>
    %357 = vector.extract_strided_slice %266 {offsets = [0, 7, 0], sizes = [1, 16, 16], strides = [1, 1, 1]} : vector<1x27x16xf32> to vector<1x16x16xf32>
    %358 = vector.broadcast %356 : f32 to vector<1x16x16xf32>
    %359 = arith.mulf %357, %358 : vector<1x16x16xf32>
    %360 = arith.addf %355, %359 : vector<1x16x16xf32>
    %c68 = arith.constant 68 : index
    %361 = memref.load %arg2[%c68] : memref<98xf32, #tpu.memory_space<smem>>
    %362 = vector.extract_strided_slice %267 {offsets = [0, 7, 0], sizes = [1, 16, 16], strides = [1, 1, 1]} : vector<1x27x16xf32> to vector<1x16x16xf32>
    %363 = vector.broadcast %361 : f32 to vector<1x16x16xf32>
    %364 = arith.mulf %362, %363 : vector<1x16x16xf32>
    %365 = arith.addf %360, %364 : vector<1x16x16xf32>
    %c69 = arith.constant 69 : index
    %366 = memref.load %arg2[%c69] : memref<98xf32, #tpu.memory_space<smem>>
    %367 = vector.extract_strided_slice %268 {offsets = [0, 7, 0], sizes = [1, 16, 16], strides = [1, 1, 1]} : vector<1x27x16xf32> to vector<1x16x16xf32>
    %368 = vector.broadcast %366 : f32 to vector<1x16x16xf32>
    %369 = arith.mulf %367, %368 : vector<1x16x16xf32>
    %370 = arith.addf %365, %369 : vector<1x16x16xf32>
    %c70 = arith.constant 70 : index
    %371 = memref.load %arg2[%c70] : memref<98xf32, #tpu.memory_space<smem>>
    %372 = vector.extract_strided_slice %262 {offsets = [0, 8, 0], sizes = [1, 16, 16], strides = [1, 1, 1]} : vector<1x27x16xf32> to vector<1x16x16xf32>
    %373 = vector.broadcast %371 : f32 to vector<1x16x16xf32>
    %374 = arith.mulf %372, %373 : vector<1x16x16xf32>
    %c71 = arith.constant 71 : index
    %375 = memref.load %arg2[%c71] : memref<98xf32, #tpu.memory_space<smem>>
    %376 = vector.extract_strided_slice %263 {offsets = [0, 8, 0], sizes = [1, 16, 16], strides = [1, 1, 1]} : vector<1x27x16xf32> to vector<1x16x16xf32>
    %377 = vector.broadcast %375 : f32 to vector<1x16x16xf32>
    %378 = arith.mulf %376, %377 : vector<1x16x16xf32>
    %379 = arith.addf %374, %378 : vector<1x16x16xf32>
    %c72 = arith.constant 72 : index
    %380 = memref.load %arg2[%c72] : memref<98xf32, #tpu.memory_space<smem>>
    %381 = vector.extract_strided_slice %264 {offsets = [0, 8, 0], sizes = [1, 16, 16], strides = [1, 1, 1]} : vector<1x27x16xf32> to vector<1x16x16xf32>
    %382 = vector.broadcast %380 : f32 to vector<1x16x16xf32>
    %383 = arith.mulf %381, %382 : vector<1x16x16xf32>
    %384 = arith.addf %379, %383 : vector<1x16x16xf32>
    %c73 = arith.constant 73 : index
    %385 = memref.load %arg2[%c73] : memref<98xf32, #tpu.memory_space<smem>>
    %386 = vector.extract_strided_slice %265 {offsets = [0, 8, 0], sizes = [1, 16, 16], strides = [1, 1, 1]} : vector<1x27x16xf32> to vector<1x16x16xf32>
    %387 = vector.broadcast %385 : f32 to vector<1x16x16xf32>
    %388 = arith.mulf %386, %387 : vector<1x16x16xf32>
    %389 = arith.addf %384, %388 : vector<1x16x16xf32>
    %c74 = arith.constant 74 : index
    %390 = memref.load %arg2[%c74] : memref<98xf32, #tpu.memory_space<smem>>
    %391 = vector.extract_strided_slice %266 {offsets = [0, 8, 0], sizes = [1, 16, 16], strides = [1, 1, 1]} : vector<1x27x16xf32> to vector<1x16x16xf32>
    %392 = vector.broadcast %390 : f32 to vector<1x16x16xf32>
    %393 = arith.mulf %391, %392 : vector<1x16x16xf32>
    %394 = arith.addf %389, %393 : vector<1x16x16xf32>
    %c75 = arith.constant 75 : index
    %395 = memref.load %arg2[%c75] : memref<98xf32, #tpu.memory_space<smem>>
    %396 = vector.extract_strided_slice %267 {offsets = [0, 8, 0], sizes = [1, 16, 16], strides = [1, 1, 1]} : vector<1x27x16xf32> to vector<1x16x16xf32>
    %397 = vector.broadcast %395 : f32 to vector<1x16x16xf32>
    %398 = arith.mulf %396, %397 : vector<1x16x16xf32>
    %399 = arith.addf %394, %398 : vector<1x16x16xf32>
    %c76 = arith.constant 76 : index
    %400 = memref.load %arg2[%c76] : memref<98xf32, #tpu.memory_space<smem>>
    %401 = vector.extract_strided_slice %268 {offsets = [0, 8, 0], sizes = [1, 16, 16], strides = [1, 1, 1]} : vector<1x27x16xf32> to vector<1x16x16xf32>
    %402 = vector.broadcast %400 : f32 to vector<1x16x16xf32>
    %403 = arith.mulf %401, %402 : vector<1x16x16xf32>
    %404 = arith.addf %399, %403 : vector<1x16x16xf32>
    %c77 = arith.constant 77 : index
    %405 = memref.load %arg2[%c77] : memref<98xf32, #tpu.memory_space<smem>>
    %406 = vector.extract_strided_slice %262 {offsets = [0, 9, 0], sizes = [1, 16, 16], strides = [1, 1, 1]} : vector<1x27x16xf32> to vector<1x16x16xf32>
    %407 = vector.broadcast %405 : f32 to vector<1x16x16xf32>
    %408 = arith.mulf %406, %407 : vector<1x16x16xf32>
    %c78 = arith.constant 78 : index
    %409 = memref.load %arg2[%c78] : memref<98xf32, #tpu.memory_space<smem>>
    %410 = vector.extract_strided_slice %263 {offsets = [0, 9, 0], sizes = [1, 16, 16], strides = [1, 1, 1]} : vector<1x27x16xf32> to vector<1x16x16xf32>
    %411 = vector.broadcast %409 : f32 to vector<1x16x16xf32>
    %412 = arith.mulf %410, %411 : vector<1x16x16xf32>
    %413 = arith.addf %408, %412 : vector<1x16x16xf32>
    %c79 = arith.constant 79 : index
    %414 = memref.load %arg2[%c79] : memref<98xf32, #tpu.memory_space<smem>>
    %415 = vector.extract_strided_slice %264 {offsets = [0, 9, 0], sizes = [1, 16, 16], strides = [1, 1, 1]} : vector<1x27x16xf32> to vector<1x16x16xf32>
    %416 = vector.broadcast %414 : f32 to vector<1x16x16xf32>
    %417 = arith.mulf %415, %416 : vector<1x16x16xf32>
    %418 = arith.addf %413, %417 : vector<1x16x16xf32>
    %c80 = arith.constant 80 : index
    %419 = memref.load %arg2[%c80] : memref<98xf32, #tpu.memory_space<smem>>
    %420 = vector.extract_strided_slice %265 {offsets = [0, 9, 0], sizes = [1, 16, 16], strides = [1, 1, 1]} : vector<1x27x16xf32> to vector<1x16x16xf32>
    %421 = vector.broadcast %419 : f32 to vector<1x16x16xf32>
    %422 = arith.mulf %420, %421 : vector<1x16x16xf32>
    %423 = arith.addf %418, %422 : vector<1x16x16xf32>
    %c81 = arith.constant 81 : index
    %424 = memref.load %arg2[%c81] : memref<98xf32, #tpu.memory_space<smem>>
    %425 = vector.extract_strided_slice %266 {offsets = [0, 9, 0], sizes = [1, 16, 16], strides = [1, 1, 1]} : vector<1x27x16xf32> to vector<1x16x16xf32>
    %426 = vector.broadcast %424 : f32 to vector<1x16x16xf32>
    %427 = arith.mulf %425, %426 : vector<1x16x16xf32>
    %428 = arith.addf %423, %427 : vector<1x16x16xf32>
    %c82 = arith.constant 82 : index
    %429 = memref.load %arg2[%c82] : memref<98xf32, #tpu.memory_space<smem>>
    %430 = vector.extract_strided_slice %267 {offsets = [0, 9, 0], sizes = [1, 16, 16], strides = [1, 1, 1]} : vector<1x27x16xf32> to vector<1x16x16xf32>
    %431 = vector.broadcast %429 : f32 to vector<1x16x16xf32>
    %432 = arith.mulf %430, %431 : vector<1x16x16xf32>
    %433 = arith.addf %428, %432 : vector<1x16x16xf32>
    %c83 = arith.constant 83 : index
    %434 = memref.load %arg2[%c83] : memref<98xf32, #tpu.memory_space<smem>>
    %435 = vector.extract_strided_slice %268 {offsets = [0, 9, 0], sizes = [1, 16, 16], strides = [1, 1, 1]} : vector<1x27x16xf32> to vector<1x16x16xf32>
    %436 = vector.broadcast %434 : f32 to vector<1x16x16xf32>
    %437 = arith.mulf %435, %436 : vector<1x16x16xf32>
    %438 = arith.addf %433, %437 : vector<1x16x16xf32>
    %c84 = arith.constant 84 : index
    %439 = memref.load %arg2[%c84] : memref<98xf32, #tpu.memory_space<smem>>
    %440 = vector.extract_strided_slice %262 {offsets = [0, 10, 0], sizes = [1, 16, 16], strides = [1, 1, 1]} : vector<1x27x16xf32> to vector<1x16x16xf32>
    %441 = vector.broadcast %439 : f32 to vector<1x16x16xf32>
    %442 = arith.mulf %440, %441 : vector<1x16x16xf32>
    %c85 = arith.constant 85 : index
    %443 = memref.load %arg2[%c85] : memref<98xf32, #tpu.memory_space<smem>>
    %444 = vector.extract_strided_slice %263 {offsets = [0, 10, 0], sizes = [1, 16, 16], strides = [1, 1, 1]} : vector<1x27x16xf32> to vector<1x16x16xf32>
    %445 = vector.broadcast %443 : f32 to vector<1x16x16xf32>
    %446 = arith.mulf %444, %445 : vector<1x16x16xf32>
    %447 = arith.addf %442, %446 : vector<1x16x16xf32>
    %c86 = arith.constant 86 : index
    %448 = memref.load %arg2[%c86] : memref<98xf32, #tpu.memory_space<smem>>
    %449 = vector.extract_strided_slice %264 {offsets = [0, 10, 0], sizes = [1, 16, 16], strides = [1, 1, 1]} : vector<1x27x16xf32> to vector<1x16x16xf32>
    %450 = vector.broadcast %448 : f32 to vector<1x16x16xf32>
    %451 = arith.mulf %449, %450 : vector<1x16x16xf32>
    %452 = arith.addf %447, %451 : vector<1x16x16xf32>
    %c87 = arith.constant 87 : index
    %453 = memref.load %arg2[%c87] : memref<98xf32, #tpu.memory_space<smem>>
    %454 = vector.extract_strided_slice %265 {offsets = [0, 10, 0], sizes = [1, 16, 16], strides = [1, 1, 1]} : vector<1x27x16xf32> to vector<1x16x16xf32>
    %455 = vector.broadcast %453 : f32 to vector<1x16x16xf32>
    %456 = arith.mulf %454, %455 : vector<1x16x16xf32>
    %457 = arith.addf %452, %456 : vector<1x16x16xf32>
    %c88 = arith.constant 88 : index
    %458 = memref.load %arg2[%c88] : memref<98xf32, #tpu.memory_space<smem>>
    %459 = vector.extract_strided_slice %266 {offsets = [0, 10, 0], sizes = [1, 16, 16], strides = [1, 1, 1]} : vector<1x27x16xf32> to vector<1x16x16xf32>
    %460 = vector.broadcast %458 : f32 to vector<1x16x16xf32>
    %461 = arith.mulf %459, %460 : vector<1x16x16xf32>
    %462 = arith.addf %457, %461 : vector<1x16x16xf32>
    %c89 = arith.constant 89 : index
    %463 = memref.load %arg2[%c89] : memref<98xf32, #tpu.memory_space<smem>>
    %464 = vector.extract_strided_slice %267 {offsets = [0, 10, 0], sizes = [1, 16, 16], strides = [1, 1, 1]} : vector<1x27x16xf32> to vector<1x16x16xf32>
    %465 = vector.broadcast %463 : f32 to vector<1x16x16xf32>
    %466 = arith.mulf %464, %465 : vector<1x16x16xf32>
    %467 = arith.addf %462, %466 : vector<1x16x16xf32>
    %c90 = arith.constant 90 : index
    %468 = memref.load %arg2[%c90] : memref<98xf32, #tpu.memory_space<smem>>
    %469 = vector.extract_strided_slice %268 {offsets = [0, 10, 0], sizes = [1, 16, 16], strides = [1, 1, 1]} : vector<1x27x16xf32> to vector<1x16x16xf32>
    %470 = vector.broadcast %468 : f32 to vector<1x16x16xf32>
    %471 = arith.mulf %469, %470 : vector<1x16x16xf32>
    %472 = arith.addf %467, %471 : vector<1x16x16xf32>
    %c91 = arith.constant 91 : index
    %473 = memref.load %arg2[%c91] : memref<98xf32, #tpu.memory_space<smem>>
    %474 = vector.extract_strided_slice %262 {offsets = [0, 11, 0], sizes = [1, 16, 16], strides = [1, 1, 1]} : vector<1x27x16xf32> to vector<1x16x16xf32>
    %475 = vector.broadcast %473 : f32 to vector<1x16x16xf32>
    %476 = arith.mulf %474, %475 : vector<1x16x16xf32>
    %c92 = arith.constant 92 : index
    %477 = memref.load %arg2[%c92] : memref<98xf32, #tpu.memory_space<smem>>
    %478 = vector.extract_strided_slice %263 {offsets = [0, 11, 0], sizes = [1, 16, 16], strides = [1, 1, 1]} : vector<1x27x16xf32> to vector<1x16x16xf32>
    %479 = vector.broadcast %477 : f32 to vector<1x16x16xf32>
    %480 = arith.mulf %478, %479 : vector<1x16x16xf32>
    %481 = arith.addf %476, %480 : vector<1x16x16xf32>
    %c93 = arith.constant 93 : index
    %482 = memref.load %arg2[%c93] : memref<98xf32, #tpu.memory_space<smem>>
    %483 = vector.extract_strided_slice %264 {offsets = [0, 11, 0], sizes = [1, 16, 16], strides = [1, 1, 1]} : vector<1x27x16xf32> to vector<1x16x16xf32>
    %484 = vector.broadcast %482 : f32 to vector<1x16x16xf32>
    %485 = arith.mulf %483, %484 : vector<1x16x16xf32>
    %486 = arith.addf %481, %485 : vector<1x16x16xf32>
    %c94 = arith.constant 94 : index
    %487 = memref.load %arg2[%c94] : memref<98xf32, #tpu.memory_space<smem>>
    %488 = vector.extract_strided_slice %265 {offsets = [0, 11, 0], sizes = [1, 16, 16], strides = [1, 1, 1]} : vector<1x27x16xf32> to vector<1x16x16xf32>
    %489 = vector.broadcast %487 : f32 to vector<1x16x16xf32>
    %490 = arith.mulf %488, %489 : vector<1x16x16xf32>
    %491 = arith.addf %486, %490 : vector<1x16x16xf32>
    %c95 = arith.constant 95 : index
    %492 = memref.load %arg2[%c95] : memref<98xf32, #tpu.memory_space<smem>>
    %493 = vector.extract_strided_slice %266 {offsets = [0, 11, 0], sizes = [1, 16, 16], strides = [1, 1, 1]} : vector<1x27x16xf32> to vector<1x16x16xf32>
    %494 = vector.broadcast %492 : f32 to vector<1x16x16xf32>
    %495 = arith.mulf %493, %494 : vector<1x16x16xf32>
    %496 = arith.addf %491, %495 : vector<1x16x16xf32>
    %c96 = arith.constant 96 : index
    %497 = memref.load %arg2[%c96] : memref<98xf32, #tpu.memory_space<smem>>
    %498 = vector.extract_strided_slice %267 {offsets = [0, 11, 0], sizes = [1, 16, 16], strides = [1, 1, 1]} : vector<1x27x16xf32> to vector<1x16x16xf32>
    %499 = vector.broadcast %497 : f32 to vector<1x16x16xf32>
    %500 = arith.mulf %498, %499 : vector<1x16x16xf32>
    %501 = arith.addf %496, %500 : vector<1x16x16xf32>
    %c97 = arith.constant 97 : index
    %502 = memref.load %arg2[%c97] : memref<98xf32, #tpu.memory_space<smem>>
    %503 = vector.extract_strided_slice %268 {offsets = [0, 11, 0], sizes = [1, 16, 16], strides = [1, 1, 1]} : vector<1x27x16xf32> to vector<1x16x16xf32>
    %504 = vector.broadcast %502 : f32 to vector<1x16x16xf32>
    %505 = arith.mulf %503, %504 : vector<1x16x16xf32>
    %506 = arith.addf %501, %505 : vector<1x16x16xf32>
    %507 = arith.addf %302, %336 : vector<1x16x16xf32>
    %508 = arith.addf %370, %404 : vector<1x16x16xf32>
    %509 = arith.addf %438, %472 : vector<1x16x16xf32>
    %510 = arith.addf %507, %508 : vector<1x16x16xf32>
    %511 = arith.addf %509, %506 : vector<1x16x16xf32>
    %512 = arith.addf %510, %511 : vector<1x16x16xf32>
    %513 = arith.addf %261, %512 : vector<1x16x16xf32>
    %c0_55 = arith.constant 0 : index
    %514 = memref.load %arg3[%c0_55] : memref<1xf32, #tpu.memory_space<smem>>
    %515 = vector.broadcast %514 : f32 to vector<1x16x16xf32>
    %516 = arith.addf %513, %515 : vector<1x16x16xf32>
    %cst_56 = arith.constant 0.000000e+00 : f32
    %517 = vector.broadcast %cst_56 : f32 to vector<1x16x16xf32>
    %518 = arith.subf %517, %516 : vector<1x16x16xf32>
    %519 = math.exp %518 : vector<1x16x16xf32>
    %cst_57 = arith.constant 1.000000e+00 : f32
    %520 = vector.broadcast %cst_57 : f32 to vector<1x16x16xf32>
    %521 = arith.addf %520, %519 : vector<1x16x16xf32>
    %cst_58 = arith.constant 1.000000e+00 : f32
    %522 = vector.broadcast %cst_58 : f32 to vector<1x16x16xf32>
    %523 = arith.divf %522, %521 : vector<1x16x16xf32>
    %524 = vector.shape_cast %523 : vector<1x16x16xf32> to vector<1x1x16x16xf32>
    %525 = vector.broadcast %524 : vector<1x1x16x16xf32> to vector<1x4x16x16xf32>
    %526 = arith.mulf %0, %525 : vector<1x4x16x16xf32>
    %c0_59 = arith.constant 0 : index
    %c0_60 = arith.constant 0 : index
    %c0_61 = arith.constant 0 : index
    %c0_62 = arith.constant 0 : index
    %527 = vector.load %arg4[%c0_59, %c0_60, %c0_61, %c0_62] : memref<1x4x16x16xf32, #tpu.memory_space<vmem>>, vector<1x4x16x16xf32>
    tpu.vector_store %arg4[%c0_59, %c0_60, %c0_61, %c0_62], %526 {strides = array<i32>} : memref<1x4x16x16xf32, #tpu.memory_space<vmem>>, vector<1x4x16x16xf32>,
    return
  }
  func.func @transform_0(%arg0: i32) -> (i32, i32, i32, i32) {
    %c0_i32 = arith.constant 0 : i32
    %c0_i32_0 = arith.constant 0 : i32
    %c0_i32_1 = arith.constant 0 : i32
    %c0_i32_2 = arith.constant 0 : i32
    return %arg0, %c0_i32, %c0_i32_0, %c0_i32_1 : i32, i32, i32, i32
  }
  func.func @transform_1(%arg0: i32) -> i32 {
    %c0_i32 = arith.constant 0 : i32
    %c0_i32_0 = arith.constant 0 : i32
    return %c0_i32 : i32
  }
  func.func @transform_2(%arg0: i32) -> i32 {
    %c0_i32 = arith.constant 0 : i32
    %c0_i32_0 = arith.constant 0 : i32
    return %c0_i32 : i32
  }
  func.func @transform_3(%arg0: i32) -> (i32, i32, i32, i32) {
    %c0_i32 = arith.constant 0 : i32
    %c0_i32_0 = arith.constant 0 : i32
    %c0_i32_1 = arith.constant 0 : i32
    %c0_i32_2 = arith.constant 0 : i32
    return %arg0, %c0_i32, %c0_i32_0, %c0_i32_1 : i32, i32, i32, i32
  }
}

</mosaic_0001>

<bundles_post_ra>
// kernel: tpu_custom_call.1
= control target key start
LH: loop header
LB: loop body
LE: loop exit
PB: predicated region body
PF: predicated region fallthrough
CT: control target
= control target key end

     0   :  { %s6026_s0 = inlined_call_operand.hbm [shape: f32[2,4,16,16], index: 0, kind: input, shape index: {}]   ;;  %s6027_s1 = inlined_call_operand.vmem [shape: f32[98], index: 1, kind: input, shape index: {}]   ;;  %s6028_s2 = inlined_call_operand.<no memory space> [shape: f32[1], index: 2, kind: input, shape index: {}]   ;;  %s6029_s3 = inlined_call_operand.hbm [shape: f32[2,4,16,16], index: 3, kind: output, shape index: {}]  }
   0x1   :  { %8 = sst [smem:[#allocation4]] %s6028_s2 }
   0x2   :  { %9 = vsyncpa [#allocation6], 0 }
   0x3   :  { %11 = vsyncpa [#allocation6 + $0x1], 0 }
   0x4   :  { %12 = vsyncpa [#allocation8], 0 }
   0x5   :  { %13 = vsyncpa [#allocation7], 0 }
   0x6   :  { %15 = vsyncpa [#allocation7 + $0x1], 0  ;;  %s3716_s14 = smov 0   ;;  %s3718_s15 = smov 0  }
   0x7   :  { %s3720_s16 = smov 0   ;;  %s3722_s17 = smov 0  }
   0x8 LB: > { %s3737_s2 = sadd.s32 4294967295, %s3677_s17   ;;  %s3330_s18 = sadd.s32 4294967294, %s3677_s17   ;;  %s3677_s17 = sphi %s3722_s17, %s6519_s17   ;;  %s3673_s16 = sphi %s3720_s16, %s6518_s16   ;;  %s3669_s15 = sphi %s3718_s15, %s6517_s15   ;;  %s3665_s14 = sphi %s3716_s14, %s6516_s14  }
   0x9   : > { %s3741_s19 = sadd.s32 1, %s3677_s17   ;;  %s28_s20 = sadd.s32 1, %s3673_s16 }
   0xa   : > { %s25_s21 = ssub.s32 %s3677_s17, %s3741_s19  ;;  %p35_p0 = scmp.ne.s32.totalorder %s3673_s16, %s3669_s15 }
   0xb   : > { %p26_p1 = scmp.eq.s32.totalorder %s25_s21, 0  ;;  %p36_p2 = scmp.eq.s32.totalorder %s3677_s17, 0 }
   0xc   : > { %p41_p3 = scmp.ne.s32.totalorder %s3669_s15, %s3665_s14  ;;  %p42_p4 = scmp.eq.s32.totalorder %s3737_s2, 0 }
   0xd   : > { %s3753_s22 = scalar_select %p26_p1, %s3673_s16, %s28_s20  }
   0xe   : > { %p3755_p5 = por %p36_p2, %p35_p0  ;;  %p3761_p6 = por %p42_p4, %p41_p3 }
   0xf   : > { %p107_p7 = scmp.eq.s32.totalorder %s3737_s2, 1  ;;  %p113_p8 = scmp.eq.s32.totalorder %s3330_s18, 1 }
  0x10   : > { %p3331_p9 = scmp.ge.s32.totalorder %s3677_s17, 1  ;;  %p120_p10 = scmp.lt.s32.totalorder %s3677_s17, 3 }
  0x11   : > { %p3768_p11 = por %p107_p7, %p35_p0  ;;  %p3772_p12 = por %p113_p8, %p41_p3 }
  0x12   : > { %p3776_p13 = pnand %p3331_p9, %p120_p10  ;;  %s132_s30 = sshll.u32 %s6027_s1, 4  ;;  %s133_s30 = int_to_ptr.vmem [resolvable:$true] %s132_s30 }
  0x13   : > { %p3466_p2 = scmp.lt.s32.totalorder %s3677_s17, 2  ;;  %s146_s4 = sand.u32 1, %s3673_s16  }
  0x14   : > { %p3453_p1 = pneg %p3776_p13  ;;  %s3334_s6 = sshll.u32 %s146_s4, 6 }
  0x15   : > { %p3792_p3 = pnand %p3466_p2, %p3755_p5  ;;  %s3679_s7 = smov [#allocation9]  }
  0x16   : > { %p3454_p7 = pnand %p3453_p1, %p42_p4  ;;  %s3443_s8 = sshll.u32 %s3677_s17, 6 }
  0x17   : > { %s150_s9 = scalar_lea.vmem [#allocation5], %s3334_s6  ;;  %s155_s13 = scalar_lea.hbm %s6026_s0, %s3443_s8 }
  0x18   : > { %3456 = dma.vmem_to_smem (!%p3454_p7), %s133_s30, 16, %s3679_s7, [#allocation8]  }
  0x19   : > { %s158_s10 = sshll.u32 %s150_s9, 4  ;;  %s156_s18 = sshll.u32 %s155_s13, 4  ;;  %s159_s10 = int_to_ptr.vmem [resolvable:$true] %s158_s10  ;;  %s157_s18 = int_to_ptr.hbm [resolvable:$true] %s156_s18 }
  0x1a   : > { %s147_s20 = scalar_lea.sflag [#allocation6], %s146_s4  ;;  %s3577_s21 = sshra.s32 %s157_s18, 4  ;;  %s3578_s21 = int_to_ptr.hbm [resolvable:$true] %s3577_s21 }
  0x1b   : > { %s3579_s23 = scalar_lea.hbm %s3578_s21, 64  ;;  %p3581_p8 = pneg %p3792_p3 }
  0x1c   : > { %p3580_p5 = scmp.ne.s32.totalorder %s3578_s21, %s3579_s23  ;;  %s3584_s30 = scalar_lea.hbm %s6026_s0, 128 }
  0x1d   : > { %p3585_p1 = scmp.lt.s32.totalorder %s3578_s21, %s6026_s0  ;;  %p3586_p2 = scmp.lt.s32.totalorder %s3584_s30, %s3579_s23 }
  0x1e   : > { %p3582_p9 = pnand %p3581_p8, %p3580_p5 }
  0x1f   : > { %p3587_p7 = por %p3586_p2, %p3585_p1 }
  0x20   : > { %p3583_p10 = pneg %p3582_p9 }
  0x22   : > { %p3588_p0 = pnand %p3587_p7, %p3583_p10 }
  0x24   : > { %3591 = shalt.err (!%p3588_p0)
}
  0x25   : > { %s3680_s4 = smov 128   ;;  %s3681_s8 = smov 8  }
  0x26   : > { %3460 = dma.hbm_to_vmem [thread:$0]  (!%p3792_p3), %s157_s18, 1024, %s159_s10, %s147_s20, %s3680_s4, %s3680_s4, %s3681_s8  }
  0x27   : > { %170 = sbr.rel (%p3776_p13) target bundleno = 1205 (0x4b5), region = 32 }
  0x2c   : > { %s3813_s9 = sand.u32 1, %s3669_s15  }
  0x2d   : > { %s3338_s11 = sshll.u32 %s3813_s9, 6  ;;  %s173_s12 = scalar_lea.sflag [#allocation6], %s3813_s9 }
  0x2e   : > { %s3819_s13 = scalar_lea.vmem [#allocation5], %s3338_s11 }
  0x2f   : > { %3652 = dma.done.wait (%p3761_p6), %s173_s12, 1024  }
  0x30   : > { %3654 = vsyncadd (%p3761_p6), %s173_s12, 4294966272 }
  0x31   : > { %3656 = dma.done.wait (%p42_p4), [#allocation8], 16  }
  0x32   : > { %3658 = vsyncadd (%p42_p4), [#allocation8], 4294967280 }
  0x33   : > { %187 = sfence }
  0x34   : > { %s3341_s27 = sld [smem:[#allocation9 + $0x1]]  ;;  %v206_v0 = vld [vmem:[%s3819_s13] sm:$0xff]  ;;  %v3682_v1 = vmov 0.0   ;;  %v207_v2 = vld [vmem:[%s3819_s13 + $0x8] sm:$0xff]  ;;  %v208_v3 = vld [vmem:[%s3819_s13 + $0x10] sm:$0xff]  ;;  %vm6145_vm0 = vcmask 130048  }
  0x35   : > { %257 = vst [vmem:[#allocation2 + $0x20] sm:$0xff] %v3682_v1  ;;  %s3831_s24 = sld [smem:[#allocation9 + $0x2]]  ;;  %v209_v4 = vld [vmem:[%s3819_s13 + $0x18] sm:$0xff]  ;;  %v210_v5 = vld [vmem:[%s3819_s13 + $0x20] sm:$0xff]  ;;  %v211_v6 = vld [vmem:[%s3819_s13 + $0x28] sm:$0xff]  ;;  %v215_v9 = vsel %vm6145_vm0, %v206_v0, -inf }
  0x36   : > { %v212_v7 = vld [vmem:[%s3819_s13 + $0x30] sm:$0xff]  ;;  %v213_v8 = vld [vmem:[%s3819_s13 + $0x38] sm:$0xff]  ;;  %v216_v10 = vsel %vm6145_vm0, %v208_v3, -inf  ;;  %v217_v11 = vsel %vm6145_vm0, %v210_v5, -inf  ;;  %v3683_v12 = vmov 4.0   ;;  %v222_v14 = vsel %vm6145_vm0, %v207_v2, -inf }
  0x37   : > { %3515 = vrcp.f32 %v3683_v12  ;;  %259 = vst [vmem:[#allocation2 + $0x30] sm:$0x7] %v3682_v1  ;;  %v219_v13 = vsel %vm6145_vm0, %v212_v7, -inf  ;;  %v223_v15 = vsel %vm6145_vm0, %v209_v4, -inf  ;;  %vm253_vm1 = vcmask 154624   ;;  %s3684_s5 = smov 127  }
  0x38   : > { %v224_v16 = vsel %vm6145_vm0, %v211_v6, -inf  ;;  %v226_v17 = vsel %vm6145_vm0, %v213_v8, -inf  ;;  %v229_v18 = vsel %vm6145_vm0, %v206_v0, 0.0  ;;  %v218_v20 = vmax.f32 %v215_v9, %v217_v11  ;;  %268 = vst [vmem:[#allocation3 + $0x30] sm:$0x7] %v3682_v1  ;;  %s3685_s10 = smov 126  }
  0x39   : > { %v220_v21 = vmax.f32 %v216_v10, %v219_v13  ;;  %v230_v22 = vsel %vm6145_vm0, %v208_v3, 0.0  ;;  %v225_v24 = vmax.f32 %v222_v14, %v224_v16  ;;  %v227_v25 = vmax.f32 %v223_v15, %v226_v17  ;;  %254 = vst.msk [vmem:[#allocation2 + $0x8] sm:$0xff] %vm253_vm1, %v3682_v1  ;;  %s3343_s18 = sld [smem:[#allocation9 + $0x3]]  ;;  %s3686_s21 = smov 125  }
  0x3a   : > { %v291_v19 = vstv %s3341_s27  ;;  %v231_v26 = vadd.f32 %v230_v22, %v229_v18  ;;  %v232_v27 = vsel %vm6145_vm0, %v210_v5, 0.0  ;;  %v236_v29 = vsel %vm6145_vm0, %v207_v2, 0.0  ;;  %256 = vst.msk [vmem:[#allocation2 + $0x18] sm:$0xff] %vm253_vm1, %v3682_v1  ;;  %s3344_s20 = sld [smem:[#allocation9 + $0x4]]  ;;  %s3687_s28 = smov 124  }
  0x3b   : > { %v296_v23 = vmul.f32 0.0, %v291_v19  ;;  %v237_v30 = vsel %vm6145_vm0, %v209_v4, 0.0  ;;  %v239_v31 = vsel %vm6145_vm0, %v211_v6, 0.0  ;;  %v333_v32 = vstv %s3831_s24  ;;  %258 = vst.msk [vmem:[#allocation2 + $0x28] sm:$0xff] %vm253_vm1, %v3682_v1  ;;  %s3345_s23 = sld [smem:[#allocation9 + $0x5]]  ;;  %s3688_s30 = smov 123  }
  0x3c   : > { %v221_v33 = vmax.f32 %v218_v20, %v220_v21  ;;  %v238_v34 = vadd.f32 %v237_v30, %v236_v29  ;;  %v228_v36 = vmax.f32 %v225_v24, %v227_v25  ;;  %v233_v37 = vadd.f32 %v232_v27, %v231_v26  ;;  %265 = vst.msk [vmem:[#allocation3 + $0x18] sm:$0xff] %vm253_vm1, %v3682_v1  ;;  %s3346_s29 = sld [smem:[#allocation9 + $0x6]]  ;;  %s3689_s7 = smov 122  }
  0x3d   : > { %v3516_v28 = vpop.eup %3515  ;;  %312 = vrot.lane.b32.xlu2 %v296_v23, %s3684_s5  ;;  %308 = vrot.lane.b32.xlu1 %v296_v23, %s3684_s5  ;;  %v234_v38 = vsel %vm6145_vm0, %v212_v7, 0.0  ;;  %v241_v40 = vsel %vm6145_vm0, %v213_v8, 0.0  ;;  %v336_v42 = vmul.f32 0.0, %v333_v32  ;;  %267 = vst.msk [vmem:[#allocation3 + $0x28] sm:$0xff] %vm253_vm1, %v3682_v1  ;;  %s3348_s6 = sld [smem:[#allocation9 + $0x8]]  ;;  %vm260_vm3 = vcmask 149504  }
  0x3e   : > { %304 = vrot.lane.b32.xlu0 %v296_v23, %s3684_s5  ;;  %v244_v35 = vmul.f32 4.0, %v3516_v28  ;;  %v240_v39 = vadd.f32 %v239_v31, %v238_v34  ;;  %270 = vst.msk [vmem:[#allocation2 + $0x18] sm:$0xff] %vm6145_vm0, %v221_v33  ;;  %v235_v44 = vadd.f32 %v234_v38, %v233_v37  ;;  %vm248_vm2 = vweird.f32 %v3516_v28  ;;  %s3349_s4 = sld [smem:[#allocation9 + $0x9]] }
  0x3f   : > { %271 = vst.msk [vmem:[#allocation2 + $0x28] sm:$0xff] %vm6145_vm0, %v228_v36  ;;  %v375_v59 = vstv %s3343_s18  ;;  %s3350_s8 = sld [smem:[#allocation9 + $0xa]]  ;;  %vm316_vm4 = vcmask 1039360   ;;  %vm358_vm5 = vcmask 1031168   ;;  %vm1508_vm6 = vcmask 1046528  }
  0x40   : > { %v245_v41 = vsub.f32 1.0, %v244_v35  ;;  %v242_v45 = vadd.f32 %v241_v40, %v240_v39  ;;  %v3874_v46 = vld [vmem:[#allocation2 + $0x8] sm:$0xff]  ;;  %263 = vst.msk [vmem:[#allocation3 + $0x8] sm:$0xff] %vm253_vm1, %v3682_v1  ;;  %v398_v63 = vstv %s3344_s20  ;;  %s3351_s12 = sld [smem:[#allocation9 + $0xb]]  ;;  %vm1587_vm7 = vcmask 1045504  }
  0x41   : > { %v335_v48 = vmul.f32 %v333_v32, %v3874_v46  ;;  %v293_v49 = vmul.f32 %v291_v19, %v3874_v46  ;;  %v376_v61 = vmul.f32 %v375_v59, %v3874_v46  ;;  %v399_v2 = vmul.f32 %v398_v63, %v3874_v46  ;;  %s3352_s27 = sld [smem:[#allocation9 + $0xc]]  ;;  %261 = vst.msk [vmem:[#allocation2 + $0x38] sm:$0x7] %vm260_vm3, %v3682_v1 }
  0x42   : > { %v246_v43 = vmul.f32 %v3516_v28, %v245_v41  ;;  %v421_v4 = vstv %s3345_s23  ;;  %v444_v8 = vstv %s3346_s29  ;;  %s3353_s24 = sld [smem:[#allocation9 + $0xd]]  ;;  %269 = vst.msk [vmem:[#allocation3 + $0x38] sm:$0x7] %vm260_vm3, %v3682_v1  ;;  %vm1644_vm8 = vcmask 1043456  }
  0x43   : > { %v422_v6 = vmul.f32 %v421_v4, %v3874_v46  ;;  %v445_v10 = vmul.f32 %v444_v8, %v3874_v46  ;;  %v475_v12 = vstv %s3348_s6  ;;  %s3355_s18 = sld [smem:[#allocation9 + $0xf]] }
  0x44   : > { %v247_v47 = vadd.f32 %v3516_v28, %v246_v43  ;;  %v478_v13 = vmul.f32 0.0, %v475_v12  ;;  %v477_v14 = vmul.f32 %v475_v12, %v3874_v46  ;;  %v516_v17 = vstv %s3349_s4  ;;  %s3356_s20 = sld [smem:[#allocation9 + $0x10]] }
  0x45   : > { %350 = vrot.lane.b32.xlu2 %v336_v42, %s3685_s10  ;;  %348 = vrot.lane.b32.xlu1 %v335_v48, %s3685_s10  ;;  %v3884_v53 = vld [vmem:[#allocation2 + $0x18] sm:$0xff]  ;;  %v519_v18 = vmul.f32 0.0, %v516_v17  ;;  %v557_v22 = vstv %s3350_s8  ;;  %s3357_s23 = sld [smem:[#allocation9 + $0x11]] }
  0x46   : > { %v249_v50 = vsel %vm248_vm2, %v3516_v28, %v247_v47  ;;  %306 = vrot.lane.b32.xlu0 %v293_v49, %s3684_s5  ;;  %v3887_v54 = vld [vmem:[#allocation2 + $0x28] sm:$0xff]  ;;  %v295_v56 = vmul.f32 %v291_v19, %v3884_v53  ;;  %v337_v58 = vmul.f32 %v333_v32, %v3884_v53  ;;  %v377_v62 = vmul.f32 %v375_v59, %v3884_v53  ;;  %s3358_s29 = sld [smem:[#allocation9 + $0x12]] }
  0x47   : > { %v250_v51 = vmul.f32 %v249_v50, %v235_v44  ;;  %v251_v52 = vmul.f32 %v249_v50, %v242_v45  ;;  %v297_v55 = vmul.f32 %v291_v19, %v3887_v54  ;;  %v339_v57 = vmul.f32 %v333_v32, %v3887_v54  ;;  %s3359_s6 = sld [smem:[#allocation9 + $0x13]] }
  0x48   : > { %v378_v60 = vmul.f32 %v375_v59, %v3887_v54  ;;  %v401_v0 = vmul.f32 %v398_v63, %v3887_v54  ;;  %v400_v3 = vmul.f32 %v398_v63, %v3884_v53  ;;  %v424_v5 = vmul.f32 %v421_v4, %v3887_v54  ;;  %s3360_s4 = sld [smem:[#allocation9 + $0x14]] }
  0x49   : > { %272 = vst.msk [vmem:[#allocation3 + $0x18] sm:$0xff] %vm6145_vm0, %v250_v51  ;;  %v423_v7 = vmul.f32 %v421_v4, %v3884_v53  ;;  %v447_v9 = vmul.f32 %v444_v8, %v3887_v54  ;;  %v446_v11 = vmul.f32 %v444_v8, %v3884_v53  ;;  %v481_v15 = vmul.f32 %v475_v12, %v3887_v54  ;;  %s3362_s8 = sld [smem:[#allocation9 + $0x16]] }
  0x4a   : > { %273 = vst.msk [vmem:[#allocation3 + $0x28] sm:$0xff] %vm6145_vm0, %v251_v52  ;;  %v479_v16 = vmul.f32 %v475_v12, %v3884_v53  ;;  %v518_v19 = vmul.f32 %v516_v17, %v3874_v46  ;;  %v522_v20 = vmul.f32 %v516_v17, %v3887_v54  ;;  %v520_v21 = vmul.f32 %v516_v17, %v3884_v53 }
  0x4b   : > { %v560_v24 = vmul.f32 %v557_v22, %v3887_v54  ;;  %v558_v25 = vmul.f32 %v557_v22, %v3874_v46  ;;  %v559_v26 = vmul.f32 %v557_v22, %v3884_v53  ;;  %v580_v27 = vstv %s3351_s12  ;;  %s3363_s12 = sld [smem:[#allocation9 + $0x17]] }
  0x4c   : > { %v583_v29 = vmul.f32 %v580_v27, %v3887_v54  ;;  %v581_v30 = vmul.f32 %v580_v27, %v3874_v46  ;;  %v582_v31 = vmul.f32 %v580_v27, %v3884_v53  ;;  %v603_v32 = vstv %s3352_s27  ;;  %s4075_s27 = sld [smem:[#allocation9 + $0x18]] }
  0x4d   : > { %314 = vrot.lane.b32.xlu2 %v297_v55, %s3684_s5  ;;  %310 = vrot.lane.b32.xlu1 %v295_v56, %s3684_s5  ;;  %v606_v34 = vmul.f32 %v603_v32, %v3887_v54  ;;  %v604_v35 = vmul.f32 %v603_v32, %v3874_v46  ;;  %v605_v36 = vmul.f32 %v603_v32, %v3884_v53  ;;  %v626_v37 = vstv %s3353_s24  ;;  %s3365_s24 = sld [smem:[#allocation9 + $0x19]] }
  0x4e   : > { %346 = vrot.lane.b32.xlu0 %v336_v42, %s3685_s10  ;;  %v629_v41 = vmul.f32 %v626_v37, %v3887_v54  ;;  %v628_v43 = vmul.f32 %v626_v37, %v3884_v53  ;;  %v657_v44 = vstv %s3355_s18  ;;  %s4100_s18 = sld [smem:[#allocation9 + $0x1b]] }
  0x4f   : > { %v660_v49 = vmul.f32 0.0, %v657_v44  ;;  %v659_v50 = vmul.f32 %v657_v44, %v3874_v46  ;;  %v663_v56 = vmul.f32 %v657_v44, %v3887_v54 }
  0x55   : > { %356 = vrot.lane.b32.xlu2 %v339_v57, %s3685_s10  ;;  %354 = vrot.lane.b32.xlu1 %v336_v42, %s3685_s10  ;;  %v627_v42 = vmul.f32 %v626_v37, %v3874_v46  ;;  %v661_v57 = vmul.f32 %v657_v44, %v3884_v53  ;;  %v837_v37 = vstv %s3362_s8  ;;  %s3373_s8 = sld [smem:[#allocation9 + $0x21]] }
  0x56   : > { %352 = vrot.lane.b32.xlu0 %v337_v58, %s3685_s10  ;;  %v698_v58 = vstv %s3356_s20  ;;  %v840_v44 = vmul.f32 0.0, %v837_v37  ;;  %s3366_s20 = sld [smem:[#allocation9 + $0x1a]] }
  0x57   : > { %v700_v63 = vmul.f32 %v698_v58, %v3874_v46  ;;  %v704_v4 = vmul.f32 %v698_v58, %v3887_v54 }
  0x5d   : > { %386 = vrot.lane.b32.xlu2 %v378_v60, %s3686_s21  ;;  %384 = vrot.lane.b32.xlu1 %v377_v62, %s3686_s21  ;;  %v701_v62 = vmul.f32 0.0, %v698_v58 }
  0x5e   : > { %382 = vrot.lane.b32.xlu0 %v376_v61, %s3686_s21 }
  0x65   : > { %409 = vrot.lane.b32.xlu2 %v401_v0, %s3687_s28  ;;  %407 = vrot.lane.b32.xlu1 %v400_v3, %s3687_s28 }
  0x66   : > { %405 = vrot.lane.b32.xlu0 %v399_v2, %s3687_s28 }
  0x6d   : > { %432 = vrot.lane.b32.xlu2 %v424_v5, %s3688_s30  ;;  %430 = vrot.lane.b32.xlu1 %v423_v7, %s3688_s30  ;;  %v702_v5 = vmul.f32 %v698_v58, %v3884_v53 }
  0x6e   : > { %428 = vrot.lane.b32.xlu0 %v422_v6, %s3688_s30  ;;  %v739_v6 = vstv %s3357_s23  ;;  %s3369_s23 = sld [smem:[#allocation9 + $0x1d]] }
  0x6f   : > { %v741_v12 = vmul.f32 %v739_v6, %v3884_v53 }
  0x75   : > { %455 = vrot.lane.b32.xlu2 %v447_v9, %s3689_s7  ;;  %453 = vrot.lane.b32.xlu1 %v446_v11, %s3689_s7  ;;  %v740_v11 = vmul.f32 %v739_v6, %v3874_v46 }
  0x76   : > { %451 = vrot.lane.b32.xlu0 %v445_v10, %s3689_s7  ;;  %v742_v10 = vmul.f32 %v739_v6, %v3887_v54 }
  0x7d   : > { %492 = vrot.lane.b32.xlu2 %v478_v13, %s3684_s5  ;;  %490 = vrot.lane.b32.xlu1 %v477_v14, %s3684_s5 }
  0x7e   : > { %488 = vrot.lane.b32.xlu0 %v478_v13, %s3684_s5 }
  0x85   : > { %498 = vrot.lane.b32.xlu2 %v481_v15, %s3684_s5  ;;  %496 = vrot.lane.b32.xlu1 %v478_v13, %s3684_s5  ;;  %v762_v13 = vstv %s3358_s29  ;;  %s3370_s29 = sld [smem:[#allocation9 + $0x1e]] }
  0x86   : > { %494 = vrot.lane.b32.xlu0 %v479_v16, %s3684_s5  ;;  %v765_v17 = vmul.f32 %v762_v13, %v3887_v54 }
  0x8d   : > { %533 = vrot.lane.b32.xlu2 %v519_v18, %s3685_s10  ;;  %531 = vrot.lane.b32.xlu1 %v518_v19, %s3685_s10  ;;  %v764_v19 = vmul.f32 %v762_v13, %v3884_v53 }
  0x8e   : > { %529 = vrot.lane.b32.xlu0 %v519_v18, %s3685_s10 }
  0x95   : > { %539 = vrot.lane.b32.xlu2 %v522_v20, %s3685_s10  ;;  %537 = vrot.lane.b32.xlu1 %v519_v18, %s3685_s10  ;;  %v763_v18 = vmul.f32 %v762_v13, %v3874_v46  ;;  %v785_v20 = vstv %s3359_s6  ;;  %v909_v13 = vstv %s3365_s24  ;;  %s3371_s6 = sld [smem:[#allocation9 + $0x1f]] }
  0x96   : > { %535 = vrot.lane.b32.xlu0 %v520_v21, %s3685_s10  ;;  %v787_v27 = vmul.f32 %v785_v20, %v3884_v53  ;;  %s3377_s24 = sld [smem:[#allocation9 + $0x25]] }
  0x97   : > { %v3941_v23 = vpop.permute.xlu2 %312 }
  0x9d   : > { %568 = vrot.lane.b32.xlu2 %v560_v24, %s3686_s21  ;;  %566 = vrot.lane.b32.xlu1 %v559_v26, %s3686_s21  ;;  %v786_v26 = vmul.f32 %v785_v20, %v3874_v46 }
  0x9e   : > { %564 = vrot.lane.b32.xlu0 %v558_v25, %s3686_s21  ;;  %v788_v25 = vmul.f32 %v785_v20, %v3887_v54  ;;  %v911_v20 = vmul.f32 %v909_v13, %v3887_v54 }
  0x9f   : > { %v3949_v28 = vpop.permute.xlu2 %350 }
  0xa5   : > { %591 = vrot.lane.b32.xlu2 %v583_v29, %s3687_s28  ;;  %589 = vrot.lane.b32.xlu1 %v582_v31, %s3687_s28  ;;  %v808_v29 = vstv %s3360_s4  ;;  %s3372_s4 = sld [smem:[#allocation9 + $0x20]] }
  0xa6   : > { %587 = vrot.lane.b32.xlu0 %v581_v30, %s3687_s28 }
  0xa7   : > { %v3957_v33 = vpop.permute.xlu2 %314 }
  0xad   : > { %614 = vrot.lane.b32.xlu2 %v606_v34, %s3688_s30  ;;  %612 = vrot.lane.b32.xlu1 %v605_v36, %s3688_s30  ;;  %v811_v34 = vmul.f32 %v808_v29, %v3887_v54  ;;  %v810_v36 = vmul.f32 %v808_v29, %v3884_v53 }
  0xae   : > { %610 = vrot.lane.b32.xlu0 %v604_v35, %s3688_s30  ;;  %v809_v35 = vmul.f32 %v808_v29, %v3874_v46  ;;  %v865_v46 = vstv %s3363_s12  ;;  %v925_v29 = vstv %s3366_s20  ;;  %s3374_s12 = sld [smem:[#allocation9 + $0x22]] }
  0xaf   : > { %v3965_v38 = vpop.permute.xlu1 %308  ;;  %v3967_v39 = vpop.permute.xlu2 %356  ;;  %v867_v58 = vmul.f32 %v865_v46, %v3884_v53  ;;  %s3379_s20 = sld [smem:[#allocation9 + $0x27]] }
  0xb0   : > { %v3969_v40 = vpop.permute.xlu0 %304 }
  0xb5   : > { %637 = vrot.lane.b32.xlu2 %v629_v41, %s3689_s7  ;;  %635 = vrot.lane.b32.xlu1 %v628_v43, %s3689_s7 }
  0xb6   : > { %633 = vrot.lane.b32.xlu0 %v627_v42, %s3689_s7 }
  0xb7   : > { %v3977_v45 = vpop.permute.xlu2 %386  ;;  %v3979_v47 = vpop.permute.xlu1 %348 }
  0xb8   : > { %v3981_v48 = vpop.permute.xlu0 %306 }
  0xbd   : > { %674 = vrot.lane.b32.xlu2 %v660_v49, %s3684_s5  ;;  %672 = vrot.lane.b32.xlu1 %v659_v50, %s3684_s5 }
  0xbe   : > { %670 = vrot.lane.b32.xlu0 %v660_v49, %s3684_s5 }
  0xbf   : > { %v3987_v51 = vpop.permute.xlu2 %409  ;;  %v3991_v55 = vpop.permute.xlu1 %310 }
  0xc0   : > { %v3989_v52 = vpop.permute.xlu0 %346 }
  0xc5   : > { %680 = vrot.lane.b32.xlu2 %v663_v56, %s3684_s5  ;;  %678 = vrot.lane.b32.xlu1 %v660_v49, %s3684_s5  ;;  %v839_v49 = vmul.f32 %v837_v37, %v3884_v53 }
  0xc6   : > { %676 = vrot.lane.b32.xlu0 %v661_v57, %s3684_s5 }
  0xc7   : > { %v3998_v59 = vpop.permute.xlu2 %432  ;;  %v4002_v61 = vpop.permute.xlu1 %354 }
  0xc8   : > { %v4000_v60 = vpop.permute.xlu0 %352 }
  0xcd   : > { %715 = vrot.lane.b32.xlu2 %v701_v62, %s3685_s10  ;;  %713 = vrot.lane.b32.xlu1 %v700_v63, %s3685_s10  ;;  %v866_v63 = vmul.f32 0.0, %v865_v46 }
  0xce   : > { %711 = vrot.lane.b32.xlu0 %v701_v62, %s3685_s10 }
  0xcf   : > { %v4008_v0 = vpop.permute.xlu2 %455  ;;  %v4012_v3 = vpop.permute.xlu1 %384 }
  0xd0   : > { %6152 = vst [vmem:[#allocation14_spill] sm:$0xff] %v4008_v0  ;;  %v4010_v2 = vpop.permute.xlu0 %382 }
  0xd1   : > { %6153 = vst [vmem:[#allocation15_spill] sm:$0xff] %v4012_v3 }
  0xd5   : > { %721 = vrot.lane.b32.xlu2 %v704_v4, %s3685_s10  ;;  %719 = vrot.lane.b32.xlu1 %v701_v62, %s3685_s10  ;;  %v841_v62 = vmul.f32 %v837_v37, %v3887_v54  ;;  %v893_v4 = vstv %s4075_s27  ;;  %v926_v37 = vmul.f32 %v925_v29, %v3884_v53  ;;  %s3376_s27 = sld [smem:[#allocation9 + $0x24]] }
  0xd6   : > { %717 = vrot.lane.b32.xlu0 %v702_v5, %s3685_s10 }
  0xd7   : > { %v4019_v7 = vpop.permute.xlu2 %492  ;;  %v4023_v9 = vpop.permute.xlu1 %407 }
  0xd8   : > { %6154 = vst [vmem:[#allocation16_spill] sm:$0xff] %v4019_v7  ;;  %v4021_v8 = vpop.permute.xlu0 %405 }
  0xd9   : > { %6155 = vst [vmem:[#allocation17_spill] sm:$0xff] %v4021_v8 }
  0xda   : > { %6156 = vst [vmem:[#allocation18_spill] sm:$0xff] %v4023_v9 }
  0xdd   : > { %750 = vrot.lane.b32.xlu2 %v742_v10, %s3686_s21  ;;  %748 = vrot.lane.b32.xlu1 %v741_v12, %s3686_s21  ;;  %v869_v12 = vmul.f32 %v865_v46, %v3887_v54 }
  0xde   : > { %746 = vrot.lane.b32.xlu0 %v740_v11, %s3686_s21  ;;  %v894_v11 = vmul.f32 %v893_v4, %v3884_v53 }
  0xdf   : > { %v4031_v14 = vpop.permute.xlu2 %498  ;;  %v4035_v16 = vpop.permute.xlu1 %430 }
  0xe0   : > { %v4033_v15 = vpop.permute.xlu0 %428  ;;  %6158 = vst [vmem:[#allocation20_spill] sm:$0xff] %v4035_v16 }
  0xe1   : > { %6157 = vst [vmem:[#allocation19_spill] sm:$0xff] %v4033_v15 }
  0xe5   : > { %773 = vrot.lane.b32.xlu2 %v765_v17, %s3687_s28  ;;  %771 = vrot.lane.b32.xlu1 %v764_v19, %s3687_s28 }
  0xe6   : > { %769 = vrot.lane.b32.xlu0 %v763_v18, %s3687_s28 }
  0xe7   : > { %v4043_v21 = vpop.permute.xlu2 %533  ;;  %v4047_v24 = vpop.permute.xlu1 %453 }
  0xe8   : > { %6159 = vst [vmem:[#allocation21_spill] sm:$0xff] %v4043_v21  ;;  %v4045_v22 = vpop.permute.xlu0 %451 }
  0xe9   : > { %6160 = vst [vmem:[#allocation22_spill] sm:$0xff] %v4045_v22 }
  0xea   : > { %6161 = vst [vmem:[#allocation23_spill] sm:$0xff] %v4047_v24 }
  0xed   : > { %796 = vrot.lane.b32.xlu2 %v788_v25, %s3688_s30  ;;  %794 = vrot.lane.b32.xlu1 %v787_v27, %s3688_s30  ;;  %v895_v25 = vmul.f32 %v893_v4, %v3887_v54  ;;  %v941_v27 = vstv %s4100_s18  ;;  %s3378_s18 = sld [smem:[#allocation9 + $0x26]] }
  0xee   : > { %792 = vrot.lane.b32.xlu0 %v786_v26, %s3688_s30  ;;  %v910_v26 = vmul.f32 %v909_v13, %v3884_v53  ;;  %v943_v4 = vmul.f32 %v941_v27, %v3887_v54 }
  0xef   : > { %v4055_v30 = vpop.permute.xlu2 %539  ;;  %v4059_v32 = vpop.permute.xlu1 %490 }
  0xf0   : > { %v4057_v31 = vpop.permute.xlu0 %488  ;;  %6163 = vst [vmem:[#allocation25_spill] sm:$0xff] %v4059_v32 }
  0xf1   : > { %6162 = vst [vmem:[#allocation24_spill] sm:$0xff] %v4057_v31 }
  0xf5   : > { %819 = vrot.lane.b32.xlu2 %v811_v34, %s3689_s7  ;;  %817 = vrot.lane.b32.xlu1 %v810_v36, %s3689_s7  ;;  %v942_v36 = vmul.f32 %v941_v27, %v3884_v53 }
  0xf6   : > { %815 = vrot.lane.b32.xlu0 %v809_v35, %s3689_s7 }
  0xf7   : > { %v4067_v41 = vpop.permute.xlu2 %568  ;;  %v4071_v43 = vpop.permute.xlu1 %496 }
  0xf8   : > { %6164 = vst [vmem:[#allocation26_spill] sm:$0xff] %v4067_v41  ;;  %v4069_v42 = vpop.permute.xlu0 %494 }
  0xf9   : > { %6165 = vst [vmem:[#allocation27_spill] sm:$0xff] %v4069_v42 }
  0xfd   : > { %850 = vrot.lane.b32.xlu2 %v840_v44, %s3684_s5  ;;  %848 = vrot.lane.b32.xlu1 %v839_v49, %s3684_s5  ;;  %v965_v49 = vstv %s3369_s23  ;;  %s3380_s23 = sld [smem:[#allocation9 + $0x28]] }
  0xfe   : > { %846 = vrot.lane.b32.xlu0 %v840_v44, %s3684_s5  ;;  %v927_v44 = vmul.f32 %v925_v29, %v3887_v54  ;;  %v969_v27 = vmul.f32 %v965_v49, %v3887_v54  ;;  %v1006_v29 = vstv %s3370_s29  ;;  %s3381_s29 = sld [smem:[#allocation9 + $0x29]] }
  0xff   : > { %v4079_v50 = vpop.permute.xlu2 %591  ;;  %v4083_v57 = vpop.permute.xlu1 %531 }
 0x100   : > { %6166 = vst [vmem:[#allocation28_spill] sm:$0xff] %v4079_v50  ;;  %v4081_v56 = vpop.permute.xlu0 %529 }
 0x101   : > { %6167 = vst [vmem:[#allocation29_spill] sm:$0xff] %v4081_v56 }
 0x102   : > { %6168 = vst [vmem:[#allocation30_spill] sm:$0xff] %v4083_v57 }
 0x105   : > { %876 = vrot.lane.b32.xlu2 %v867_v58, %s3685_s10  ;;  %874 = vrot.lane.b32.xlu1 %v866_v63, %s3685_s10 }
 0x106   : > { %852 = vrot.lane.b32.xlu0 %v841_v62, %s3684_s5 }
 0x107   : > { %v4091_v5 = vpop.permute.xlu2 %614  ;;  %v4095_v10 = vpop.permute.xlu1 %537 }
 0x108   : > { %6169 = vst [vmem:[#allocation31_spill] sm:$0xff] %v4091_v5  ;;  %v4093_v6 = vpop.permute.xlu0 %535 }
 0x109   : > { %6170 = vst [vmem:[#allocation32_spill] sm:$0xff] %v4093_v6 }
 0x10d   : > { %898 = vrot.lane.b32.xlu2 %v894_v11, %s3686_s21  ;;  %880 = vrot.lane.b32.xlu1 %v869_v12, %s3685_s10  ;;  %v966_v11 = vmul.f32 0.0, %v965_v49  ;;  %v4140_v12 = vld [vmem:[#allocation2 + $0x30] sm:$0x7] }
 0x10e   : > { %878 = vrot.lane.b32.xlu0 %v866_v63, %s3685_s10  ;;  %v967_v63 = vmul.f32 %v965_v49, %v3884_v53 }
 0x10f   : > { %v4105_v17 = vpop.permute.xlu2 %637  ;;  %v4110_v19 = vpop.permute.xlu1 %566 }
 0x110   : > { %6171 = vst [vmem:[#allocation33_spill] sm:$0xff] %v4105_v17  ;;  %v4108_v18 = vpop.permute.xlu0 %564 }
 0x111   : > { %6172 = vst [vmem:[#allocation34_spill] sm:$0xff] %v4108_v18 }
 0x112   : > { %6173 = vst [vmem:[#allocation35_spill] sm:$0xff] %v4110_v19 }
 0x115   : > { %916 = vrot.lane.b32.xlu2 %v911_v20, %s3687_s28  ;;  %914 = vrot.lane.b32.xlu1 %v910_v26, %s3687_s28  ;;  %v970_v26 = vmul.f32 %v965_v49, %v4140_v12 }
 0x116   : > { %900 = vrot.lane.b32.xlu0 %v895_v25, %s3686_s21 }
 0x117   : > { %v4119_v1 = vpop.permute.xlu2 %674  ;;  %v4123_v35 = vpop.permute.xlu1 %589 }
 0x118   : > { %6174 = vst [vmem:[#allocation36_spill] sm:$0xff] %v4119_v1  ;;  %v4121_v34 = vpop.permute.xlu0 %587  ;;  %v1007_v1 = vmul.f32 0.0, %v1006_v29 }
 0x119   : > { %6175 = vst [vmem:[#allocation37_spill] sm:$0xff] %v4121_v34 }
 0x11a   : > { %6176 = vst [vmem:[#allocation38_spill] sm:$0xff] %v4123_v35 }
 0x11d   : > { %946 = vrot.lane.b32.xlu2 %v942_v36, %s3689_s7  ;;  %932 = vrot.lane.b32.xlu1 %v927_v44, %s3688_s30 }
 0x11e   : > { %930 = vrot.lane.b32.xlu0 %v926_v37, %s3688_s30  ;;  %v4157_v37 = vld [vmem:[#allocation2 + $0x38] sm:$0x7] }
 0x11f   : > { %v4131_v46 = vpop.permute.xlu2 %680  ;;  %v4135_v62 = vpop.permute.xlu1 %612 }
 0x120   : > { %6177 = vst [vmem:[#allocation39_spill] sm:$0xff] %v4131_v46  ;;  %v4133_v58 = vpop.permute.xlu0 %610 }
 0x121   : > { %6178 = vst [vmem:[#allocation40_spill] sm:$0xff] %v4133_v58 }
 0x122   : > { %6179 = vst [vmem:[#allocation41_spill] sm:$0xff] %v4135_v62 }
 0x125   : > { %980 = vrot.lane.b32.xlu2 %v967_v63, %s3684_s5  ;;  %978 = vrot.lane.b32.xlu1 %v966_v11, %s3684_s5 }
 0x126   : > { %948 = vrot.lane.b32.xlu0 %v943_v4, %s3689_s7  ;;  %v1008_v4 = vmul.f32 %v1006_v29, %v3884_v53 }
 0x127   : > { %v4144_v13 = vpop.permute.xlu2 %715  ;;  %v4148_v25 = vpop.permute.xlu1 %635 }
 0x128   : > { %6180 = vst [vmem:[#allocation42_spill] sm:$0xff] %v4144_v13  ;;  %v4146_v20 = vpop.permute.xlu0 %633  ;;  %v971_v13 = vmul.f32 %v965_v49, %v4157_v37  ;;  %v1047_v49 = vstv %s3371_s6  ;;  %s3383_s6 = sld [smem:[#allocation9 + $0x2b]] }
 0x129   : > { %6181 = vst [vmem:[#allocation43_spill] sm:$0xff] %v4146_v20 }
 0x12a   : > { %6182 = vst [vmem:[#allocation44_spill] sm:$0xff] %v4148_v25 }
 0x12d   : > { %986 = vrot.lane.b32.xlu2 %v970_v26, %s3684_s5  ;;  %984 = vrot.lane.b32.xlu1 %v969_v27, %s3684_s5 }
 0x12e   : > { %982 = vrot.lane.b32.xlu0 %v966_v11, %s3684_s5 }
 0x12f   : > { %v4154_v36 = vpop.permute.xlu2 %721  ;;  %v4161_v63 = vpop.permute.xlu1 %672 }
 0x130   : > { %6183 = vst [vmem:[#allocation45_spill] sm:$0xff] %v4154_v36  ;;  %v4159_v44 = vpop.permute.xlu0 %670  ;;  %v1012_v36 = vmul.f32 %v1006_v29, %v4157_v37 }
 0x131   : > { %6184 = vst [vmem:[#allocation46_spill] sm:$0xff] %v4159_v44  ;;  %v1011_v44 = vmul.f32 %v1006_v29, %v4140_v12 }
 0x132   : > { %6185 = vst [vmem:[#allocation47_spill] sm:$0xff] %v4161_v63  ;;  %v1010_v63 = vmul.f32 %v1006_v29, %v3887_v54  ;;  %v1050_v29 = vmul.f32 %v1047_v49, %v4157_v37 }
 0x135   : > { %1021 = vrot.lane.b32.xlu2 %v1008_v4, %s3685_s10  ;;  %1019 = vrot.lane.b32.xlu1 %v1007_v1, %s3685_s10 }
 0x136   : > { %988 = vrot.lane.b32.xlu0 %v971_v13, %s3684_s5 }
 0x137   : > { %v4167_v11 = vpop.permute.xlu2 %750  ;;  %v4172_v27 = vpop.permute.xlu1 %678 }
 0x138   : > { %6186 = vst [vmem:[#allocation48_spill] sm:$0xff] %v4167_v11  ;;  %v4170_v26 = vpop.permute.xlu0 %676 }
 0x139   : > { %6187 = vst [vmem:[#allocation49_spill] sm:$0xff] %v4170_v26  ;;  %v1049_v26 = vmul.f32 %v1047_v49, %v3887_v54 }
 0x13a   : > { %6188 = vst [vmem:[#allocation50_spill] sm:$0xff] %v4172_v27  ;;  %v1048_v27 = vmul.f32 %v1047_v49, %v3884_v53 }
 0x13d   : > { %1027 = vrot.lane.b32.xlu2 %v1011_v44, %s3685_s10  ;;  %1025 = vrot.lane.b32.xlu1 %v1010_v63, %s3685_s10  ;;  %v1070_v44 = vstv %s3372_s4  ;;  %s3384_s4 = sld [smem:[#allocation9 + $0x2c]] }
 0x13e   : > { %1023 = vrot.lane.b32.xlu0 %v1007_v1, %s3685_s10  ;;  %v1073_v49 = vmul.f32 %v1070_v44, %v4157_v37 }
 0x13f   : > { %v4178_v4 = vpop.permute.xlu2 %773  ;;  %v4183_v11 = vpop.permute.xlu1 %713 }
 0x140   : > { %6189 = vst [vmem:[#allocation51_spill] sm:$0xff] %v4178_v4  ;;  %v4181_v13 = vpop.permute.xlu0 %711  ;;  %v1071_v4 = vmul.f32 %v1070_v44, %v3884_v53 }
 0x141   : > { %6190 = vst [vmem:[#allocation52_spill] sm:$0xff] %v4181_v13 }
 0x142   : > { %6191 = vst [vmem:[#allocation53_spill] sm:$0xff] %v4183_v11  ;;  %v1072_v11 = vmul.f32 %v1070_v44, %v3887_v54 }
 0x145   : > { %1056 = vrot.lane.b32.xlu2 %v1049_v26, %s3686_s21  ;;  %1054 = vrot.lane.b32.xlu1 %v1048_v27, %s3686_s21  ;;  %v1093_v26 = vstv %s3373_s8  ;;  %s3385_s8 = sld [smem:[#allocation9 + $0x2d]] }
 0x146   : > { %1029 = vrot.lane.b32.xlu0 %v1012_v36, %s3685_s10  ;;  %v1096_v44 = vmul.f32 %v1093_v26, %v4157_v37 }
 0x147   : > { %v4190_v1 = vpop.permute.xlu2 %796  ;;  %v4195_v13 = vpop.permute.xlu1 %719 }
 0x148   : > { %6192 = vst [vmem:[#allocation54_spill] sm:$0xff] %v4190_v1  ;;  %v4193_v63 = vpop.permute.xlu0 %717 }
 0x149   : > { %6193 = vst [vmem:[#allocation55_spill] sm:$0xff] %v4193_v63  ;;  %v1095_v63 = vmul.f32 %v1093_v26, %v3887_v54 }
 0x14a   : > { %6194 = vst [vmem:[#allocation56_spill] sm:$0xff] %v4195_v13  ;;  %v1094_v13 = vmul.f32 %v1093_v26, %v3884_v53 }
 0x14d   : > { %1079 = vrot.lane.b32.xlu2 %v1072_v11, %s3687_s28  ;;  %1077 = vrot.lane.b32.xlu1 %v1071_v4, %s3687_s28  ;;  %v1116_v11 = vstv %s3374_s12  ;;  %s3386_s12 = sld [smem:[#allocation9 + $0x2e]] }
 0x14e   : > { %1058 = vrot.lane.b32.xlu0 %v1050_v29, %s3686_s21 }
 0x14f   : > { %v4202_v36 = vpop.permute.xlu2 %819  ;;  %v4207_v1 = vpop.permute.xlu1 %748 }
 0x150   : > { %6195 = vst [vmem:[#allocation57_spill] sm:$0xff] %v4202_v36  ;;  %v4205_v27 = vpop.permute.xlu0 %746  ;;  %v1117_v36 = vmul.f32 %v1116_v11, %v3884_v53 }
 0x151   : > { %6196 = vst [vmem:[#allocation58_spill] sm:$0xff] %v4205_v27 }
 0x152   : > { %6197 = vst [vmem:[#allocation59_spill] sm:$0xff] %v4207_v1  ;;  %v1118_v1 = vmul.f32 %v1116_v11, %v3887_v54 }
 0x155   : > { %1102 = vrot.lane.b32.xlu2 %v1095_v63, %s3688_s30  ;;  %1100 = vrot.lane.b32.xlu1 %v1094_v13, %s3688_s30  ;;  %v1147_v63 = vstv %s3376_s27  ;;  %s3387_s27 = sld [smem:[#allocation9 + $0x2f]] }
 0x156   : > { %1081 = vrot.lane.b32.xlu0 %v1073_v49, %s3687_s28  ;;  %v1148_v26 = vmul.f32 0.0, %v1147_v63 }
 0x157   : > { %v4214_v29 = vpop.permute.xlu2 %850  ;;  %v4219_v27 = vpop.permute.xlu1 %771 }
 0x158   : > { %6198 = vst [vmem:[#allocation60_spill] sm:$0xff] %v4214_v29  ;;  %v4217_v4 = vpop.permute.xlu0 %769  ;;  %v1119_v29 = vmul.f32 %v1116_v11, %v4157_v37  ;;  %v1188_v11 = vstv %s3377_s24  ;;  %s3388_s24 = sld [smem:[#allocation9 + $0x30]] }
 0x159   : > { %6199 = vst [vmem:[#allocation61_spill] sm:$0xff] %v4217_v4 }
 0x15a   : > { %6200 = vst [vmem:[#allocation62_spill] sm:$0xff] %v4219_v27  ;;  %v1149_v27 = vmul.f32 %v1147_v63, %v3884_v53 }
 0x15d   : > { %1125 = vrot.lane.b32.xlu2 %v1118_v1, %s3689_s7  ;;  %1123 = vrot.lane.b32.xlu1 %v1117_v36, %s3689_s7 }
 0x15e   : > { %1104 = vrot.lane.b32.xlu0 %v1096_v44, %s3688_s30 }
 0x15f   : > { %v4226_v49 = vpop.permute.xlu2 %876  ;;  %v4231_v4 = vpop.permute.xlu1 %794 }
 0x160   : > { %6201 = vst [vmem:[#allocation63_spill] sm:$0xff] %v4226_v49  ;;  %v4229_v13 = vpop.permute.xlu0 %792  ;;  %v1189_v49 = vmul.f32 0.0, %v1188_v11 }
 0x161   : > { %6202 = vst [vmem:[#allocation64_spill] sm:$0xff] %v4229_v13  ;;  %v1151_v13 = vmul.f32 %v1147_v63, %v3887_v54 }
 0x162   : > { %6203 = vst [vmem:[#allocation65_spill] sm:$0xff] %v4231_v4  ;;  %v1152_v4 = vmul.f32 %v1147_v63, %v4140_v12 }
 0x165   : > { %1162 = vrot.lane.b32.xlu2 %v1149_v27, %s3684_s5  ;;  %1160 = vrot.lane.b32.xlu1 %v1148_v26, %s3684_s5 }
 0x166   : > { %1127 = vrot.lane.b32.xlu0 %v1119_v29, %s3689_s7 }
 0x167   : > { %v4237_v1 = vpop.permute.xlu2 %898  ;;  %v4242_v36 = vpop.permute.xlu1 %817 }
 0x168   : > { %6204 = vst [vmem:[#allocation66_spill] sm:$0xff] %v4237_v1  ;;  %v4240_v44 = vpop.permute.xlu0 %815 }
 0x169   : > { %6205 = vst [vmem:[#allocation67_spill] sm:$0xff] %v4240_v44  ;;  %v1190_v44 = vmul.f32 %v1188_v11, %v3884_v53 }
 0x16a   : > { %6206 = vst [vmem:[#allocation68_spill] sm:$0xff] %v4242_v36  ;;  %v1153_v36 = vmul.f32 %v1147_v63, %v4157_v37  ;;  %v1229_v63 = vstv %s3378_s18  ;;  %s3390_s18 = sld [smem:[#allocation9 + $0x32]] }
 0x16d   : > { %1168 = vrot.lane.b32.xlu2 %v1152_v4, %s3684_s5  ;;  %1166 = vrot.lane.b32.xlu1 %v1151_v13, %s3684_s5 }
 0x16e   : > { %1164 = vrot.lane.b32.xlu0 %v1148_v26, %s3684_s5 }
 0x16f   : > { %v4248_v27 = vpop.permute.xlu2 %916  ;;  %v4253_v1 = vpop.permute.xlu1 %848 }
 0x170   : > { %6207 = vst [vmem:[#allocation69_spill] sm:$0xff] %v4248_v27  ;;  %v4251_v29 = vpop.permute.xlu0 %846  ;;  %v1193_v27 = vmul.f32 %v1188_v11, %v4140_v12 }
 0x171   : > { %6208 = vst [vmem:[#allocation70_spill] sm:$0xff] %v4251_v29  ;;  %v1192_v29 = vmul.f32 %v1188_v11, %v3887_v54 }
 0x172   : > { %6209 = vst [vmem:[#allocation71_spill] sm:$0xff] %v4253_v1  ;;  %v1230_v1 = vmul.f32 %v1229_v63, %v3884_v53 }
 0x175   : > { %1203 = vrot.lane.b32.xlu2 %v1190_v44, %s3685_s10  ;;  %1201 = vrot.lane.b32.xlu1 %v1189_v49, %s3685_s10 }
 0x176   : > { %1170 = vrot.lane.b32.xlu0 %v1153_v36, %s3684_s5 }
 0x177   : > { %v4259_v4 = vpop.permute.xlu2 %946  ;;  %v4264_v13 = vpop.permute.xlu1 %874 }
 0x178   : > { %6210 = vst [vmem:[#allocation72_spill] sm:$0xff] %v4259_v4  ;;  %v4262_v26 = vpop.permute.xlu0 %852 }
 0x179   : > { %6211 = vst [vmem:[#allocation73_spill] sm:$0xff] %v4262_v26  ;;  %v1194_v26 = vmul.f32 %v1188_v11, %v4157_v37  ;;  %v1232_v11 = vmul.f32 %v1229_v63, %v4157_v37 }
 0x17a   : > { %6212 = vst [vmem:[#allocation74_spill] sm:$0xff] %v4264_v13  ;;  %v1231_v13 = vmul.f32 %v1229_v63, %v3887_v54 }
 0x17d   : > { %1209 = vrot.lane.b32.xlu2 %v1193_v27, %s3685_s10  ;;  %1207 = vrot.lane.b32.xlu1 %v1192_v29, %s3685_s10  ;;  %v1252_v27 = vstv %s3379_s20  ;;  %s3391_s20 = sld [smem:[#allocation9 + $0x33]] }
 0x17e   : > { %1205 = vrot.lane.b32.xlu0 %v1189_v49, %s3685_s10  ;;  %v1255_v63 = vmul.f32 %v1252_v27, %v4157_v37 }
 0x17f   : > { %v4270_v44 = vpop.permute.xlu2 %980  ;;  %v4275_v4 = vpop.permute.xlu1 %880 }
 0x180   : > { %6213 = vst [vmem:[#allocation75_spill] sm:$0xff] %v4270_v44  ;;  %v4273_v36 = vpop.permute.xlu0 %878 }
 0x181   : > { %6214 = vst [vmem:[#allocation76_spill] sm:$0xff] %v4273_v36  ;;  %v1254_v36 = vmul.f32 %v1252_v27, %v3887_v54 }
 0x182   : > { %6215 = vst [vmem:[#allocation77_spill] sm:$0xff] %v4275_v4  ;;  %v1253_v4 = vmul.f32 %v1252_v27, %v3884_v53 }
 0x185   : > { %1238 = vrot.lane.b32.xlu2 %v1231_v13, %s3686_s21  ;;  %1236 = vrot.lane.b32.xlu1 %v1230_v1, %s3686_s21  ;;  %v1275_v13 = vstv %s3380_s23  ;;  %s3392_s23 = sld [smem:[#allocation9 + $0x34]] }
 0x186   : > { %1211 = vrot.lane.b32.xlu0 %v1194_v26, %s3685_s10  ;;  %v1278_v27 = vmul.f32 %v1275_v13, %v4157_v37 }
 0x187   : > { %v4282_v49 = vpop.permute.xlu2 %986  ;;  %v4287_v44 = vpop.permute.xlu1 %914 }
 0x188   : > { %6216 = vst [vmem:[#allocation78_spill] sm:$0xff] %v4282_v49  ;;  %v4285_v29 = vpop.permute.xlu0 %900 }
 0x189   : > { %6217 = vst [vmem:[#allocation79_spill] sm:$0xff] %v4285_v29  ;;  %v1276_v29 = vmul.f32 %v1275_v13, %v3884_v53 }
 0x18a   : > { %6218 = vst [vmem:[#allocation80_spill] sm:$0xff] %v4287_v44  ;;  %v1277_v44 = vmul.f32 %v1275_v13, %v3887_v54 }
 0x18d   : > { %1261 = vrot.lane.b32.xlu2 %v1254_v36, %s3687_s28  ;;  %1259 = vrot.lane.b32.xlu1 %v1253_v4, %s3687_s28  ;;  %v1298_v36 = vstv %s3381_s29  ;;  %s3393_s29 = sld [smem:[#allocation9 + $0x35]] }
 0x18e   : > { %1240 = vrot.lane.b32.xlu0 %v1232_v11, %s3686_s21 }
 0x18f   : > { %v4294_v26 = vpop.permute.xlu2 %1021  ;;  %v4299_v49 = vpop.permute.xlu1 %932 }
 0x190   : > { %6219 = vst [vmem:[#allocation81_spill] sm:$0xff] %v4294_v26  ;;  %v4297_v1 = vpop.permute.xlu0 %930 }
 0x191   : > { %6220 = vst [vmem:[#allocation82_spill] sm:$0xff] %v4297_v1  ;;  %v1299_v1 = vmul.f32 %v1298_v36, %v3884_v53 }
 0x192   : > { %6221 = vst [vmem:[#allocation83_spill] sm:$0xff] %v4299_v49  ;;  %v1300_v49 = vmul.f32 %v1298_v36, %v3887_v54 }
 0x195   : > { %1284 = vrot.lane.b32.xlu2 %v1277_v44, %s3688_s30  ;;  %1282 = vrot.lane.b32.xlu1 %v1276_v29, %s3688_s30  ;;  %v1329_v44 = vstv %s3383_s6  ;;  %s3394_s6 = sld [smem:[#allocation9 + $0x36]] }
 0x196   : > { %1263 = vrot.lane.b32.xlu0 %v1255_v63, %s3687_s28  ;;  %v1330_v13 = vmul.f32 0.0, %v1329_v44 }
 0x197   : > { %v4306_v11 = vpop.permute.xlu2 %1027  ;;  %v4311_v26 = vpop.permute.xlu1 %978 }
 0x198   : > { %6222 = vst [vmem:[#allocation84_spill] sm:$0xff] %v4306_v11  ;;  %v4309_v4 = vpop.permute.xlu0 %948  ;;  %v1331_v11 = vmul.f32 %v1329_v44, %v3884_v53 }
 0x199   : > { %6223 = vst [vmem:[#allocation85_spill] sm:$0xff] %v4309_v4  ;;  %v1301_v4 = vmul.f32 %v1298_v36, %v4157_v37  ;;  %v1370_v36 = vstv %s3384_s4  ;;  %s3395_s4 = sld [smem:[#allocation9 + $0x37]] }
 0x19a   : > { %6224 = vst [vmem:[#allocation86_spill] sm:$0xff] %v4311_v26 }
 0x19d   : > { %1307 = vrot.lane.b32.xlu2 %v1300_v49, %s3689_s7  ;;  %1305 = vrot.lane.b32.xlu1 %v1299_v1, %s3689_s7  ;;  %v1334_v1 = vmul.f32 %v1329_v44, %v4140_v12 }
 0x19e   : > { %1286 = vrot.lane.b32.xlu0 %v1278_v27, %s3688_s30 }
 0x19f   : > { %v4318_v63 = vpop.permute.xlu2 %1056  ;;  %v4324_v26 = vpop.permute.xlu1 %984 }
 0x1a0   : > { %6225 = vst [vmem:[#allocation87_spill] sm:$0xff] %v4318_v63  ;;  %v4321_v29 = vpop.permute.xlu0 %982 }
 0x1a1   : > { %6226 = vst [vmem:[#allocation88_spill] sm:$0xff] %v4321_v29  ;;  %v1333_v29 = vmul.f32 %v1329_v44, %v3887_v54 }
 0x1a2   : > { %6227 = vst [vmem:[#allocation89_spill] sm:$0xff] %v4324_v26  ;;  %v1335_v26 = vmul.f32 %v1329_v44, %v4157_v37  ;;  %v1374_v44 = vmul.f32 %v1370_v36, %v3887_v54 }
 0x1a5   : > { %1344 = vrot.lane.b32.xlu2 %v1331_v11, %s3684_s5  ;;  %1342 = vrot.lane.b32.xlu1 %v1330_v13, %s3684_s5 }
 0x1a6   : > { %1309 = vrot.lane.b32.xlu0 %v1301_v4, %s3689_s7 }
 0x1a7   : > { %v4329_v49 = vpop.permute.xlu2 %1079  ;;  %v4335_v63 = vpop.permute.xlu1 %1019 }
 0x1a8   : > { %6228 = vst [vmem:[#allocation90_spill] sm:$0xff] %v4329_v49  ;;  %v4332_v27 = vpop.permute.xlu0 %988  ;;  %v1372_v49 = vmul.f32 %v1370_v36, %v3884_v53 }
 0x1a9   : > { %6229 = vst [vmem:[#allocation91_spill] sm:$0xff] %v4332_v27 }
 0x1aa   : > { %6230 = vst [vmem:[#allocation92_spill] sm:$0xff] %v4335_v63  ;;  %v4349_v63 = vld [vmem:[#allocation2 + $0x20] sm:$0xff] }
 0x1ab   : > { %v1371_v25 = vmul.f32 %v4349_v63, %v1370_v36 }
 0x1ad   : > { %1350 = vrot.lane.b32.xlu2 %v1334_v1, %s3684_s5  ;;  %1348 = vrot.lane.b32.xlu1 %v1333_v29, %s3684_s5  ;;  %v1375_v1 = vmul.f32 %v1370_v36, %v4140_v12  ;;  %v1376_v12 = vmul.f32 %v1370_v36, %v4157_v37 }
 0x1ae   : > { %1346 = vrot.lane.b32.xlu0 %v1330_v13, %s3684_s5 }
 0x1af   : > { %v4340_v11 = vpop.permute.xlu2 %1102  ;;  %v4346_v27 = vpop.permute.xlu1 %1025 }
 0x1b0   : > { %6231 = vst [vmem:[#allocation93_spill] sm:$0xff] %v4340_v11  ;;  %v4343_v4 = vpop.permute.xlu0 %1023 }
 0x1b1   : > { %6232 = vst [vmem:[#allocation94_spill] sm:$0xff] %v4343_v4  ;;  %v1411_v4 = vstv %s3385_s8  ;;  %s3397_s8 = sld [smem:[#allocation9 + $0x39]] }
 0x1b2   : > { %6233 = vst [vmem:[#allocation95_spill] sm:$0xff] %v4346_v27  ;;  %v1414_v36 = vmul.f32 %v1411_v4, %v4157_v37  ;;  %v1684_v27 = vstv %s3390_s18  ;;  %s3401_s18 = sld [smem:[#allocation9 + $0x3d]] }
 0x1b5   : > { %1385 = vrot.lane.b32.xlu2 %v1372_v49, %s3685_s10  ;;  %1383 = vrot.lane.b32.xlu1 %v1371_v25, %s3685_s10 }
 0x1b6   : > { %1352 = vrot.lane.b32.xlu0 %v1335_v26, %s3684_s5 }
 0x1b7   : > { %v4354_v13 = vpop.permute.xlu2 %1125  ;;  %v4360_v11 = vpop.permute.xlu1 %1054 }
 0x1b8   : > { %6234 = vst [vmem:[#allocation96_spill] sm:$0xff] %v4354_v13  ;;  %v4357_v29 = vpop.permute.xlu0 %1029  ;;  %v1413_v13 = vmul.f32 %v1411_v4, %v3887_v54 }
 0x1b9   : > { %6235 = vst [vmem:[#allocation97_spill] sm:$0xff] %v4357_v29 }
 0x1ba   : > { %6236 = vst [vmem:[#allocation98_spill] sm:$0xff] %v4360_v11  ;;  %v1412_v11 = vmul.f32 %v1411_v4, %v3884_v53 }
 0x1bd   : > { %1391 = vrot.lane.b32.xlu2 %v1375_v1, %s3685_s10  ;;  %1389 = vrot.lane.b32.xlu1 %v1374_v44, %s3685_s10  ;;  %v1434_v1 = vstv %s3386_s12  ;;  %s3398_s12 = sld [smem:[#allocation9 + $0x3a]] }
 0x1be   : > { %1387 = vrot.lane.b32.xlu0 %v1371_v25, %s3685_s10  ;;  %v1437_v4 = vmul.f32 %v1434_v1, %v4157_v37 }
 0x1bf   : > { %v4365_v49 = vpop.permute.xlu2 %1162  ;;  %v4371_v29 = vpop.permute.xlu1 %1077 }
 0x1c0   : > { %6237 = vst [vmem:[#allocation99_spill] sm:$0xff] %v4365_v49  ;;  %v4368_v26 = vpop.permute.xlu0 %1058 }
 0x1c1   : > { %6238 = vst [vmem:[#allocation100_spill] sm:$0xff] %v4368_v26  ;;  %v1436_v26 = vmul.f32 %v1434_v1, %v3887_v54 }
 0x1c2   : > { %6239 = vst [vmem:[#allocation101_spill] sm:$0xff] %v4371_v29  ;;  %v1435_v29 = vmul.f32 %v1434_v1, %v3884_v53 }
 0x1c5   : > { %1420 = vrot.lane.b32.xlu2 %v1413_v13, %s3686_s21  ;;  %1418 = vrot.lane.b32.xlu1 %v1412_v11, %s3686_s21  ;;  %v1457_v13 = vstv %s3387_s27  ;;  %s3399_s27 = sld [smem:[#allocation9 + $0x3b]] }
 0x1c6   : > { %1393 = vrot.lane.b32.xlu0 %v1376_v12, %s3685_s10  ;;  %v1460_v1 = vmul.f32 %v1457_v13, %v4157_v37 }
 0x1c7   : > { %v4377_v25 = vpop.permute.xlu2 %1168  ;;  %v4383_v49 = vpop.permute.xlu1 %1100 }
 0x1c8   : > { %6240 = vst [vmem:[#allocation102_spill] sm:$0xff] %v4377_v25  ;;  %v4380_v44 = vpop.permute.xlu0 %1081  ;;  %v1459_v25 = vmul.f32 %v1457_v13, %v3887_v54 }
 0x1c9   : > { %6241 = vst [vmem:[#allocation103_spill] sm:$0xff] %v4380_v44 }
 0x1ca   : > { %6242 = vst [vmem:[#allocation104_spill] sm:$0xff] %v4383_v49  ;;  %v1458_v49 = vmul.f32 %v1457_v13, %v3884_v53 }
 0x1cd   : > { %1443 = vrot.lane.b32.xlu2 %v1436_v26, %s3687_s28  ;;  %1441 = vrot.lane.b32.xlu1 %v1435_v29, %s3687_s28  ;;  %v1480_v26 = vstv %s3388_s24  ;;  %s3400_s24 = sld [smem:[#allocation9 + $0x3c]] }
 0x1ce   : > { %1422 = vrot.lane.b32.xlu0 %v1414_v36, %s3686_s21  ;;  %v1483_v13 = vmul.f32 %v1480_v26, %v4157_v37  ;;  %v1725_v37 = vstv %s3391_s20  ;;  %s3402_s20 = sld [smem:[#allocation9 + $0x3e]] }
 0x1cf   : > { %v4389_v12 = vpop.permute.xlu2 %1203  ;;  %v4395_v44 = vpop.permute.xlu1 %1123 }
 0x1d0   : > { %6243 = vst [vmem:[#allocation105_spill] sm:$0xff] %v4389_v12  ;;  %v4392_v11 = vpop.permute.xlu0 %1104 }
 0x1d1   : > { %6244 = vst [vmem:[#allocation106_spill] sm:$0xff] %v4392_v11  ;;  %v1482_v11 = vmul.f32 %v1480_v26, %v3887_v54 }
 0x1d2   : > { %6245 = vst [vmem:[#allocation107_spill] sm:$0xff] %v4395_v44  ;;  %v1481_v44 = vmul.f32 %v1480_v26, %v3884_v53  ;;  %v1685_v53 = vmul.f32 %v4349_v63, %v1684_v27 }
 0x1d5   : > { %1466 = vrot.lane.b32.xlu2 %v1459_v25, %s3688_s30  ;;  %1464 = vrot.lane.b32.xlu1 %v1458_v49, %s3688_s30  ;;  %v4412_v25 = vld [vmem:[#allocation3 + $0x8] sm:$0xff] }
 0x1d6   : > { %1445 = vrot.lane.b32.xlu0 %v1437_v4, %s3687_s28  ;;  %v1686_v54 = vmul.f32 %v1684_v27, %v4412_v25 }
 0x1d7   : > { %v4401_v36 = vpop.permute.xlu2 %1209  ;;  %v4407_v12 = vpop.permute.xlu1 %1160 }
 0x1d8   : > { %6246 = vst [vmem:[#allocation108_spill] sm:$0xff] %v4401_v36  ;;  %v4404_v29 = vpop.permute.xlu0 %1127 }
 0x1d9   : > { %6247 = vst [vmem:[#allocation109_spill] sm:$0xff] %v4404_v29 }
 0x1da   : > { %6248 = vst [vmem:[#allocation110_spill] sm:$0xff] %v4407_v12 }
 0x1dd   : > { %1489 = vrot.lane.b32.xlu2 %v1482_v11, %s3689_s7  ;;  %1487 = vrot.lane.b32.xlu1 %v1481_v44, %s3689_s7  ;;  %v4430_v44 = vld [vmem:[#allocation3 + $0x18] sm:$0xff] }
 0x1de   : > { %1468 = vrot.lane.b32.xlu0 %v1460_v1, %s3688_s30  ;;  %v1688_v12 = vmul.f32 %v1684_v27, %v4430_v44 }
 0x1df   : > { %v4415_v4 = vpop.permute.xlu2 %1238  ;;  %v4421_v29 = vpop.permute.xlu1 %1166 }
 0x1e0   : > { %6249 = vst [vmem:[#allocation111_spill] sm:$0xff] %v4415_v4  ;;  %v4418_v49 = vpop.permute.xlu0 %1164  ;;  %v1726_v4 = vmul.f32 %v4349_v63, %v1725_v37 }
 0x1e1   : > { %6250 = vst [vmem:[#allocation112_spill] sm:$0xff] %v4418_v49  ;;  %v1789_v49 = vstv %s3393_s29  ;;  %s3389_s29 = sld [smem:[#allocation9 + $0x31]] }
 0x1e2   : > { %6251 = vst [vmem:[#allocation113_spill] sm:$0xff] %v4421_v29 }
 0x1e5   : > { %1699 = vrot.lane.b32.xlu2 %v1686_v54, %s3684_s5  ;;  %1697 = vrot.lane.b32.xlu1 %v1685_v53, %s3684_s5  ;;  %v4441_v54 = vld [vmem:[#allocation3 + $0x28] sm:$0xff] }
 0x1e6   : > { %1491 = vrot.lane.b32.xlu0 %v1483_v13, %s3689_s7 }
 0x1e7   : > { %v4427_v11 = vpop.permute.xlu2 %1261  ;;  %v4434_v36 = vpop.permute.xlu1 %1201 }
 0x1e8   : > { %6252 = vst [vmem:[#allocation114_spill] sm:$0xff] %v4427_v11  ;;  %v4432_v1 = vpop.permute.xlu0 %1170  ;;  %v1727_v11 = vmul.f32 %v1725_v37, %v4412_v25 }
 0x1e9   : > { %6253 = vst [vmem:[#allocation115_spill] sm:$0xff] %v4432_v1 }
 0x1ea   : > { %6254 = vst [vmem:[#allocation116_spill] sm:$0xff] %v4434_v36  ;;  %v1690_v36 = vmul.f32 %v1684_v27, %v4441_v54  ;;  %v1766_v27 = vstv %s3392_s23  ;;  %s3404_s23 = sld [smem:[#allocation9 + $0x40]] }
 0x1ed   : > { %1705 = vrot.lane.b32.xlu2 %v1685_v53, %s3684_s5  ;;  %1703 = vrot.lane.b32.xlu1 %v1688_v12, %s3684_s5 }
 0x1ee   : > { %1701 = vrot.lane.b32.xlu0 %v1685_v53, %s3684_s5 }
 0x1ef   : > { %v4439_v26 = vpop.permute.xlu2 %1284  ;;  %v4447_v1 = vpop.permute.xlu1 %1207 }
 0x1f0   : > { %6255 = vst [vmem:[#allocation117_spill] sm:$0xff] %v4439_v26  ;;  %v4444_v13 = vpop.permute.xlu0 %1205 }
 0x1f1   : > { %6256 = vst [vmem:[#allocation118_spill] sm:$0xff] %v4444_v13  ;;  %v1729_v13 = vmul.f32 %v1725_v37, %v4430_v44 }
 0x1f2   : > { %6257 = vst [vmem:[#allocation119_spill] sm:$0xff] %v4447_v1 }
 0x1f5   : > { %1740 = vrot.lane.b32.xlu2 %v1727_v11, %s3685_s10  ;;  %1738 = vrot.lane.b32.xlu1 %v1726_v4, %s3685_s10 }
 0x1f6   : > { %1707 = vrot.lane.b32.xlu0 %v1690_v36, %s3684_s5 }
 0x1f7   : > { %v4453_v53 = vpop.permute.xlu2 %1307  ;;  %v4458_v26 = vpop.permute.xlu1 %1236 }
 0x1f8   : > { %6258 = vst [vmem:[#allocation120_spill] sm:$0xff] %v4453_v53  ;;  %v4456_v12 = vpop.permute.xlu0 %1211  ;;  %v1768_v53 = vmul.f32 %v1766_v27, %v4430_v44 }
 0x1f9   : > { %6259 = vst [vmem:[#allocation121_spill] sm:$0xff] %v4456_v12  ;;  %v1767_v12 = vmul.f32 %v1766_v27, %v4412_v25 }
 0x1fa   : > { %6260 = vst [vmem:[#allocation122_spill] sm:$0xff] %v4458_v26  ;;  %v1731_v26 = vmul.f32 %v1725_v37, %v4441_v54  ;;  %v1769_v37 = vmul.f32 %v1766_v27, %v4441_v54  ;;  %v1792_v27 = vmul.f32 %v1789_v49, %v4441_v54 }
 0x1fd   : > { %1746 = vrot.lane.b32.xlu2 %v1726_v4, %s3685_s10  ;;  %1744 = vrot.lane.b32.xlu1 %v1729_v13, %s3685_s10 }
 0x1fe   : > { %1742 = vrot.lane.b32.xlu0 %v1726_v4, %s3685_s10 }
 0x1ff   : > { %v4463_v11 = vpop.permute.xlu2 %1344  ;;  %v4469_v1 = vpop.permute.xlu1 %1259 }
 0x200   : > { %6261 = vst [vmem:[#allocation123_spill] sm:$0xff] %v4463_v11  ;;  %v4466_v36 = vpop.permute.xlu0 %1240 }
 0x201   : > { %6262 = vst [vmem:[#allocation124_spill] sm:$0xff] %v4466_v36  ;;  %v1791_v36 = vmul.f32 %v1789_v49, %v4430_v44 }
 0x202   : > { %6263 = vst [vmem:[#allocation125_spill] sm:$0xff] %v4469_v1  ;;  %v1790_v1 = vmul.f32 %v1789_v49, %v4412_v25 }
 0x205   : > { %1775 = vrot.lane.b32.xlu2 %v1768_v53, %s3686_s21  ;;  %1773 = vrot.lane.b32.xlu1 %v1767_v12, %s3686_s21  ;;  %v1812_v53 = vstv %s3394_s6  ;;  %s3405_s6 = sld [smem:[#allocation9 + $0x41]] }
 0x206   : > { %1748 = vrot.lane.b32.xlu0 %v1731_v26, %s3685_s10  ;;  %v1815_v49 = vmul.f32 %v1812_v53, %v4441_v54 }
 0x207   : > { %v4475_v4 = vpop.permute.xlu2 %1350  ;;  %v4481_v11 = vpop.permute.xlu1 %1282 }
 0x208   : > { %6264 = vst [vmem:[#allocation126_spill] sm:$0xff] %v4475_v4  ;;  %v4478_v13 = vpop.permute.xlu0 %1263  ;;  %v1814_v4 = vmul.f32 %v1812_v53, %v4430_v44 }
 0x209   : > { %6265 = vst [vmem:[#allocation127_spill] sm:$0xff] %v4478_v13 }
 0x20a   : > { %6266 = vst [vmem:[#allocation128_spill] sm:$0xff] %v4481_v11  ;;  %v1813_v11 = vmul.f32 %v1812_v53, %v4412_v25 }
 0x20b   : > { %v2089_v34 = vstv %s3405_s6  ;;  %s4729_s6 = sld [smem:[#allocation9 + $0x4b]] }
 0x20c   : > { %v2091_v21 = vmul.f32 %v2089_v34, %v4412_v25 }
 0x20d   : > { %1798 = vrot.lane.b32.xlu2 %v1791_v36, %s3687_s28  ;;  %1796 = vrot.lane.b32.xlu1 %v1790_v1, %s3687_s28  ;;  %v1835_v36 = vstv %s3395_s4  ;;  %s3406_s4 = sld [smem:[#allocation9 + $0x42]] }
 0x20e   : > { %1777 = vrot.lane.b32.xlu0 %v1769_v37, %s3686_s21 }
 0x20f   : > { %v4487_v26 = vpop.permute.xlu2 %1385  ;;  %v4493_v13 = vpop.permute.xlu1 %1305 }
 0x210   : > { %6267 = vst [vmem:[#allocation129_spill] sm:$0xff] %v4487_v26  ;;  %v4490_v12 = vpop.permute.xlu0 %1286 }
 0x211   : > { %6268 = vst [vmem:[#allocation130_spill] sm:$0xff] %v4490_v12  ;;  %v1837_v12 = vmul.f32 %v1835_v36, %v4430_v44 }
 0x212   : > { %6269 = vst [vmem:[#allocation131_spill] sm:$0xff] %v4493_v13  ;;  %v1836_v13 = vmul.f32 %v1835_v36, %v4412_v25 }
 0x215   : > { %1821 = vrot.lane.b32.xlu2 %v1814_v4, %s3688_s30  ;;  %1819 = vrot.lane.b32.xlu1 %v1813_v11, %s3688_s30  ;;  %v1866_v4 = vstv %s3397_s8  ;;  %s3407_s8 = sld [smem:[#allocation9 + $0x43]] }
 0x216   : > { %1800 = vrot.lane.b32.xlu0 %v1792_v27, %s3687_s28  ;;  %v1867_v53 = vmul.f32 %v4349_v63, %v1866_v4 }
 0x217   : > { %v4499_v37 = vpop.permute.xlu2 %1391  ;;  %v4505_v26 = vpop.permute.xlu1 %1342 }
 0x218   : > { %6270 = vst [vmem:[#allocation132_spill] sm:$0xff] %v4499_v37  ;;  %v4502_v1 = vpop.permute.xlu0 %1309  ;;  %v1868_v37 = vmul.f32 %v1866_v4, %v4412_v25 }
 0x219   : > { %6271 = vst [vmem:[#allocation133_spill] sm:$0xff] %v4502_v1 }
 0x21a   : > { %6272 = vst [vmem:[#allocation134_spill] sm:$0xff] %v4505_v26  ;;  %v1838_v26 = vmul.f32 %v1835_v36, %v4441_v54  ;;  %v1907_v36 = vstv %s3398_s12  ;;  %s3396_s12 = sld [smem:[#allocation9 + $0x38]] }
 0x21d   : > { %1844 = vrot.lane.b32.xlu2 %v1837_v12, %s3689_s7  ;;  %1842 = vrot.lane.b32.xlu1 %v1836_v13, %s3689_s7 }
 0x21e   : > { %1823 = vrot.lane.b32.xlu0 %v1815_v49, %s3688_s30 }
 0x21f   : > { %v4511_v27 = vpop.permute.xlu2 %1420  ;;  %v4517_v1 = vpop.permute.xlu1 %1348 }
 0x220   : > { %6273 = vst [vmem:[#allocation135_spill] sm:$0xff] %v4511_v27  ;;  %v4514_v11 = vpop.permute.xlu0 %1346  ;;  %v1870_v27 = vmul.f32 %v1866_v4, %v4430_v44 }
 0x221   : > { %6274 = vst [vmem:[#allocation136_spill] sm:$0xff] %v4514_v11 }
 0x222   : > { %6275 = vst [vmem:[#allocation137_spill] sm:$0xff] %v4517_v1  ;;  %v1971_v1 = vstv %s3400_s24  ;;  %s3409_s24 = sld [smem:[#allocation9 + $0x45]] }
 0x225   : > { %1881 = vrot.lane.b32.xlu2 %v1868_v37, %s3684_s5  ;;  %1879 = vrot.lane.b32.xlu1 %v1867_v53, %s3684_s5  ;;  %v1909_v37 = vmul.f32 %v1907_v36, %v4412_v25 }
 0x226   : > { %1846 = vrot.lane.b32.xlu0 %v1838_v26, %s3689_s7 }
 0x227   : > { %v4523_v12 = vpop.permute.xlu2 %1443  ;;  %v4528_v49 = vpop.permute.xlu1 %1383 }
 0x228   : > { %6276 = vst [vmem:[#allocation138_spill] sm:$0xff] %v4523_v12  ;;  %v4526_v13 = vpop.permute.xlu0 %1352 }
 0x229   : > { %6277 = vst [vmem:[#allocation139_spill] sm:$0xff] %v4526_v13  ;;  %v1872_v13 = vmul.f32 %v1866_v4, %v4441_v54  ;;  %v1948_v4 = vstv %s3399_s27  ;;  %s3408_s27 = sld [smem:[#allocation9 + $0x44]] }
 0x22a   : > { %6278 = vst [vmem:[#allocation140_spill] sm:$0xff] %v4528_v49  ;;  %v1908_v49 = vmul.f32 %v4349_v63, %v1907_v36 }
 0x22d   : > { %1887 = vrot.lane.b32.xlu2 %v1867_v53, %s3684_s5  ;;  %1885 = vrot.lane.b32.xlu1 %v1870_v27, %s3684_s5 }
 0x22e   : > { %1883 = vrot.lane.b32.xlu0 %v1867_v53, %s3684_s5 }
 0x22f   : > { %v4533_v11 = vpop.permute.xlu2 %1466  ;;  %v4539_v12 = vpop.permute.xlu1 %1389 }
 0x230   : > { %6279 = vst [vmem:[#allocation141_spill] sm:$0xff] %v4533_v11  ;;  %v4536_v26 = vpop.permute.xlu0 %1387 }
 0x231   : > { %6280 = vst [vmem:[#allocation142_spill] sm:$0xff] %v4536_v26  ;;  %v1911_v26 = vmul.f32 %v1907_v36, %v4430_v44 }
 0x232   : > { %6281 = vst [vmem:[#allocation143_spill] sm:$0xff] %v4539_v12 }
 0x235   : > { %1922 = vrot.lane.b32.xlu2 %v1909_v37, %s3685_s10  ;;  %1920 = vrot.lane.b32.xlu1 %v1908_v49, %s3685_s10 }
 0x236   : > { %1889 = vrot.lane.b32.xlu0 %v1872_v13, %s3684_s5 }
 0x237   : > { %v4545_v53 = vpop.permute.xlu2 %1489  ;;  %v4550_v11 = vpop.permute.xlu1 %1418 }
 0x238   : > { %6282 = vst [vmem:[#allocation144_spill] sm:$0xff] %v4545_v53  ;;  %v4548_v27 = vpop.permute.xlu0 %1393  ;;  %v1950_v53 = vmul.f32 %v1948_v4, %v4430_v44 }
 0x239   : > { %6283 = vst [vmem:[#allocation145_spill] sm:$0xff] %v4548_v27  ;;  %v1913_v27 = vmul.f32 %v1907_v36, %v4441_v54  ;;  %v1951_v36 = vmul.f32 %v1948_v4, %v4441_v54 }
 0x23a   : > { %6284 = vst [vmem:[#allocation146_spill] sm:$0xff] %v4550_v11  ;;  %v1949_v11 = vmul.f32 %v1948_v4, %v4412_v25  ;;  %v1974_v4 = vmul.f32 %v1971_v1, %v4441_v54 }
 0x23d   : > { %1928 = vrot.lane.b32.xlu2 %v1908_v49, %s3685_s10  ;;  %1926 = vrot.lane.b32.xlu1 %v1911_v26, %s3685_s10 }
 0x23e   : > { %1924 = vrot.lane.b32.xlu0 %v1908_v49, %s3685_s10 }
 0x23f   : > { %v4555_v37 = vpop.permute.xlu2 %1699  ;;  %v4561_v12 = vpop.permute.xlu1 %1441 }
 0x240   : > { %v4558_v13 = vpop.permute.xlu0 %1422  ;;  %6286 = vst [vmem:[#allocation148_spill] sm:$0xff] %v4561_v12  ;;  %v1972_v12 = vmul.f32 %v1971_v1, %v4412_v25 }
 0x241   : > { %6285 = vst [vmem:[#allocation147_spill] sm:$0xff] %v4558_v13  ;;  %v1973_v13 = vmul.f32 %v1971_v1, %v4430_v44 }
 0x245   : > { %1957 = vrot.lane.b32.xlu2 %v1950_v53, %s3686_s21  ;;  %1955 = vrot.lane.b32.xlu1 %v1949_v11, %s3686_s21  ;;  %v1994_v53 = vstv %s3401_s18  ;;  %s3411_s18 = sld [smem:[#allocation9 + $0x47]] }
 0x246   : > { %1930 = vrot.lane.b32.xlu0 %v1913_v27, %s3685_s10  ;;  %v1997_v1 = vmul.f32 %v1994_v53, %v4441_v54 }
 0x247   : > { %v4567_v49 = vpop.permute.xlu2 %1705  ;;  %v4573_v29 = vpop.permute.xlu1 %1464 }
 0x248   : > { %v4570_v26 = vpop.permute.xlu0 %1445  ;;  %6288 = vst [vmem:[#allocation150_spill] sm:$0xff] %v4573_v29  ;;  %v1995_v29 = vmul.f32 %v1994_v53, %v4412_v25 }
 0x249   : > { %6287 = vst [vmem:[#allocation149_spill] sm:$0xff] %v4570_v26  ;;  %v1996_v26 = vmul.f32 %v1994_v53, %v4430_v44 }
 0x24d   : > { %1980 = vrot.lane.b32.xlu2 %v1973_v13, %s3687_s28  ;;  %1978 = vrot.lane.b32.xlu1 %v1972_v12, %s3687_s28  ;;  %v2017_v13 = vstv %s3402_s20  ;;  %s3412_s20 = sld [smem:[#allocation9 + $0x48]] }
 0x24e   : > { %1959 = vrot.lane.b32.xlu0 %v1951_v36, %s3686_s21  ;;  %v2020_v58 = vmul.f32 %v2017_v13, %v4441_v54 }
 0x24f   : > { %v4579_v27 = vpop.permute.xlu2 %1740  ;;  %v4585_v20 = vpop.permute.xlu1 %1487 }
 0x250   : > { %v4582_v11 = vpop.permute.xlu0 %1468  ;;  %6290 = vst [vmem:[#allocation152_spill] sm:$0xff] %v4585_v20  ;;  %v2018_v20 = vmul.f32 %v2017_v13, %v4412_v25 }
 0x251   : > { %6289 = vst [vmem:[#allocation151_spill] sm:$0xff] %v4582_v11  ;;  %v2019_v11 = vmul.f32 %v2017_v13, %v4430_v44 }
 0x255   : > { %2003 = vrot.lane.b32.xlu2 %v1996_v26, %s3688_s30  ;;  %2001 = vrot.lane.b32.xlu1 %v1995_v29, %s3688_s30  ;;  %v2048_v26 = vstv %s3404_s23  ;;  %s4716_s23 = sld [smem:[#allocation9 + $0x4a]] }
 0x256   : > { %1982 = vrot.lane.b32.xlu0 %v1974_v4, %s3687_s28  ;;  %v2050_v29 = vmul.f32 %v2048_v26, %v4412_v25  ;;  %v2049_v35 = vmul.f32 %v4349_v63, %v2048_v26  ;;  %v2052_v17 = vmul.f32 %v2048_v26, %v4430_v44  ;;  %v2054_v50 = vmul.f32 %v2048_v26, %v4441_v54 }
 0x257   : > { %v4591_v36 = vpop.permute.xlu2 %1746  ;;  %v4597_v46 = vpop.permute.xlu1 %1697 }
 0x258   : > { %v4594_v12 = vpop.permute.xlu0 %1491 }
 0x259   : > { %6291 = vst [vmem:[#allocation153_spill] sm:$0xff] %v4594_v12 }
 0x25d   : > { %2026 = vrot.lane.b32.xlu2 %v2019_v11, %s3689_s7  ;;  %2024 = vrot.lane.b32.xlu1 %v2018_v20, %s3689_s7 }
 0x25e   : > { %2005 = vrot.lane.b32.xlu0 %v1997_v1, %s3688_s30  ;;  %v1676_v1 = vstv %s3389_s29  ;;  %s4719_s29 = sld [smem:[#allocation9 + $0x49]] }
 0x25f   : > { %v1776_v4 = vpop.permute.xlu2 %1775  ;;  %v1704_v12 = vpop.permute.xlu1 %1703  ;;  %v1680_v13 = vmul.f32 %v1676_v1, %v4430_v44  ;;  %v1677_v19 = vmul.f32 %v4349_v63, %v1676_v1 }
 0x260   : > { %v1702_v62 = vpop.permute.xlu0 %1701 }
 0x261   : > { %v1721_v18 = vadd.f32 %v1704_v12, %v1680_v13 }
 0x265   : > { %2063 = vrot.lane.b32.xlu2 %v2050_v29, %s3684_s5  ;;  %2061 = vrot.lane.b32.xlu1 %v2049_v35, %s3684_s5  ;;  %v1710_v29 = vsel %vm316_vm4, %v1702_v62, %v1704_v12 }
 0x266   : > { %2028 = vrot.lane.b32.xlu0 %v2020_v58, %s3689_s7  ;;  %v1720_v6 = vadd.f32 %v1710_v29, %v1677_v19 }
 0x267   : > { %v1799_v53 = vpop.permute.xlu2 %1798  ;;  %v4612_v20 = vpop.permute.xlu1 %1738 }
 0x268   : > { %v4610_v11 = vpop.permute.xlu0 %1707 }
 0x26d   : > { %2069 = vrot.lane.b32.xlu2 %v2049_v35, %s3684_s5  ;;  %2067 = vrot.lane.b32.xlu1 %v2052_v17, %s3684_s5 }
 0x26e   : > { %2065 = vrot.lane.b32.xlu0 %v2049_v35, %s3684_s5  ;;  %v2090_v35 = vmul.f32 %v4349_v63, %v2089_v34 }
 0x26f   : > { %v1822_v58 = vpop.permute.xlu2 %1821  ;;  %v1745_v24 = vpop.permute.xlu1 %1744 }
 0x270   : > { %v1743_v5 = vpop.permute.xlu0 %1742  ;;  %v1762_v57 = vadd.f32 %v1745_v24, %v1721_v18 }
 0x271   : > { %v1751_v56 = vsel %vm358_vm5, %v1743_v5, %v1745_v24 }
 0x272   : > { %v1761_v62 = vadd.f32 %v1751_v56, %v1720_v6  ;;  %v1785_v7 = vadd.f32 %v1776_v4, %v1762_v57  ;;  %v2093_v57 = vmul.f32 %v2089_v34, %v4430_v44 }
 0x274   : > { %v1784_v42 = vadd.f32 %v1776_v4, %v1761_v62  ;;  %v1808_v12 = vadd.f32 %v1799_v53, %v1785_v7  ;;  %v1678_v4 = vmul.f32 %v1676_v1, %v4412_v25  ;;  %v1709_v62 = vsel %vm316_vm4, %v4597_v46, %v4555_v37 }
 0x275   : > { %2104 = vrot.lane.b32.xlu2 %v2091_v21, %s3685_s10  ;;  %2102 = vrot.lane.b32.xlu1 %v2090_v35, %s3685_s10  ;;  %v2130_v21 = vstv %s3406_s4  ;;  %v1750_v46 = vsel %vm358_vm5, %v4612_v20, %v4579_v27  ;;  %s3418_s4 = sld [smem:[#allocation9 + $0x4e]] }
 0x276   : > { %2071 = vrot.lane.b32.xlu0 %v2054_v50, %s3684_s5  ;;  %v1807_v13 = vadd.f32 %v1799_v53, %v1784_v42  ;;  %v1831_v29 = vadd.f32 %v1822_v58, %v1808_v12  ;;  %v2132_v50 = vmul.f32 %v2130_v21, %v4430_v44  ;;  %v2095_v53 = vmul.f32 %v2089_v34, %v4441_v54 }
 0x277   : > { %v1845_v17 = vpop.permute.xlu2 %1844  ;;  %v1774_v18 = vpop.permute.xlu1 %1773  ;;  %v1719_v12 = vadd.f32 %v4555_v37, %v1678_v4  ;;  %v1718_v37 = vadd.f32 %v1709_v62, %v1677_v19  ;;  %v2133_v20 = vmul.f32 %v2130_v21, %v4441_v54 }
 0x278   : > { %v1749_v5 = vpop.permute.xlu0 %1748  ;;  %v1830_v24 = vadd.f32 %v1822_v58, %v1807_v13  ;;  %v4628_v26 = vadd.f32 %v1845_v17, %v1831_v29  ;;  %v2131_v58 = vmul.f32 %v2130_v21, %v4412_v25  ;;  %v1711_v13 = vsel %vm316_vm4, %v4567_v49, %v4610_v11 }
 0x279   : > { %v4651_v29 = vstv %s3396_s12  ;;  %v1760_v22 = vadd.f32 %v4579_v27, %v1719_v12  ;;  %v1759_v31 = vadd.f32 %v1750_v46, %v1718_v37  ;;  %v2199_v37 = vstv %s3409_s24  ;;  %s3416_s12 = sld [smem:[#allocation9 + $0x4c]] }
 0x27a   : > { %v4630_v56 = vadd.f32 %v1845_v17, %v1830_v24  ;;  %v2153_v17 = vstv %s3407_s8  ;;  %v1752_v24 = vsel %vm358_vm5, %v4591_v36, %v1749_v5  ;;  %s3403_s8 = sld [smem:[#allocation9 + $0x3f]] }
 0x27b   : > { %v2154_v62 = vmul.f32 %v2153_v17, %v4412_v25  ;;  %v1782_v15 = vadd.f32 %v1774_v18, %v1759_v31  ;;  %v1783_v36 = vadd.f32 %v1774_v18, %v1760_v22  ;;  %s3420_s24 = sld [smem:[#allocation9 + $0x50]] }
 0x27d   : > { %2110 = vrot.lane.b32.xlu2 %v2090_v35, %s3685_s10  ;;  %2108 = vrot.lane.b32.xlu1 %v2093_v57, %s3685_s10  ;;  %v2155_v57 = vmul.f32 %v2153_v17, %v4430_v44 }
 0x27e   : > { %2106 = vrot.lane.b32.xlu0 %v2090_v35, %s3685_s10  ;;  %v1682_v35 = vmul.f32 %v1676_v1, %v4441_v54  ;;  %v1860_v1 = vmul.f32 %v4651_v29, %v4412_v25 }
 0x27f   : > { %v4635_v7 = vpop.permute.xlu2 %1881  ;;  %v1797_v6 = vpop.permute.xlu1 %1796 }
 0x280   : > { %v1778_v42 = vpop.permute.xlu0 %1777  ;;  %v1723_v4 = vadd.f32 %v4610_v11, %v1682_v35  ;;  %v1805_v11 = vadd.f32 %v1797_v6, %v1782_v15  ;;  %v1806_v35 = vadd.f32 %v1797_v6, %v1783_v36  ;;  %v2156_v6 = vmul.f32 %v2153_v17, %v4441_v54 }
 0x282   : > { %v1764_v16 = vadd.f32 %v1749_v5, %v1723_v4 }
 0x285   : > { %2139 = vrot.lane.b32.xlu2 %v2132_v50, %s3686_s21  ;;  %2137 = vrot.lane.b32.xlu1 %v2131_v58, %s3686_s21  ;;  %v1722_v50 = vadd.f32 %v1711_v13, %v1677_v19  ;;  %v1901_v58 = vadd.f32 %v4635_v7, %v1860_v1  ;;  %v1787_v19 = vadd.f32 %v1778_v42, %v1764_v16  ;;  %v2176_v13 = vstv %s3408_s27  ;;  %s3419_s27 = sld [smem:[#allocation9 + $0x4f]] }
 0x286   : > { %2112 = vrot.lane.b32.xlu0 %v2095_v53, %s3685_s10  ;;  %v2178_v18 = vmul.f32 %v2176_v13, %v4430_v44 }
 0x287   : > { %v4654_v34 = vpop.permute.xlu2 %1887  ;;  %v1820_v53 = vpop.permute.xlu1 %1819  ;;  %v1763_v32 = vadd.f32 %v1752_v24, %v1722_v50 }
 0x288   : > { %v1801_v49 = vpop.permute.xlu0 %1800  ;;  %v1828_v46 = vadd.f32 %v1820_v53, %v1805_v11  ;;  %v1829_v31 = vadd.f32 %v1820_v53, %v1806_v35 }
 0x289   : > { %v1786_v9 = vadd.f32 %v1778_v42, %v1763_v32  ;;  %v1810_v12 = vadd.f32 %v1801_v49, %v1787_v19 }
 0x28b   : > { %v1809_v21 = vadd.f32 %v1801_v49, %v1786_v9  ;;  %v2177_v9 = vmul.f32 %v2176_v13, %v4412_v25 }
 0x28d   : > { %2162 = vrot.lane.b32.xlu2 %v2155_v57, %s3687_s28  ;;  %2160 = vrot.lane.b32.xlu1 %v2154_v62, %s3687_s28  ;;  %v2201_v57 = vmul.f32 %v2199_v37, %v4430_v44  ;;  %v2228_v62 = vstv %s3411_s18  ;;  %s3421_s18 = sld [smem:[#allocation9 + $0x51]] }
 0x28e   : > { %2141 = vrot.lane.b32.xlu0 %v2133_v20, %s3686_s21  ;;  %v2179_v20 = vmul.f32 %v2176_v13, %v4441_v54  ;;  %v2230_v11 = vmul.f32 %v2228_v62, %v4430_v44  ;;  %v2229_v13 = vmul.f32 %v4349_v63, %v2228_v62 }
 0x28f   : > { %v1923_v27 = vpop.permute.xlu2 %1922  ;;  %v1843_v42 = vpop.permute.xlu1 %1842 }
 0x290   : > { %v4673_v5 = vadd.f32 %v1923_v27, %v1901_v58  ;;  %v1824_v22 = vpop.permute.xlu0 %1823  ;;  %v4676_v1 = vadd.f32 %v1843_v42, %v1828_v46  ;;  %v4678_v15 = vadd.f32 %v1843_v42, %v1829_v31  ;;  %v2200_v58 = vmul.f32 %v2199_v37, %v4412_v25 }
 0x291   : > { %v1832_v32 = vadd.f32 %v1824_v22, %v1809_v21  ;;  %v1833_v16 = vadd.f32 %v1824_v22, %v1810_v12  ;;  %v1859_v12 = vmul.f32 %v4349_v63, %v4651_v29  ;;  %v2256_v46 = vstv %s3412_s20  ;;  %s3422_s20 = sld [smem:[#allocation9 + $0x52]] }
 0x295   : > { %2185 = vrot.lane.b32.xlu2 %v2178_v18, %s3688_s30  ;;  %2183 = vrot.lane.b32.xlu1 %v2177_v9, %s3688_s30  ;;  %v2257_v18 = vmul.f32 %v4349_v63, %v2256_v46 }
 0x296   : > { %2164 = vrot.lane.b32.xlu0 %v2156_v6, %s3687_s28 }
 0x297   : > { %v4684_v24 = vpop.permute.xlu2 %1928  ;;  %v1880_v17 = vpop.permute.xlu1 %1879 }
 0x298   : > { %v1847_v49 = vpop.permute.xlu0 %1846  ;;  %v1891_v53 = vsel %vm316_vm4, %v1880_v17, %v4635_v7  ;;  %v2202_v7 = vmul.f32 %v2199_v37, %v4441_v54  ;;  %v2232_v37 = vmul.f32 %v2228_v62, %v4441_v54  ;;  %v2260_v17 = vmul.f32 %v2256_v46, %v4441_v54 }
 0x299   : > { %v4688_v50 = vadd.f32 %v1847_v49, %v1832_v32  ;;  %v4690_v4 = vadd.f32 %v1847_v49, %v1833_v16  ;;  %v1900_v32 = vadd.f32 %v1891_v53, %v1859_v12  ;;  %v1862_v49 = vmul.f32 %v4651_v29, %v4430_v44 }
 0x29d   : > { %2208 = vrot.lane.b32.xlu2 %v2201_v57, %s3689_s7  ;;  %2206 = vrot.lane.b32.xlu1 %v2200_v58, %s3689_s7 }
 0x29e   : > { %2187 = vrot.lane.b32.xlu0 %v2179_v20, %s3688_s30 }
 0x29f   : > { %v1958_v36 = vpop.permute.xlu2 %1957  ;;  %v1886_v35 = vpop.permute.xlu1 %1885 }
 0x2a0   : > { %v1884_v19 = vpop.permute.xlu0 %1883 }
 0x2a1   : > { %v1892_v21 = vsel %vm316_vm4, %v1884_v19, %v1886_v35  ;;  %v2258_v19 = vmul.f32 %v2256_v46, %v4430_v44 }
 0x2a2   : > { %v1902_v53 = vadd.f32 %v1892_v21, %v1859_v12 }
 0x2a5   : > { %2239 = vrot.lane.b32.xlu2 %v2230_v11, %s3684_s5  ;;  %2237 = vrot.lane.b32.xlu1 %v2229_v13, %s3684_s5  ;;  %v1864_v11 = vmul.f32 %v4651_v29, %v4441_v54 }
 0x2a6   : > { %2210 = vrot.lane.b32.xlu0 %v2202_v7, %s3689_s7 }
 0x2a7   : > { %v1981_v31 = vpop.permute.xlu2 %1980  ;;  %v1921_v42 = vpop.permute.xlu1 %1920 }
 0x2a8   : > { %v1890_v22 = vpop.permute.xlu0 %1889  ;;  %v1932_v6 = vsel %vm358_vm5, %v1921_v42, %v1923_v27 }
 0x2a9   : > { %v1893_v16 = vsel %vm316_vm4, %v4654_v34, %v1890_v22  ;;  %v1941_v9 = vadd.f32 %v1932_v6, %v1900_v32  ;;  %v1903_v34 = vadd.f32 %v1886_v35, %v1862_v49  ;;  %v2300_v35 = vstv %s4716_s23  ;;  %s3423_s23 = sld [smem:[#allocation9 + $0x53]] }
 0x2aa   : > { %v2284_v6 = vstv %s4719_s29  ;;  %v1904_v49 = vadd.f32 %v1893_v16, %v1859_v12  ;;  %v2316_v16 = vstv %s4729_s6  ;;  %s3425_s29 = sld [smem:[#allocation9 + $0x55]] }
 0x2ab   : > { %s3426_s6 = sld [smem:[#allocation9 + $0x56]] }
 0x2ad   : > { %2265 = vrot.lane.b32.xlu2 %v2257_v18, %s3685_s10  ;;  %2243 = vrot.lane.b32.xlu1 %v2232_v37, %s3684_s5  ;;  %v1905_v37 = vadd.f32 %v1890_v22, %v1864_v11 }
 0x2ae   : > { %2241 = vrot.lane.b32.xlu0 %v2229_v13, %s3684_s5 }
 0x2af   : > { %v2004_v57 = vpop.permute.xlu2 %2003  ;;  %v1927_v20 = vpop.permute.xlu1 %1926 }
 0x2b0   : > { %v1925_v27 = vpop.permute.xlu0 %1924  ;;  %v1944_v62 = vadd.f32 %v1927_v20, %v1903_v34 }
 0x2b1   : > { %v1933_v58 = vsel %vm358_vm5, %v1925_v27, %v1927_v20  ;;  %v2301_v27 = vmul.f32 %v2300_v35, %v4430_v44 }
 0x2b2   : > { %v1943_v7 = vadd.f32 %v1933_v58, %v1902_v53  ;;  %v1967_v13 = vadd.f32 %v1958_v36, %v1944_v62  ;;  %v2285_v58 = vmul.f32 %v2284_v6, %v4430_v44 }
 0x2b4   : > { %v1966_v32 = vadd.f32 %v1958_v36, %v1943_v7  ;;  %v1990_v42 = vadd.f32 %v1981_v31, %v1967_v13 }
 0x2b5   : > { %2271 = vrot.lane.b32.xlu2 %v2260_v17, %s3685_s10  ;;  %2269 = vrot.lane.b32.xlu1 %v2257_v18, %s3685_s10  ;;  %v2286_v18 = vmul.f32 %v2284_v6, %v4441_v54  ;;  %v2356_v6 = vstv %s3418_s4  ;;  %s3410_s4 = sld [smem:[#allocation9 + $0x46]] }
 0x2b6   : > { %2267 = vrot.lane.b32.xlu0 %v2258_v19, %s3685_s10  ;;  %v1989_v46 = vadd.f32 %v1981_v31, %v1966_v32  ;;  %v2013_v29 = vadd.f32 %v2004_v57, %v1990_v42  ;;  %v2317_v42 = vmul.f32 %v2316_v16, %v4430_v44 }
 0x2b7   : > { %v2027_v21 = vpop.permute.xlu2 %2026  ;;  %v1956_v20 = vpop.permute.xlu1 %1955 }
 0x2b8   : > { %v1931_v34 = vpop.permute.xlu0 %1930  ;;  %v2012_v17 = vadd.f32 %v2004_v57, %v1989_v46  ;;  %v4738_v62 = vadd.f32 %v2027_v21, %v2013_v29  ;;  %v1964_v19 = vadd.f32 %v1956_v20, %v1941_v9  ;;  %v1965_v31 = vadd.f32 %v1956_v20, %v4673_v5 }
 0x2b9   : > { %v1934_v36 = vsel %vm358_vm5, %v4684_v24, %v1931_v34  ;;  %v1946_v53 = vadd.f32 %v1931_v34, %v1905_v37  ;;  %v2318_v9 = vmul.f32 %v2316_v16, %v4441_v54  ;;  %v4754_v37 = vstv %s3403_s8  ;;  %s3432_s8 = sld [smem:[#allocation9 + $0x5c]] }
 0x2ba   : > { %v1945_v22 = vadd.f32 %v1934_v36, %v1904_v49  ;;  %v4741_v12 = vadd.f32 %v2027_v21, %v2012_v17  ;;  %v2302_v21 = vmul.f32 %v2300_v35, %v4441_v54  ;;  %v2042_v49 = vmul.f32 %v4754_v37, %v4412_v25 }
 0x2bb   : > { %v2332_v29 = vstv %s3416_s12  ;;  %v2357_v35 = vmul.f32 %v4349_v63, %v2356_v6  ;;  %v2360_v16 = vmul.f32 %v2356_v6, %v4441_v54  ;;  %s3433_s12 = sld [smem:[#allocation9 + $0x5d]] }
 0x2bd   : > { %2305 = vrot.lane.b32.xlu2 %v2301_v27, %s3687_s28  ;;  %2291 = vrot.lane.b32.xlu1 %v2286_v18, %s3686_s21 }
 0x2be   : > { %2289 = vrot.lane.b32.xlu0 %v2285_v58, %s3686_s21  ;;  %v2333_v58 = vmul.f32 %v2332_v29, %v4430_v44 }
 0x2bf   : > { %v4747_v24 = vpop.permute.xlu2 %2063  ;;  %v1979_v7 = vpop.permute.xlu1 %1978 }
 0x2c0   : > { %v1960_v57 = vpop.permute.xlu0 %1959  ;;  %v1987_v13 = vadd.f32 %v1979_v7, %v1964_v19  ;;  %v1988_v32 = vadd.f32 %v1979_v7, %v1965_v31  ;;  %v2334_v19 = vmul.f32 %v2332_v29, %v4441_v54  ;;  %v2397_v29 = vstv %s3419_s27  ;;  %s3417_s27 = sld [smem:[#allocation9 + $0x4d]] }
 0x2c1   : > { %v1968_v5 = vadd.f32 %v1960_v57, %v1945_v22  ;;  %v1969_v11 = vadd.f32 %v1960_v57, %v1946_v53  ;;  %v2083_v22 = vadd.f32 %v4747_v24, %v2042_v49 }
 0x2c5   : > { %2323 = vrot.lane.b32.xlu2 %v2318_v9, %s3688_s30  ;;  %2321 = vrot.lane.b32.xlu1 %v2317_v42, %s3688_s30 }
 0x2c6   : > { %2307 = vrot.lane.b32.xlu0 %v2302_v21, %s3687_s28  ;;  %v2903_v21 = vrot.slane %v4738_v62, 1  ;;  %v4791_v62 = vld [vmem:[#allocation3 + $0x30] sm:$0x7] }
 0x2c7   : > { %v4757_v46 = vpop.permute.xlu2 %2069  ;;  %v2002_v36 = vpop.permute.xlu1 %2001 }
 0x2c8   : > { %v1983_v34 = vpop.permute.xlu0 %1982  ;;  %v2010_v53 = vadd.f32 %v2002_v36, %v1987_v13  ;;  %v2011_v20 = vadd.f32 %v2002_v36, %v1988_v32  ;;  %v2358_v13 = vmul.f32 %v2356_v6, %v4430_v44  ;;  %v2900_v32 = vrot.slane %v4741_v12, 1 }
 0x2c9   : > { %v1991_v27 = vadd.f32 %v1983_v34, %v1968_v5  ;;  %v1992_v17 = vadd.f32 %v1983_v34, %v1969_v11 }
 0x2cd   : > { %2369 = vrot.lane.b32.xlu2 %v2357_v35, %s3684_s5  ;;  %2339 = vrot.lane.b32.xlu1 %v2334_v19, %s3689_s7 }
 0x2ce   : > { %2337 = vrot.lane.b32.xlu0 %v2333_v58, %s3689_s7  ;;  %v4794_v58 = vld [vmem:[#allocation3 + $0x38] sm:$0x7] }
 0x2cf   : > { %v4768_v25 = vpop.permute.xlu2 %2104  ;;  %v2025_v5 = vpop.permute.xlu1 %2024 }
 0x2d0   : > { %v4772_v31 = vadd.f32 %v4768_v25, %v2083_v22  ;;  %v2006_v18 = vpop.permute.xlu0 %2005  ;;  %v2033_v11 = vadd.f32 %v2025_v5, %v2010_v53  ;;  %v2034_v7 = vadd.f32 %v2025_v5, %v2011_v20  ;;  %v2398_v20 = vmul.f32 %v4349_v63, %v2397_v29 }
 0x2d1   : > { %v2014_v57 = vadd.f32 %v2006_v18, %v1991_v27  ;;  %v2015_v9 = vadd.f32 %v2006_v18, %v1992_v17 }
 0x2d2   : > { %v2899_v42 = vrot.slane %v2033_v11, 1  ;;  %v2902_v49 = vrot.slane %v2034_v7, 1  ;;  %v2362_v11 = vmul.f32 %v2356_v6, %v4794_v58 }
 0x2d4   : > { %v2901_v34 = vsel %vm1508_vm6, %v2899_v42, %v2900_v32  ;;  %v2904_v27 = vsel %vm1508_vm6, %v2902_v49, %v2903_v21  ;;  %v2438_v42 = vstv %s3420_s24  ;;  %s3427_s24 = sld [smem:[#allocation9 + $0x57]] }
 0x2d5   : > { %2375 = vrot.lane.b32.xlu2 %v2360_v16, %s3684_s5  ;;  %v4785_v36 = vadd.f32 %v2901_v34, %v4676_v1  ;;  %v4788_v12 = vadd.f32 %v2904_v27, %v4678_v15  ;;  %2373 = vrot.lane.b32.xlu1 %v2357_v35, %s3684_s5  ;;  %v2361_v1 = vmul.f32 %v2356_v6, %v4791_v62 }
 0x2d6   : > { %2371 = vrot.lane.b32.xlu0 %v2358_v13, %s3684_s5  ;;  %v2439_v27 = vmul.f32 %v2438_v42, %v4430_v44 }
 0x2d7   : > { %v4782_v17 = vpop.permute.xlu2 %2110  ;;  %v2062_v18 = vpop.permute.xlu1 %2061 }
 0x2d8   : > { %v2029_v53 = vpop.permute.xlu0 %2028  ;;  %v2073_v16 = vsel %vm316_vm4, %v2062_v18, %v4747_v24 }
 0x2d9   : > { %v2037_v22 = vadd.f32 %v2029_v53, %v2014_v57  ;;  %v2038_v19 = vadd.f32 %v2029_v53, %v2015_v9 }
 0x2da   : > { %v2620_v3 = vstv %s3427_s24  ;;  %s5505_s24 = sld [smem:[#allocation9 + $0x2a]] }
 0x2db   : > { %v2905_v5 = vrot.slane %v2037_v22, 1  ;;  %v2907_v15 = vrot.slane %v2038_v19, 1 }
 0x2dd   : > { %2410 = vrot.lane.b32.xlu2 %v2398_v20, %s3685_s10  ;;  %v2906_v35 = vsel %vm1508_vm6, %v2900_v32, %v2905_v5  ;;  %v2908_v63 = vsel %vm1508_vm6, %v2903_v21, %v2907_v15  ;;  %v4804_v7 = vadd.f32 %v2905_v5, %v4688_v50  ;;  %v4807_v57 = vadd.f32 %v2907_v15, %v4690_v4 }
 0x2de   : > { %v4810_v24 = vadd.f32 %v2906_v35, %v4630_v56  ;;  %v4813_v9 = vadd.f32 %v2908_v63, %v4628_v26  ;;  %2377 = vrot.lane.b32.xlu0 %v2361_v1, %s3684_s5  ;;  %2379 = vrot.lane.b32.xlu1 %v2362_v11, %s3684_s5  ;;  %v2401_v32 = vmul.f32 %v2397_v29, %v4441_v54  ;;  %v4821_v56 = vld [vmem:[#allocation2 + $0x20] sm:$0xff] }
 0x2df   : > { %v2140_v6 = vpop.permute.xlu2 %2139  ;;  %v2068_v50 = vpop.permute.xlu1 %2067  ;;  %v2399_v4 = vmul.f32 %v2397_v29, %v4430_v44  ;;  %v2041_v26 = vmul.f32 %v4821_v56, %v4754_v37  ;;  %v2402_v1 = vmul.f32 %v2397_v29, %v4791_v62  ;;  %v2403_v15 = vmul.f32 %v2397_v29, %v4794_v58 }
 0x2e0   : > { %v2066_v13 = vpop.permute.xlu0 %2065  ;;  %v2044_v11 = vmul.f32 %v4754_v37, %v4430_v44 }
 0x2e1   : > { %v2074_v21 = vsel %vm316_vm4, %v2066_v13, %v2068_v50  ;;  %v2082_v53 = vadd.f32 %v2073_v16, %v2041_v26 }
 0x2e2   : > { %v2084_v63 = vadd.f32 %v2074_v21, %v2041_v26 }
 0x2e5   : > { %2416 = vrot.lane.b32.xlu2 %v2401_v32, %s3685_s10 }
 0x2e6   : > { %2412 = vrot.lane.b32.xlu0 %v2399_v4, %s3685_s10  ;;  %2414 = vrot.lane.b32.xlu1 %v2398_v20, %s3685_s10  ;;  %v2461_v20 = vstv %s3421_s18  ;;  %v2440_v4 = vmul.f32 %v2438_v42, %v4441_v54  ;;  %s3434_s18 = sld [smem:[#allocation9 + $0x5e]] }
 0x2e7   : > { %v2163_v49 = vpop.permute.xlu2 %2162  ;;  %v2103_v19 = vpop.permute.xlu1 %2102 }
 0x2e8   : > { %v2072_v34 = vpop.permute.xlu0 %2071  ;;  %v2114_v18 = vsel %vm358_vm5, %v2103_v19, %v4768_v25  ;;  %v2462_v25 = vmul.f32 %v2461_v20, %v4430_v44  ;;  %v2441_v19 = vmul.f32 %v2438_v42, %v4794_v58 }
 0x2e9   : > { %v2075_v22 = vsel %vm316_vm4, %v4757_v46, %v2072_v34  ;;  %v2123_v5 = vadd.f32 %v2114_v18, %v2082_v53  ;;  %v2085_v46 = vadd.f32 %v2068_v50, %v2044_v11 }
 0x2ed   : > { %2445 = vrot.lane.b32.xlu2 %v2439_v27, %s3686_s21  ;;  %v2046_v27 = vmul.f32 %v4754_v37, %v4441_v54 }
 0x2ee   : > { %2418 = vrot.lane.b32.xlu0 %v2402_v1, %s3685_s10  ;;  %2420 = vrot.lane.b32.xlu1 %v2403_v15, %s3685_s10  ;;  %v2484_v1 = vstv %s3422_s20  ;;  %s3435_s20 = sld [smem:[#allocation9 + $0x5f]] }
 0x2ef   : > { %v2186_v16 = vpop.permute.xlu2 %2185  ;;  %v2109_v13 = vpop.permute.xlu1 %2108  ;;  %v2087_v11 = vadd.f32 %v2072_v34, %v2046_v27 }
 0x2f0   : > { %v2107_v35 = vpop.permute.xlu0 %2106  ;;  %v2126_v32 = vadd.f32 %v2109_v13, %v2085_v46 }
 0x2f1   : > { %v2115_v29 = vsel %vm358_vm5, %v2107_v35, %v2109_v13  ;;  %v2086_v35 = vadd.f32 %v2075_v22, %v2041_v26  ;;  %v2464_v26 = vmul.f32 %v2461_v20, %v4794_v58  ;;  %v2507_v22 = vstv %s3423_s23  ;;  %s3430_s23 = sld [smem:[#allocation9 + $0x5a]] }
 0x2f2   : > { %v2125_v53 = vadd.f32 %v2115_v29, %v2084_v63  ;;  %v2149_v18 = vadd.f32 %v2140_v6, %v2126_v32  ;;  %v2485_v63 = vmul.f32 %v2484_v1, %v4430_v44  ;;  %v2463_v32 = vmul.f32 %v2461_v20, %v4441_v54 }
 0x2f3   : > { %v2486_v20 = vmul.f32 %v2484_v1, %v4441_v54  ;;  %v4872_v54 = vld [vmem:[#allocation3 + $0x28] sm:$0xff] }
 0x2f4   : > { %v2148_v50 = vadd.f32 %v2140_v6, %v2125_v53  ;;  %v2172_v15 = vadd.f32 %v2163_v49, %v2149_v18 }
 0x2f5   : > { %2468 = vrot.lane.b32.xlu2 %v2462_v25, %s3687_s28 }
 0x2f6   : > { %2447 = vrot.lane.b32.xlu0 %v2440_v4, %s3686_s21  ;;  %2449 = vrot.lane.b32.xlu1 %v2441_v19, %s3686_s21  ;;  %v2171_v46 = vadd.f32 %v2163_v49, %v2148_v50  ;;  %v2195_v13 = vadd.f32 %v2186_v16, %v2172_v15  ;;  %v2508_v19 = vmul.f32 %v2507_v22, %v4430_v44 }
 0x2f7   : > { %v2209_v21 = vpop.permute.xlu2 %2208  ;;  %v2138_v29 = vpop.permute.xlu1 %2137  ;;  %v2487_v15 = vmul.f32 %v2484_v1, %v4794_v58  ;;  %v2509_v1 = vmul.f32 %v4872_v54, %v2507_v22 }
 0x2f8   : > { %v2113_v37 = vpop.permute.xlu0 %2112  ;;  %v2194_v42 = vadd.f32 %v2186_v16, %v2171_v46  ;;  %v4852_v4 = vadd.f32 %v2209_v21, %v2195_v13  ;;  %v2146_v34 = vadd.f32 %v2138_v29, %v2123_v5  ;;  %v2147_v27 = vadd.f32 %v2138_v29, %v4772_v31 }
 0x2f9   : > { %v2116_v25 = vsel %vm358_vm5, %v4782_v17, %v2113_v37  ;;  %v2128_v6 = vadd.f32 %v2113_v37, %v2087_v11  ;;  %v2538_v11 = vstv %s3425_s29  ;;  %s282_s29 = sld [smem:[#allocation9]] }
 0x2fa   : > { %v2127_v53 = vadd.f32 %v2116_v25, %v2086_v35  ;;  %v4855_v49 = vadd.f32 %v2209_v21, %v2194_v42  ;;  %v2539_v44 = vmul.f32 %v4821_v56, %v2538_v11 }
 0x2fd   : > { %2491 = vrot.lane.b32.xlu2 %v2485_v63, %s3688_s30 }
 0x2fe   : > { %2470 = vrot.lane.b32.xlu0 %v2463_v32, %s3687_s28  ;;  %2472 = vrot.lane.b32.xlu1 %v2464_v26, %s3687_s28 }
 0x2ff   : > { %v4860_v17 = vpop.permute.xlu2 %2239  ;;  %v2161_v31 = vpop.permute.xlu1 %2160 }
 0x300   : > { %v2142_v16 = vpop.permute.xlu0 %2141  ;;  %v2169_v50 = vadd.f32 %v2161_v31, %v2146_v34  ;;  %v2170_v21 = vadd.f32 %v2161_v31, %v2147_v27 }
 0x301   : > { %v2150_v5 = vadd.f32 %v2142_v16, %v2127_v53  ;;  %v2151_v18 = vadd.f32 %v2142_v16, %v2128_v6  ;;  %v2510_v6 = vmul.f32 %v2507_v22, %v4794_v58  ;;  %v2542_v53 = vmul.f32 %v4872_v54, %v2538_v11 }
 0x305   : > { %2514 = vrot.lane.b32.xlu2 %v2508_v19, %s3689_s7 }
 0x306   : > { %2493 = vrot.lane.b32.xlu0 %v2486_v20, %s3688_s30  ;;  %2495 = vrot.lane.b32.xlu1 %v2487_v15, %s3688_s30 }
 0x307   : > { %v4868_v46 = vpop.permute.xlu2 %2265  ;;  %v2184_v63 = vpop.permute.xlu1 %2183 }
 0x308   : > { %v2165_v35 = vpop.permute.xlu0 %2164  ;;  %v2192_v42 = vadd.f32 %v2184_v63, %v2169_v50  ;;  %v2193_v25 = vadd.f32 %v2184_v63, %v2170_v21  ;;  %v2544_v63 = vmul.f32 %v2538_v11, %v4794_v58 }
 0x309   : > { %v2173_v13 = vadd.f32 %v2165_v35, %v2150_v5  ;;  %v2174_v37 = vadd.f32 %v2165_v35, %v2151_v18  ;;  %v4884_v5 = vld [vmem:[#allocation3 + $0x18] sm:$0xff]  ;;  %v2579_v18 = vstv %s3426_s6  ;;  %s3436_s6 = sld [smem:[#allocation9 + $0x60]] }
 0x30a   : > { %v2540_v22 = vmul.f32 %v4884_v5, %v2538_v11  ;;  %v2580_v21 = vmul.f32 %v4821_v56, %v2579_v18 }
 0x30d   : > { %2551 = vrot.lane.b32.xlu2 %v2539_v44, %s3684_s5 }
 0x30e   : > { %2516 = vrot.lane.b32.xlu0 %v2509_v1, %s3689_s7  ;;  %2518 = vrot.lane.b32.xlu1 %v2510_v6, %s3689_s7  ;;  %v2583_v6 = vmul.f32 %v4872_v54, %v2579_v18 }
 0x30f   : > { %v2272_v29 = vpop.permute.xlu2 %2271  ;;  %v2207_v26 = vpop.permute.xlu1 %2206 }
 0x310   : > { %v2188_v32 = vpop.permute.xlu0 %2187  ;;  %v4880_v16 = vadd.f32 %v2207_v26, %v2192_v42  ;;  %v4882_v19 = vadd.f32 %v2207_v26, %v2193_v25  ;;  %v2222_v42 = vstv %s3410_s4  ;;  %s3437_s4 = sld [smem:[#allocation9 + $0x61]] }
 0x311   : > { %v2196_v34 = vadd.f32 %v2188_v32, %v2173_v13  ;;  %v2197_v27 = vadd.f32 %v2188_v32, %v2174_v37  ;;  %v2543_v37 = vmul.f32 %v2538_v11, %v4791_v62  ;;  %v2226_v25 = vmul.f32 %v4872_v54, %v2222_v42 }
 0x312   : > { %v2581_v11 = vmul.f32 %v4884_v5, %v2579_v18  ;;  %v2223_v26 = vmul.f32 %v4821_v56, %v2222_v42 }
 0x315   : > { %2557 = vrot.lane.b32.xlu2 %v2542_v53, %s3684_s5 }
 0x316   : > { %2553 = vrot.lane.b32.xlu0 %v2540_v22, %s3684_s5  ;;  %2555 = vrot.lane.b32.xlu1 %v2539_v44, %s3684_s5 }
 0x317   : > { %v2306_v31 = vpop.permute.xlu2 %2305  ;;  %v2238_v35 = vpop.permute.xlu1 %2237 }
 0x318   : > { %v2211_v50 = vpop.permute.xlu0 %2210  ;;  %v2245_v13 = vsel %vm316_vm4, %v2238_v35, %v4860_v17 }
 0x319   : > { %v4891_v20 = vadd.f32 %v2211_v50, %v2196_v34  ;;  %v4893_v15 = vadd.f32 %v2211_v50, %v2197_v27  ;;  %v2224_v27 = vmul.f32 %v4884_v5, %v2222_v42  ;;  %v2720_v50 = vstv %s3432_s8  ;;  %s3347_s8 = sld [smem:[#allocation9 + $0x7]] }
 0x31d   : > { %2592 = vrot.lane.b32.xlu2 %v2580_v21, %s3685_s10 }
 0x31e   : > { %2559 = vrot.lane.b32.xlu0 %v2543_v37, %s3684_s5  ;;  %2561 = vrot.lane.b32.xlu1 %v2544_v63, %s3684_s5  ;;  %v2252_v37 = vadd.f32 %v4860_v17, %v2224_v27  ;;  %v2251_v63 = vadd.f32 %v2245_v13, %v2223_v26  ;;  %v2585_v17 = vmul.f32 %v2579_v18, %v4794_v58 }
 0x31f   : > { %v4901_v44 = vpop.permute.xlu2 %2323  ;;  %v2244_v32 = vpop.permute.xlu1 %2243  ;;  %v2724_v13 = vmul.f32 %v4872_v54, %v2720_v50 }
 0x320   : > { %v2242_v1 = vpop.permute.xlu0 %2241  ;;  %v2254_v34 = vadd.f32 %v2244_v32, %v2226_v25 }
 0x321   : > { %v2246_v53 = vsel %vm316_vm4, %v2242_v1, %v2244_v32  ;;  %v2721_v1 = vmul.f32 %v4821_v56, %v2720_v50 }
 0x322   : > { %v2282_v22 = vadd.f32 %v2272_v29, %v2254_v34  ;;  %v2253_v32 = vadd.f32 %v2246_v53, %v2223_v26 }
 0x325   : > { %2598 = vrot.lane.b32.xlu2 %v2583_v6, %s3685_s10 }
 0x326   : > { %2594 = vrot.lane.b32.xlu0 %v2581_v11, %s3685_s10  ;;  %2596 = vrot.lane.b32.xlu1 %v2580_v21, %s3685_s10  ;;  %v2584_v11 = vmul.f32 %v2579_v18, %v4791_v62  ;;  %v2722_v18 = vmul.f32 %v4884_v5, %v2720_v50 }
 0x327   : > { %v4912_v35 = vpop.permute.xlu2 %2369  ;;  %v2270_v6 = vpop.permute.xlu1 %2269 }
 0x328   : > { %v2268_v25 = vpop.permute.xlu0 %2267  ;;  %v2274_v8 = vsel %vm358_vm5, %v2270_v6, %v2272_v29 }
 0x329   : > { %v2273_v42 = vsel %vm358_vm5, %v4868_v46, %v2268_v25  ;;  %v2280_v41 = vadd.f32 %v2268_v25, %v2252_v37  ;;  %v2281_v0 = vadd.f32 %v2274_v8, %v2253_v32  ;;  %v4930_v25 = vstv %s3433_s12  ;;  %s5375_s12 = sld [smem:[#allocation9 + $0x1c]] }
 0x32a   : > { %v2279_v34 = vadd.f32 %v2273_v42, %v2251_v63  ;;  %v4932_v32 = vstv %s3417_s27  ;;  %s5451_s27 = sld [smem:[#allocation9 + $0x23]] }
 0x32d   : > { %2733 = vrot.lane.b32.xlu2 %v2721_v1, %s3684_s5 }
 0x32e   : > { %2600 = vrot.lane.b32.xlu0 %v2584_v11, %s3685_s10  ;;  %2602 = vrot.lane.b32.xlu1 %v2585_v17, %s3685_s10 }
 0x32f   : > { %v4924_v21 = vpop.permute.xlu2 %2375  ;;  %v2292_v27 = vpop.permute.xlu1 %2291 }
 0x330   : > { %v2290_v46 = vpop.permute.xlu0 %2289  ;;  %v2297_v26 = vadd.f32 %v2292_v27, %v2281_v0  ;;  %v2298_v8 = vadd.f32 %v2292_v27, %v2282_v22  ;;  %v2762_v22 = vmul.f32 %v4821_v56, %v4930_v25 }
 0x331   : > { %v2295_v53 = vadd.f32 %v2290_v46, %v2279_v34  ;;  %v2296_v29 = vadd.f32 %v2290_v46, %v2280_v41  ;;  %v2352_v41 = vmul.f32 %v4872_v54, %v4932_v32  ;;  %v2725_v46 = vmul.f32 %v2720_v50, %v4791_v62 }
 0x333   : > { %v2311_v37 = vadd.f32 %v2306_v31, %v2295_v53  ;;  %v2312_v63 = vadd.f32 %v2306_v31, %v2296_v29  ;;  %v2726_v53 = vmul.f32 %v2720_v50, %v4794_v58  ;;  %v2765_v50 = vmul.f32 %v4872_v54, %v4930_v25 }
 0x335   : > { %2739 = vrot.lane.b32.xlu2 %v2724_v13, %s3684_s5  ;;  %v2393_v13 = vadd.f32 %v4924_v21, %v2352_v41 }
 0x336   : > { %2735 = vrot.lane.b32.xlu0 %v2722_v18, %s3684_s5  ;;  %2737 = vrot.lane.b32.xlu1 %v2721_v1, %s3684_s5 }
 0x337   : > { %v4935_v42 = vpop.permute.xlu2 %2410  ;;  %v2322_v34 = vpop.permute.xlu1 %2321 }
 0x338   : > { %v2308_v0 = vpop.permute.xlu0 %2307  ;;  %v2327_v11 = vadd.f32 %v2322_v34, %v2311_v37  ;;  %v2328_v17 = vadd.f32 %v2322_v34, %v2312_v63 }
 0x339   : > { %v2313_v31 = vadd.f32 %v2308_v0, %v2297_v26  ;;  %v2314_v6 = vadd.f32 %v2308_v0, %v2298_v8  ;;  %v2763_v0 = vmul.f32 %v4884_v5, %v4930_v25 }
 0x33b   : > { %v2329_v29 = vadd.f32 %v4901_v44, %v2313_v31  ;;  %v2330_v27 = vadd.f32 %v4901_v44, %v2314_v6 }
 0x33d   : > { %2774 = vrot.lane.b32.xlu2 %v2762_v22, %s3685_s10 }
 0x33e   : > { %2741 = vrot.lane.b32.xlu0 %v2725_v46, %s3684_s5  ;;  %2743 = vrot.lane.b32.xlu1 %v2726_v53, %s3684_s5  ;;  %s4962_s5 = sld [smem:[#allocation9 + $0x58]] }
 0x33f   : > { %v4949_v1 = vpop.permute.xlu2 %2416  ;;  %v2340_v63 = vpop.permute.xlu1 %2339 }
 0x340   : > { %v4953_v26 = vadd.f32 %v4949_v1, %v2393_v13  ;;  %v2338_v8 = vpop.permute.xlu0 %2337  ;;  %v2345_v44 = vadd.f32 %v2340_v63, %v2329_v29  ;;  %v2346_v41 = vadd.f32 %v2340_v63, %v2330_v27 }
 0x341   : > { %v2343_v18 = vadd.f32 %v2338_v8, %v2327_v11  ;;  %v2344_v37 = vadd.f32 %v2338_v8, %v2328_v17 }
 0x342   : > { %v2927_v34 = vrot.slane %v2345_v44, 1  ;;  %v2929_v46 = vrot.slane %v2346_v41, 1 }
 0x343   : > { %v2925_v31 = vrot.slane %v2343_v18, 1  ;;  %v2926_v6 = vrot.slane %v2344_v37, 1 }
 0x344   : > { %v2941_v29 = vadd.f32 %v2927_v34, %v4891_v20  ;;  %v2942_v27 = vadd.f32 %v2929_v46, %v4893_v15  ;;  %v2621_v20 = vmul.f32 %v4884_v5, %v2620_v3 }
 0x345   : > { %2780 = vrot.lane.b32.xlu2 %v2765_v50, %s3685_s10  ;;  %v2937_v13 = vadd.f32 %v2925_v31, %v4880_v16  ;;  %v2938_v53 = vadd.f32 %v2926_v6, %v4882_v19  ;;  %v2928_v11 = vsel %vm1508_vm6, %v2925_v31, %v2927_v34  ;;  %v2930_v17 = vsel %vm1508_vm6, %v2926_v6, %v2929_v46 }
 0x346   : > { %2776 = vrot.lane.b32.xlu0 %v2763_v0, %s3685_s10  ;;  %v2939_v16 = vadd.f32 %v2928_v11, %v4855_v49  ;;  %v2940_v19 = vadd.f32 %v2930_v17, %v4852_v4  ;;  %2778 = vrot.lane.b32.xlu1 %v2762_v22, %s3685_s10  ;;  %v2983_v37 = vrot.slane %v2941_v29, 2  ;;  %v2985_v63 = vrot.slane %v2942_v27, 2 }
 0x347   : > { %v4969_v8 = vpop.permute.xlu2 %2445  ;;  %v2977_v50 = vrot.slane %v2937_v13, 2  ;;  %v2980_v18 = vrot.slane %v2938_v53, 2  ;;  %v2374_v31 = vpop.permute.xlu1 %2373  ;;  %v2766_v49 = vmul.f32 %v4930_v25, %v4791_v62  ;;  %v2767_v34 = vmul.f32 %v4930_v25, %v4794_v58 }
 0x348   : > { %v2372_v44 = vpop.permute.xlu0 %2371  ;;  %v2978_v41 = vrot.slane %v2939_v16, 2  ;;  %v2981_v15 = vrot.slane %v2940_v19, 2  ;;  %v4980_v4 = vadd.f32 %v2983_v37, %v4804_v7  ;;  %v4983_v22 = vadd.f32 %v2985_v63, %v4807_v57 }
 0x349   : > { %v2381_v0 = vsel %vm316_vm4, %v4912_v35, %v2372_v44  ;;  %v2382_v6 = vsel %vm316_vm4, %v2374_v31, %v4924_v21  ;;  %v2643_v21 = vstv %s4962_s5  ;;  %v2802_v16 = vstv %s3434_s18  ;;  %s5844_s5 = sld [smem:[#allocation4]]  ;;  %s3690_s18 = smov 3  }
 0x34a   : > { %6292 = vst [vmem:[#allocation154_spill] sm:$0xff] %v4980_v4  ;;  %v2979_v46 = vsel %vm1587_vm7, %v2977_v50, %v2978_v41  ;;  %v2982_v35 = vsel %vm1587_vm7, %v2980_v18, %v2981_v15  ;;  %v2984_v13 = vsel %vm1587_vm7, %v2978_v41, %v2983_v37  ;;  %v2986_v53 = vsel %vm1587_vm7, %v2981_v15, %v2985_v63 }
 0x34b   : > { %6293 = vst [vmem:[#allocation155_spill] sm:$0xff] %v4983_v22  ;;  %v4994_v7 = vadd.f32 %v2984_v13, %v4810_v24  ;;  %v4997_v57 = vadd.f32 %v2986_v53, %v4813_v9  ;;  %v5002_v25 = vadd.f32 %v2979_v46, %v4785_v36  ;;  %v5005_v11 = vadd.f32 %v2982_v35, %v4788_v12  ;;  %v6341_v22 = vld [vmem:[#allocation74_spill] sm:$0xff] }
 0x34c   : > { %v2644_v29 = vmul.f32 %v4884_v5, %v2643_v21  ;;  %v2622_v50 = vmul.f32 %v4872_v54, %v2620_v3  ;;  %v2350_v36 = vmul.f32 %v4884_v5, %v4932_v32  ;;  %v2623_v18 = vmul.f32 %v2620_v3, %v4794_v58 }
 0x34d   : > { %6294 = vst [vmem:[#allocation156_spill] sm:$0xff] %v4994_v7  ;;  %2627 = vrot.lane.b32.xlu2 %v2621_v20, %s3686_s21  ;;  %v2349_v12 = vmul.f32 %v4821_v56, %v4932_v32  ;;  %v2803_v41 = vmul.f32 %v4884_v5, %v2802_v16  ;;  %v2645_v35 = vmul.f32 %v4872_v54, %v2643_v21 }
 0x34e   : > { %6295 = vst [vmem:[#allocation157_spill] sm:$0xff] %v4997_v57  ;;  %2782 = vrot.lane.b32.xlu0 %v2766_v49, %s3685_s10  ;;  %2784 = vrot.lane.b32.xlu1 %v2767_v34, %s3685_s10  ;;  %s3429_s10 = sld [smem:[#allocation9 + $0x59]]  ;;  %v2391_v37 = vadd.f32 %v2372_v44, %v2350_v36  ;;  %v2354_v53 = vmul.f32 %v4932_v32, %v4794_v58  ;;  %v6344_v57 = vld [vmem:[#allocation48_spill] sm:$0xff] }
 0x34f   : > { %6296 = vst [vmem:[#allocation158_spill] sm:$0xff] %v5002_v25  ;;  %v2469_v17 = vpop.permute.xlu2 %2468  ;;  %v2390_v63 = vadd.f32 %v2381_v0, %v2349_v12  ;;  %v2392_v15 = vadd.f32 %v2382_v6, %v2349_v12  ;;  %v2646_v0 = vmul.f32 %v2643_v21, %v4794_v58 }
 0x350   : > { %6297 = vst [vmem:[#allocation159_spill] sm:$0xff] %v5005_v11  ;;  %v2378_v24 = vpop.permute.xlu0 %2377  ;;  %v2380_v9 = vpop.permute.xlu1 %2379 }
 0x351   : > { %v2383_v27 = vsel %vm316_vm4, %v2378_v24, %v2380_v9  ;;  %v2395_v36 = vadd.f32 %v2380_v9, %v2354_v53  ;;  %v2825_v9 = vstv %s3435_s20  ;;  %v2689_v53 = vstv %s3430_s23 }
 0x355   : > { %2650 = vrot.lane.b32.xlu2 %v2644_v29, %s3687_s28  ;;  %v2666_v29 = vstv %s3429_s10  ;;  %s3444_s10 = sshll.u32 %s3737_s2, 6  ;;  %s205_s2 = scalar_lea.vmem [#allocation10], %s3338_s11 }
 0x356   : > { %2629 = vrot.lane.b32.xlu0 %v2622_v50, %s3686_s21  ;;  %2631 = vrot.lane.b32.xlu1 %v2623_v18, %s3686_s21  ;;  %s3230_s11 = scalar_lea.sflag [#allocation7], %s3813_s9 }
 0x357   : > { %v2492_v19 = vpop.permute.xlu2 %2491 }
 0x358   : > { %v2413_v20 = vpop.permute.xlu0 %2412  ;;  %v2415_v49 = vpop.permute.xlu1 %2414 }
 0x359   : > { %v2422_v3 = vsel %vm358_vm5, %v4935_v42, %v2413_v20  ;;  %v2432_v31 = vadd.f32 %v2413_v20, %v2391_v37  ;;  %v2423_v46 = vsel %vm358_vm5, %v2415_v49, %v4949_v1  ;;  %v2353_v42 = vmul.f32 %v4932_v32, %v4791_v62 }
 0x35a   : > { %v2431_v34 = vadd.f32 %v2422_v3, %v2390_v63  ;;  %v2433_v13 = vadd.f32 %v2423_v46, %v2392_v15  ;;  %v2804_v15 = vmul.f32 %v4872_v54, %v2802_v16  ;;  %v2805_v3 = vmul.f32 %v2802_v16, %v4794_v58 }
 0x35b   : > { %v2455_v44 = vadd.f32 %v4969_v8, %v2432_v31  ;;  %v2394_v37 = vadd.f32 %v2383_v27, %v2353_v42  ;;  %v2826_v31 = vmul.f32 %v4884_v5, %v2825_v9  ;;  %v2668_v16 = vmul.f32 %v4872_v54, %v2666_v29 }
 0x35c   : > { %v2454_v6 = vadd.f32 %v4969_v8, %v2431_v34  ;;  %v2667_v8 = vmul.f32 %v4884_v5, %v2666_v29 }
 0x35d   : > { %2809 = vrot.lane.b32.xlu2 %v2803_v41, %s3686_s21  ;;  %v2478_v24 = vadd.f32 %v2469_v17, %v2455_v44 }
 0x35e   : > { %2652 = vrot.lane.b32.xlu0 %v2645_v35, %s3687_s28  ;;  %v2477_v50 = vadd.f32 %v2469_v17, %v2454_v6  ;;  %2654 = vrot.lane.b32.xlu1 %v2646_v0, %s3687_s28  ;;  %v2669_v0 = vmul.f32 %v2666_v29, %v4794_v58 }
 0x35f   : > { %v2515_v1 = vpop.permute.xlu2 %2514  ;;  %v2501_v21 = vadd.f32 %v2492_v19, %v2478_v24 }
 0x360   : > { %v2500_v18 = vadd.f32 %v2492_v19, %v2477_v50  ;;  %v2419_v12 = vpop.permute.xlu0 %2418  ;;  %v2421_v20 = vpop.permute.xlu1 %2420 }
 0x361   : > { %v5037_v63 = vadd.f32 %v2515_v1, %v2501_v21  ;;  %v2424_v32 = vsel %vm358_vm5, %v2419_v12, %v2421_v20  ;;  %v2436_v41 = vadd.f32 %v2421_v20, %v2395_v36  ;;  %v2827_v21 = vmul.f32 %v4872_v54, %v2825_v9  ;;  %v5067_v20 = vld [vmem:[#allocation2 + $0x28] sm:$0xff] }
 0x362   : > { %v5039_v62 = vadd.f32 %v2515_v1, %v2500_v18  ;;  %v2435_v17 = vadd.f32 %v2424_v32, %v2394_v37  ;;  %v2828_v36 = vmul.f32 %v2825_v9, %v4794_v58  ;;  %v2848_v18 = vstv %s3436_s6  ;;  %s3242_s6 = sshll.u32 %s205_s2, 4  ;;  %s3243_s6 = int_to_ptr.vmem [resolvable:$true] %s3242_s6 }
 0x363   : > { %6298 = vst [vmem:[#allocation160_spill] sm:$0xff] %v5037_v63  ;;  %v283_v12 = vstv %s282_s29  ;;  %s3241_s29 = scalar_lea.hbm %s6029_s3, %s3444_s10 }
 0x364   : > { %6299 = vst [vmem:[#allocation161_spill] sm:$0xff] %v5039_v62  ;;  %v289_v32 = vmul.f32 %v5067_v20, %v283_v12 }
 0x365   : > { %2673 = vrot.lane.b32.xlu2 %v2667_v8, %s3688_s30 }
 0x366   : > { %2811 = vrot.lane.b32.xlu0 %v2804_v15, %s3686_s21  ;;  %2813 = vrot.lane.b32.xlu1 %v2805_v3, %s3686_s21  ;;  %s3424_s21 = sld [smem:[#allocation9 + $0x54]] }
 0x367   : > { %v5046_v27 = vpop.permute.xlu2 %2551 }
 0x368   : > { %v2448_v19 = vpop.permute.xlu0 %2447  ;;  %v2450_v46 = vpop.permute.xlu1 %2449 }
 0x369   : > { %v2456_v49 = vadd.f32 %v2448_v19, %v2433_v13  ;;  %v2457_v34 = vadd.f32 %v2448_v19, %v4953_v26  ;;  %v2458_v35 = vadd.f32 %v2450_v46, %v2435_v17  ;;  %v2459_v44 = vadd.f32 %v2450_v46, %v2436_v41 }
 0x36a   : > { %v2690_v13 = vmul.f32 %v4884_v5, %v2689_v53  ;;  %v2849_v17 = vmul.f32 %v4884_v5, %v2848_v18  ;;  %v288_v46 = vmul.f32 %v4821_v56, %v283_v12 }
 0x36c   : > { %v5062_v8 = vstv %s3424_s21  ;;  %s3244_s21 = sshll.u32 %s3241_s29, 4  ;;  %s3245_s21 = int_to_ptr.hbm [resolvable:$true] %s3244_s21 }
 0x36d   : > { %2832 = vrot.lane.b32.xlu2 %v2826_v31, %s3687_s28  ;;  %v2534_v41 = vmul.f32 %v4872_v54, %v5062_v8 }
 0x36e   : > { %2675 = vrot.lane.b32.xlu0 %v2668_v16, %s3688_s30  ;;  %2677 = vrot.lane.b32.xlu1 %v2669_v0, %s3688_s30  ;;  %v2692_v16 = vmul.f32 %v2689_v53, %v4794_v58  ;;  %v319_v0 = vsel %vm316_vm4, %v3941_v23, %v3957_v33  ;;  %v5094_v23 = vld [vmem:[#allocation2 + $0x8] sm:$0xff] }
 0x36f   : > { %v5055_v6 = vpop.permute.xlu2 %2557 }
 0x370   : > { %v2471_v26 = vpop.permute.xlu0 %2470  ;;  %v2473_v1 = vpop.permute.xlu1 %2472 }
 0x371   : > { %v2479_v42 = vadd.f32 %v2471_v26, %v2456_v49  ;;  %v2480_v24 = vadd.f32 %v2471_v26, %v2457_v34  ;;  %v2481_v50 = vadd.f32 %v2473_v1, %v2458_v35  ;;  %v2482_v29 = vadd.f32 %v2473_v1, %v2459_v44 }
 0x372   : > { %v2691_v34 = vmul.f32 %v4872_v54, %v2689_v53  ;;  %v331_v35 = vadd.f32 %v3957_v33, %v289_v32  ;;  %v2575_v44 = vadd.f32 %v5055_v6, %v2534_v41  ;;  %v2871_v26 = vstv %s3437_s4  ;;  %s3621_s4 = sshra.s32 %s3245_s21, 4  ;;  %s3622_s4 = int_to_ptr.hbm [resolvable:$true] %s3621_s4 }
 0x373   : > { %v285_v33 = vmul.f32 %v5094_v23, %v283_v12  ;;  %v467_v41 = vstv %s3347_s8  ;;  %s3623_s8 = scalar_lea.hbm %s3622_s4, 64  ;;  %p3628_p0 = scmp.lt.s32.totalorder %s3622_s4, %s6029_s3 }
 0x374   : > { %v373_v1 = vadd.f32 %v3967_v39, %v331_v35  ;;  %v473_v35 = vmul.f32 %v5067_v20, %v467_v41  ;;  %p3624_p4 = scmp.ne.s32.totalorder %s3622_s4, %s3623_s8 }
 0x375   : > { %2696 = vrot.lane.b32.xlu2 %v2690_v13, %s3689_s7  ;;  %v361_v13 = vsel %vm358_vm5, %v4002_v61, %v3967_v39 }
 0x376   : > { %2834 = vrot.lane.b32.xlu0 %v2827_v21, %s3687_s28  ;;  %2836 = vrot.lane.b32.xlu1 %v2828_v36, %s3687_s28  ;;  %s5163_s28 = sld [smem:[#allocation9 + $0xe]]  ;;  %p3625_p6 = pnand %p3624_p4, %p3768_p11 }
 0x377   : > { %v5065_v37 = vpop.permute.xlu2 %2592 }
 0x378   : > { %v2494_v15 = vpop.permute.xlu0 %2493  ;;  %v2496_v19 = vpop.permute.xlu1 %2495  ;;  %p3626_p13 = pneg %p3625_p6 }
 0x379   : > { %v2502_v3 = vadd.f32 %v2494_v15, %v2479_v42  ;;  %v2503_v9 = vadd.f32 %v2494_v15, %v2480_v24  ;;  %v2504_v31 = vadd.f32 %v2496_v19, %v2481_v50  ;;  %v2505_v49 = vadd.f32 %v2496_v19, %v2482_v29 }
 0x37a   : > { %v330_v24 = vadd.f32 %v319_v0, %v288_v46  ;;  %v2872_v29 = vmul.f32 %v4884_v5, %v2871_v26  ;;  %v317_v19 = vsel %vm316_vm4, %v3969_v40, %v3981_v48  ;;  %v318_v0 = vsel %vm316_vm4, %v3965_v38, %v3991_v55 }
 0x37b   : > { %v360_v38 = vsel %vm358_vm5, %v3949_v28, %v4000_v60  ;;  %v2873_v28 = vmul.f32 %v4872_v54, %v2871_v26 }
 0x37c   : > { %v372_v61 = vadd.f32 %v361_v13, %v330_v24  ;;  %v468_v24 = vmul.f32 %v4821_v56, %v467_v41 }
 0x37d   : > { %2855 = vrot.lane.b32.xlu2 %v2849_v17, %s3688_s30  ;;  %v2850_v17 = vmul.f32 %v4872_v54, %v2848_v18 }
 0x37e   : > { %2698 = vrot.lane.b32.xlu0 %v2691_v34, %s3689_s7  ;;  %2700 = vrot.lane.b32.xlu1 %v2692_v16, %s3689_s7  ;;  %v396_v34 = vadd.f32 %v3977_v45, %v373_v1  ;;  %v326_v16 = vadd.f32 %v317_v19, %v288_v46 }
 0x37f   : > { %v5087_v42 = vpop.permute.xlu2 %2598 }
 0x380   : > { %v5092_v53 = vadd.f32 %v5087_v42, %v2575_v44  ;;  %v2517_v50 = vpop.permute.xlu0 %2516  ;;  %v2519_v32 = vpop.permute.xlu1 %2518  ;;  %v5114_v44 = vld [vmem:[#allocation2 + $0x18] sm:$0xff]  ;;  %v419_v40 = vadd.f32 %v3987_v51, %v396_v34  ;;  %v6304_v34 = vld [vmem:[#allocation15_spill] sm:$0xff] }
 0x381   : > { %v5098_v21 = vadd.f32 %v2517_v50, %v2502_v3  ;;  %v5100_v36 = vadd.f32 %v2517_v50, %v2503_v9  ;;  %v5102_v39 = vadd.f32 %v2519_v32, %v2504_v31  ;;  %v5104_v15 = vadd.f32 %v2519_v32, %v2505_v49 }
 0x382   : > { %v2851_v3 = vmul.f32 %v2848_v18, %v4794_v58  ;;  %v327_v9 = vadd.f32 %v3981_v48, %v285_v33  ;;  %v287_v31 = vmul.f32 %v5114_v44, %v283_v12  ;;  %v395_v49 = vadd.f32 %v3977_v45, %v372_v61 }
 0x383   : > { %6300 = vst [vmem:[#allocation162_spill] sm:$0xff] %v5098_v21  ;;  %v514_v18 = vadd.f32 %v4031_v14, %v473_v35  ;;  %v502_v48 = vsel %vm316_vm4, %v4071_v43, %v4031_v14  ;;  %v359_v45 = vsel %vm358_vm5, %v3989_v52, %v3979_v47  ;;  %v543_v43 = vsel %vm358_vm5, %v4095_v10, %v4055_v30 }
 0x384   : > { %6301 = vst [vmem:[#allocation163_spill] sm:$0xff] %v5100_v36  ;;  %v329_v12 = vadd.f32 %v3991_v55, %v287_v31  ;;  %v369_v13 = vadd.f32 %v3979_v47, %v327_v9  ;;  %v418_v14 = vadd.f32 %v3987_v51, %v395_v49  ;;  %v328_v55 = vadd.f32 %v318_v0, %v288_v46  ;;  %v6307_v31 = vld [vmem:[#allocation26_spill] sm:$0xff] }
 0x385   : > { %6302 = vst [vmem:[#allocation164_spill] sm:$0xff] %v5102_v39  ;;  %2878 = vrot.lane.b32.xlu2 %v2872_v29, %s3689_s7  ;;  %v513_v33 = vadd.f32 %v502_v48, %v468_v24  ;;  %v368_v29 = vadd.f32 %v359_v45, %v326_v16  ;;  %v442_v51 = vadd.f32 %v3998_v59, %v419_v40 }
 0x386   : > { %6303 = vst [vmem:[#allocation165_spill] sm:$0xff] %v5104_v15  ;;  %2857 = vrot.lane.b32.xlu0 %v2850_v17, %s3688_s30  ;;  %2859 = vrot.lane.b32.xlu1 %v2851_v3, %s3688_s30  ;;  %v555_v61 = vadd.f32 %v4055_v30, %v514_v18  ;;  %v2874_v10 = vmul.f32 %v2871_v26, %v4794_v58  ;;  %v6305_v30 = vld [vmem:[#allocation14_spill] sm:$0xff]  ;;  %s5221_s30 = sld [smem:[#allocation9 + $0x15]] }
 0x387   : > { %v370_v32 = vadd.f32 %v360_v38, %v328_v55  ;;  %v554_v17 = vadd.f32 %v543_v43, %v513_v33  ;;  %v441_v46 = vadd.f32 %v3998_v59, %v418_v14  ;;  %v391_v19 = vadd.f32 %v4010_v2, %v368_v29  ;;  %v5165_v3 = vpop.permute.xlu2 %2733  ;;  %v6312_v29 = vld [vmem:[#allocation24_spill] sm:$0xff] }
 0x388   : > { %v5135_v1 = vpop.permute.xlu0 %2553  ;;  %v2556_v47 = vpop.permute.xlu1 %2555  ;;  %v5169_v26 = vadd.f32 %v6305_v30, %v442_v51  ;;  %v578_v49 = vadd.f32 %v6307_v31, %v555_v61  ;;  %v469_v0 = vmul.f32 %v5094_v23, %v467_v41  ;;  %v471_v14 = vmul.f32 %v5114_v44, %v467_v41 }
 0x389   : > { %v5147_v52 = vsel %vm316_vm4, %v5046_v27, %v5135_v1  ;;  %v5151_v50 = vsel %vm316_vm4, %v2556_v47, %v5055_v6  ;;  %v371_v27 = vadd.f32 %v4000_v60, %v329_v12  ;;  %v392_v6 = vadd.f32 %v4010_v2, %v369_v13  ;;  %v6306_v60 = vld [vmem:[#allocation17_spill] sm:$0xff]  ;;  %v6308_v2 = vld [vmem:[#allocation18_spill] sm:$0xff]  ;;  %v6309_v12 = vld [vmem:[#allocation19_spill] sm:$0xff] }
 0x38a   : > { %v393_v35 = vadd.f32 %v6304_v34, %v370_v32  ;;  %v414_v9 = vadd.f32 %v6306_v60, %v391_v19  ;;  %v577_v18 = vadd.f32 %v6307_v31, %v554_v17  ;;  %v5180_v45 = vadd.f32 %v6305_v30, %v441_v46  ;;  %v6310_v47 = vld [vmem:[#allocation20_spill] sm:$0xff] }
 0x38b   : > { %v394_v54 = vadd.f32 %v6304_v34, %v371_v27  ;;  %v415_v59 = vadd.f32 %v6306_v60, %v392_v6  ;;  %v6314_v27 = vld [vmem:[#allocation27_spill] sm:$0xff]  ;;  %v6315_v17 = vld [vmem:[#allocation16_spill] sm:$0xff]  ;;  %v2532_v6 = vmul.f32 %v4884_v5, %v5062_v8 }
 0x38c   : > { %v416_v16 = vadd.f32 %v6308_v2, %v393_v35  ;;  %v437_v13 = vadd.f32 %v6309_v12, %v414_v9  ;;  %v501_v41 = vsel %vm316_vm4, %v6315_v17, %v6314_v27  ;;  %v6316_v46 = vld [vmem:[#allocation28_spill] sm:$0xff]  ;;  %v6317_v35 = vld [vmem:[#allocation30_spill] sm:$0xff]  ;;  %v2531_v9 = vmul.f32 %v4821_v56, %v5062_v8 }
 0x38d   : > { %v417_v40 = vadd.f32 %v6308_v2, %v394_v54  ;;  %v438_v38 = vadd.f32 %v6309_v12, %v415_v59  ;;  %v601_v19 = vadd.f32 %v6316_v46, %v578_v49  ;;  %v6318_v54 = vld [vmem:[#allocation29_spill] sm:$0xff]  ;;  %v600_v60 = vadd.f32 %v6316_v46, %v577_v18  ;;  %v6319_v59 = vld [vmem:[#allocation23_spill] sm:$0xff] }
 0x38e   : > { %2880 = vrot.lane.b32.xlu0 %v2873_v28, %s3689_s7  ;;  %2882 = vrot.lane.b32.xlu1 %v2874_v10, %s3689_s7  ;;  %v439_v55 = vadd.f32 %v6310_v47, %v416_v16  ;;  %v6311_v28 = vld [vmem:[#allocation25_spill] sm:$0xff]  ;;  %v6313_v10 = vld [vmem:[#allocation22_spill] sm:$0xff]  ;;  %v541_v30 = vsel %vm358_vm5, %v6318_v54, %v6317_v35  ;;  %v6320_v16 = vld [vmem:[#allocation32_spill] sm:$0xff]  ;;  %v512_v18 = vadd.f32 %v6314_v27, %v471_v14  ;;  %s5331_s7 = sld [smem:[#allocation9 + $0x5b]] }
 0x38f   : > { %v440_v33 = vadd.f32 %v6310_v47, %v417_v40  ;;  %v500_v51 = vsel %vm316_vm4, %v6312_v29, %v6311_v28  ;;  %v5197_v32 = vadd.f32 %v6313_v10, %v437_v13  ;;  %v5206_v34 = vadd.f32 %v6313_v10, %v438_v38  ;;  %v6321_v40 = vld [vmem:[#allocation21_spill] sm:$0xff]  ;;  %v6322_v29 = vld [vmem:[#allocation31_spill] sm:$0xff]  ;;  %v5236_v46 = vpop.permute.xlu2 %2739  ;;  %v6323_v14 = vld [vmem:[#allocation34_spill] sm:$0xff] }
 0x390   : > { %v2560_v48 = vpop.permute.xlu0 %2559  ;;  %v5185_v43 = vpop.permute.xlu1 %2561  ;;  %v5215_v31 = vadd.f32 %v6319_v59, %v439_v55  ;;  %v509_v2 = vadd.f32 %v500_v51, %v468_v24  ;;  %v510_v49 = vadd.f32 %v6311_v28, %v469_v0  ;;  %v511_v13 = vadd.f32 %v501_v41, %v468_v24  ;;  %v6324_v54 = vld [vmem:[#allocation35_spill] sm:$0xff] }
 0x391   : > { %v5194_v61 = vsel %vm316_vm4, %v2560_v48, %v5185_v43  ;;  %v542_v48 = vsel %vm358_vm5, %v6321_v40, %v6320_v16  ;;  %v5224_v12 = vadd.f32 %v6319_v59, %v440_v33  ;;  %v5228_v38 = vstv %s5163_s28 }
 0x392   : > { %v550_v47 = vadd.f32 %v541_v30, %v509_v2  ;;  %v551_v55 = vadd.f32 %v6317_v35, %v510_v49  ;;  %v624_v51 = vadd.f32 %v6322_v29, %v601_v19  ;;  %v2573_v0 = vadd.f32 %v5135_v1, %v2532_v6  ;;  %v6325_v2 = vld [vmem:[#allocation37_spill] sm:$0xff] }
 0x393   : > { %v552_v28 = vadd.f32 %v542_v48, %v511_v13  ;;  %v553_v10 = vadd.f32 %v6320_v16, %v512_v18  ;;  %v623_v17 = vadd.f32 %v6322_v29, %v600_v60  ;;  %v2572_v33 = vadd.f32 %v5147_v52, %v2531_v9  ;;  %v6326_v49 = vld [vmem:[#allocation33_spill] sm:$0xff]  ;;  %v6327_v48 = vld [vmem:[#allocation38_spill] sm:$0xff] }
 0x394   : > { %v573_v27 = vadd.f32 %v6323_v14, %v550_v47  ;;  %v2574_v41 = vadd.f32 %v5151_v50, %v2531_v9  ;;  %v574_v6 = vadd.f32 %v6323_v14, %v551_v55  ;;  %v5257_v16 = vadd.f32 %v6326_v49, %v624_v51  ;;  %v6328_v47 = vld [vmem:[#allocation40_spill] sm:$0xff]  ;;  %v6330_v14 = vld [vmem:[#allocation39_spill] sm:$0xff] }
 0x395   : > { %v575_v30 = vadd.f32 %v6324_v54, %v552_v28  ;;  %v576_v59 = vadd.f32 %v6324_v54, %v553_v10  ;;  %v2536_v18 = vmul.f32 %v5062_v8, %v4794_v58  ;;  %v831_v29 = vstv %s5221_s30  ;;  %v6329_v10 = vld [vmem:[#allocation41_spill] sm:$0xff]  ;;  %v6333_v54 = vld [vmem:[#allocation50_spill] sm:$0xff]  ;;  %s3627_s30 = scalar_lea.hbm %s6029_s3, 128 }
 0x396   : > { %v596_v50 = vadd.f32 %v6325_v2, %v573_v27  ;;  %v597_v40 = vadd.f32 %v6325_v2, %v574_v6  ;;  %v5271_v51 = vadd.f32 %v6326_v49, %v623_v17  ;;  %v651_v58 = vmul.f32 %v5094_v23, %v5228_v38  ;;  %v6332_v6 = vld [vmem:[#allocation44_spill] sm:$0xff]  ;;  %v6334_v23 = vld [vmem:[#allocation45_spill] sm:$0xff]  ;;  %p3629_p3 = scmp.lt.s32.totalorder %s3627_s30, %s3623_s8 }
 0x397   : > { %v598_v13 = vadd.f32 %v6327_v48, %v575_v30  ;;  %v684_v30 = vsel %vm316_vm4, %v6333_v54, %v6330_v14  ;;  %v832_v49 = vmul.f32 %v4821_v56, %v831_v29  ;;  %v5400_v11 = vstv %s5331_s7 }
 0x398   : > { %v2595_v24 = vpop.permute.xlu0 %2594  ;;  %v2597_v1 = vpop.permute.xlu1 %2596  ;;  %v619_v55 = vadd.f32 %v6328_v47, %v596_v50  ;;  %v6335_v50 = vld [vmem:[#allocation56_spill] sm:$0xff]  ;;  %p3630_p5 = por %p3629_p3, %p3628_p0 }
 0x399   : > { %v2604_v35 = vsel %vm358_vm5, %v5065_v37, %v2595_v24  ;;  %v5242_v19 = vadd.f32 %v2595_v24, %v2573_v0  ;;  %v2605_v52 = vsel %vm358_vm5, %v2597_v1, %v5087_v42  ;;  %v655_v37 = vmul.f32 %v5067_v20, %v5228_v38  ;;  %v5266_v0 = vld [vmem:[#allocation3 + $0x30] sm:$0x7]  ;;  %v6331_v1 = vld [vmem:[#allocation43_spill] sm:$0xff] }
 0x39a   : > { %v5246_v60 = vadd.f32 %v2604_v35, %v2572_v33  ;;  %v5254_v9 = vadd.f32 %v2605_v52, %v2574_v41  ;;  %v599_v42 = vadd.f32 %v6327_v48, %v576_v59  ;;  %v2535_v28 = vmul.f32 %v5266_v0, %v5062_v8  ;;  %p3631_p8 = pnand %p3630_p5, %p3626_p13 }
 0x39b   : > { %v621_v33 = vadd.f32 %v6329_v10, %v598_v13  ;;  %v5276_v24 = vmul.f32 %v4821_v56, %v5228_v38  ;;  %v696_v27 = vadd.f32 %v6330_v14, %v655_v37  ;;  %v620_v41 = vadd.f32 %v6328_v47, %v597_v40  ;;  %v6337_v47 = vld [vmem:[#allocation70_spill] sm:$0xff] }
 0x39c   : > { %v622_v35 = vadd.f32 %v6329_v10, %v599_v42  ;;  %v642_v8 = vadd.f32 %v6331_v1, %v619_v55  ;;  %v833_v52 = vmul.f32 %v5114_v44, %v831_v29  ;;  %v2577_v59 = vadd.f32 %v5185_v43, %v2536_v18  ;;  %v6336_v42 = vld [vmem:[#allocation71_spill] sm:$0xff]  ;;  %v6338_v10 = vld [vmem:[#allocation73_spill] sm:$0xff]  ;;  %v5302_v18 = vpop.permute.xlu2 %2774 }
 0x39d   : > { %v644_v17 = vadd.f32 %v6332_v6, %v621_v33  ;;  %v725_v37 = vsel %vm358_vm5, %v6335_v50, %v6334_v23  ;;  %v835_v40 = vmul.f32 %v5067_v20, %v831_v29  ;;  %v2576_v48 = vadd.f32 %v5194_v61, %v2535_v28  ;;  %v6339_v33 = vld [vmem:[#allocation60_spill] sm:$0xff] }
 0x39e   : > { %v854_v55 = vsel %vm316_vm4, %v6337_v47, %v6336_v42  ;;  %v855_v43 = vsel %vm316_vm4, %v6339_v33, %v6338_v10  ;;  %v643_v56 = vadd.f32 %v6331_v1, %v620_v41  ;;  %v5309_v29 = vadd.f32 %v6332_v6, %v622_v35  ;;  %v6340_v33 = vld [vmem:[#allocation63_spill] sm:$0xff] }
 0x39f   : > { %v695_v61 = vadd.f32 %v684_v30, %v5276_v24  ;;  %v737_v50 = vadd.f32 %v6334_v23, %v696_v27  ;;  %v861_v47 = vadd.f32 %v6336_v42, %v833_v52  ;;  %v882_v4 = vsel %vm358_vm5, %v6341_v22, %v6340_v33 }
 0x3a0   : > { %v2601_v2 = vpop.permute.xlu0 %2600  ;;  %v2603_v13 = vpop.permute.xlu1 %2602  ;;  %v6139_v41 = vrot.slane %v5257_v16, 1  ;;  %v860_v1 = vadd.f32 %v854_v55, %v832_v49  ;;  %v862_v6 = vadd.f32 %v855_v43, %v832_v49  ;;  %v6140_v30 = vrot.slane %v5271_v51, 1 }
 0x3a1   : > { %v2606_v14 = vsel %vm358_vm5, %v2601_v2, %v2603_v13  ;;  %v5305_v54 = vadd.f32 %v2603_v13, %v2577_v59  ;;  %v6342_v2 = vld [vmem:[#allocation77_spill] sm:$0xff]  ;;  %v6343_v59 = vld [vmem:[#allocation76_spill] sm:$0xff]  ;;  %v736_v35 = vadd.f32 %v725_v37, %v695_v61  ;;  %v863_v27 = vadd.f32 %v6338_v10, %v835_v40  ;;  %v6346_v40 = vld [vmem:[#allocation46_spill] sm:$0xff] }
 0x3a2   : > { %v5312_v28 = vadd.f32 %v2606_v14, %v2576_v48  ;;  %v883_v13 = vsel %vm358_vm5, %v6343_v59, %v6342_v2  ;;  %v1509_v48 = vrot.slane %v642_v8, 1  ;;  %v1510_v14 = vrot.slane %v644_v17, 1  ;;  %v6345_v17 = vld [vmem:[#allocation47_spill] sm:$0xff] }
 0x3a3   : > { %v1512_v52 = vrot.slane %v643_v56, 1  ;;  %v6138_v23 = vrot.slane %v5309_v29, 1  ;;  %v888_v42 = vadd.f32 %v882_v4, %v860_v1  ;;  %v890_v22 = vadd.f32 %v883_v13, %v862_v6  ;;  %v6347_v10 = vld [vmem:[#allocation79_spill] sm:$0xff] }
 0x3a4   : > { %v760_v7 = vadd.f32 %v6344_v57, %v737_v50  ;;  %v653_v59 = vmul.f32 %v5114_v44, %v5228_v38  ;;  %v889_v37 = vadd.f32 %v6340_v33, %v861_v47  ;;  %v891_v49 = vadd.f32 %v6342_v2, %v863_v27  ;;  %v6350_v2 = vld [vmem:[#allocation36_spill] sm:$0xff]  ;;  %v6352_v27 = vld [vmem:[#allocation51_spill] sm:$0xff] }
 0x3a5   : > { %v682_v55 = vsel %vm316_vm4, %v6346_v40, %v6345_v17  ;;  %v759_v4 = vadd.f32 %v6344_v57, %v736_v35  ;;  %v906_v43 = vadd.f32 %v6347_v10, %v890_v22  ;;  %v5348_v61 = vadd.f32 %v6139_v41, %v5169_v26  ;;  %v6349_v26 = vld [vmem:[#allocation49_spill] sm:$0xff]  ;;  %v6351_v35 = vld [vmem:[#allocation66_spill] sm:$0xff]  ;;  %v6358_v41 = vld [vmem:[#allocation55_spill] sm:$0xff] }
 0x3a6   : > { %v5351_v50 = vsel %vm1508_vm6, %v1509_v48, %v1510_v14  ;;  %v907_v47 = vadd.f32 %v6347_v10, %v891_v49  ;;  %v5366_v33 = vsel %vm1508_vm6, %v1510_v14, %v6140_v30  ;;  %v683_v13 = vsel %vm316_vm4, %v6350_v2, %v6349_v26  ;;  %v5378_v49 = vpop.permute.xlu2 %2780  ;;  %v6354_v10 = vld [vmem:[#allocation80_spill] sm:$0xff]  ;;  %v6362_v30 = vld [vmem:[#allocation54_spill] sm:$0xff] }
 0x3a7   : > { %v904_v1 = vadd.f32 %v6351_v35, %v888_v42  ;;  %v691_v6 = vadd.f32 %v682_v55, %v5276_v24  ;;  %v692_v48 = vadd.f32 %v6345_v17, %v651_v58  ;;  %v783_v22 = vadd.f32 %v6352_v27, %v760_v7  ;;  %6353 = vst [vmem:[#allocation14_spill] sm:$0xff] %v5378_v49  ;;  %v6355_v42 = vld [vmem:[#allocation69_spill] sm:$0xff]  ;;  %v6357_v17 = vld [vmem:[#allocation52_spill] sm:$0xff] }
 0x3a8   : > { %v5333_v8 = vpop.permute.xlu0 %2735  ;;  %v2738_v56 = vpop.permute.xlu1 %2737  ;;  %v694_v14 = vadd.f32 %v6349_v26, %v653_v59  ;;  %v782_v40 = vadd.f32 %v6352_v27, %v759_v4  ;;  %v922_v2 = vadd.f32 %v6355_v42, %v906_v43  ;;  %v693_v55 = vadd.f32 %v683_v13, %v5276_v24  ;;  %v6356_v58 = vld [vmem:[#allocation53_spill] sm:$0xff]  ;;  %v6359_v59 = vld [vmem:[#allocation42_spill] sm:$0xff]  ;;  %v6361_v27 = vld [vmem:[#allocation83_spill] sm:$0xff] }
 0x3a9   : > { %v5343_v38 = vsel %vm316_vm4, %v5165_v3, %v5333_v8  ;;  %v5356_v57 = vsel %vm316_vm4, %v2738_v56, %v5236_v46  ;;  %v5361_v3 = vsel %vm1508_vm6, %v1512_v52, %v6138_v23  ;;  %v905_v52 = vadd.f32 %v6351_v35, %v889_v37  ;;  %v6360_v26 = vld [vmem:[#allocation82_spill] sm:$0xff] }
 0x3aa   : > { %6348 = vst [vmem:[#allocation15_spill] sm:$0xff] %v5356_v57  ;;  %v920_v56 = vadd.f32 %v6354_v10, %v904_v1  ;;  %v723_v7 = vsel %vm358_vm5, %v6357_v17, %v6356_v58  ;;  %v923_v37 = vadd.f32 %v6355_v42, %v907_v47  ;;  %v733_v35 = vadd.f32 %v6356_v58, %v692_v48  ;;  %v6363_v42 = vld [vmem:[#allocation85_spill] sm:$0xff]  ;;  %v6435_v57 = vld [vmem:[#allocation135_spill] sm:$0xff] }
 0x3ab   : > { %v921_v23 = vadd.f32 %v6354_v10, %v905_v52  ;;  %v724_v4 = vsel %vm358_vm5, %v6359_v59, %v6358_v41  ;;  %v938_v43 = vadd.f32 %v6361_v27, %v922_v2  ;;  %v806_v24 = vadd.f32 %v6362_v30, %v783_v22  ;;  %v6365_v59 = vld [vmem:[#allocation57_spill] sm:$0xff] }
 0x3ac   : > { %v936_v1 = vadd.f32 %v6360_v26, %v920_v56  ;;  %v939_v17 = vadd.f32 %v6361_v27, %v923_v37  ;;  %v732_v47 = vadd.f32 %v723_v7, %v691_v6  ;;  %v735_v48 = vadd.f32 %v6358_v41, %v694_v14  ;;  %v6368_v41 = vld [vmem:[#allocation72_spill] sm:$0xff] }
 0x3ad   : > { %v937_v13 = vadd.f32 %v6360_v26, %v921_v23  ;;  %v805_v10 = vadd.f32 %v6362_v30, %v782_v40  ;;  %v954_v58 = vadd.f32 %v6363_v42, %v938_v43  ;;  %v734_v2 = vadd.f32 %v724_v4, %v693_v55  ;;  %v6367_v26 = vld [vmem:[#allocation58_spill] sm:$0xff]  ;;  %v6369_v40 = vld [vmem:[#allocation59_spill] sm:$0xff] }
 0x3ae   : > { %v829_v22 = vadd.f32 %v6365_v59, %v806_v24  ;;  %v955_v23 = vadd.f32 %v6363_v42, %v939_v17  ;;  %v755_v27 = vadd.f32 %v6367_v26, %v732_v47  ;;  %v756_v6 = vadd.f32 %v6367_v26, %v733_v35  ;;  %v6370_v17 = vld [vmem:[#allocation61_spill] sm:$0xff]  ;;  %v6371_v42 = vld [vmem:[#allocation62_spill] sm:$0xff] }
 0x3af   : > { %v952_v14 = vadd.f32 %v6368_v41, %v936_v1  ;;  %v2714_v30 = vmul.f32 %v4884_v5, %v5400_v11  ;;  %v757_v7 = vadd.f32 %v6369_v40, %v734_v2  ;;  %v758_v55 = vadd.f32 %v6369_v40, %v735_v48  ;;  %v5431_v48 = vpop.permute.xlu2 %2627  ;;  %v6372_v40 = vld [vmem:[#allocation64_spill] sm:$0xff] }
 0x3b0   : > { %v2742_v52 = vpop.permute.xlu0 %2741  ;;  %v5405_v56 = vpop.permute.xlu1 %2743  ;;  %v5421_v4 = vstv %s5375_s12  ;;  %v953_v43 = vadd.f32 %v6368_v41, %v937_v13  ;;  %v828_v24 = vadd.f32 %v6365_v59, %v805_v10  ;;  %v1537_v47 = vrot.slane %v954_v58, 1  ;;  %v6373_v41 = vld [vmem:[#allocation89_spill] sm:$0xff]  ;;  %v6374_v10 = vld [vmem:[#allocation88_spill] sm:$0xff] }
 0x3b1   : > { %6364 = vst [vmem:[#allocation17_spill] sm:$0xff] %v5405_v56  ;;  %v5411_v37 = vsel %vm316_vm4, %v2742_v52, %v5405_v56  ;;  %v778_v52 = vadd.f32 %v6370_v17, %v755_v27  ;;  %v961_v35 = vmul.f32 %v5067_v20, %v5421_v4  ;;  %v779_v1 = vadd.f32 %v6370_v17, %v756_v6  ;;  %v6375_v27 = vld [vmem:[#allocation65_spill] sm:$0xff] }
 0x3b2   : > { %6366 = vst [vmem:[#allocation26_spill] sm:$0xff] %v5411_v37  ;;  %v780_v5 = vadd.f32 %v6371_v42, %v757_v7  ;;  %v781_v2 = vadd.f32 %v6371_v42, %v758_v55  ;;  %v1539_v26 = vrot.slane %v955_v23, 1  ;;  %v1535_v13 = vrot.slane %v952_v14, 1  ;;  %v5440_v7 = vld [vmem:[#allocation2 + $0x20] sm:$0xff]  ;;  %v6376_v42 = vld [vmem:[#allocation95_spill] sm:$0xff] }
 0x3b3   : > { %v801_v25 = vadd.f32 %v6372_v40, %v778_v52  ;;  %v991_v59 = vsel %vm316_vm4, %v6374_v10, %v6373_v41  ;;  %v2755_v58 = vadd.f32 %v5333_v8, %v2714_v30  ;;  %v1536_v17 = vrot.slane %v953_v43, 1  ;;  %v6377_v10 = vld [vmem:[#allocation94_spill] sm:$0xff] }
 0x3b4   : > { %v803_v56 = vadd.f32 %v6375_v27, %v780_v5  ;;  %v804_v6 = vadd.f32 %v6375_v27, %v781_v2  ;;  %v958_v23 = vmul.f32 %v5440_v7, %v5421_v4  ;;  %v1538_v14 = vsel %vm1508_vm6, %v1535_v13, %v1537_v47  ;;  %v6380_v5 = vld [vmem:[#allocation68_spill] sm:$0xff] }
 0x3b5   : > { %v1002_v52 = vadd.f32 %v6373_v41, %v961_v35  ;;  %v1032_v8 = vsel %vm358_vm5, %v6377_v10, %v6376_v42  ;;  %v959_v27 = vmul.f32 %v5114_v44, %v5421_v4  ;;  %v1540_v37 = vsel %vm1508_vm6, %v1536_v17, %v1539_v26  ;;  %v6381_v41 = vld [vmem:[#allocation67_spill] sm:$0xff] }
 0x3b6   : > { %v826_v2 = vadd.f32 %v6380_v5, %v803_v56  ;;  %v1001_v15 = vadd.f32 %v991_v59, %v958_v23  ;;  %v802_v35 = vadd.f32 %v6372_v40, %v779_v1  ;;  %v824_v39 = vadd.f32 %v6381_v41, %v801_v25 }
 0x3b7   : > { %v827_v10 = vadd.f32 %v6380_v5, %v804_v6  ;;  %v1043_v36 = vadd.f32 %v6376_v42, %v1002_v52  ;;  %v1552_v21 = vadd.f32 %v1539_v26, %v829_v22  ;;  %v6382_v56 = vrot.slane %v5271_v51, 1  ;;  %v6387_v26 = vld [vmem:[#allocation87_spill] sm:$0xff] }
 0x3b8   : > { %v5444_v55 = vpop.permute.xlu0 %2776  ;;  %v5456_v43 = vpop.permute.xlu1 %2778  ;;  %v1042_v63 = vadd.f32 %v1032_v8, %v1001_v15  ;;  %v6384_v59 = vrot.slane %v5309_v29, 1  ;;  %v825_v25 = vadd.f32 %v6381_v41, %v802_v35  ;;  %v1525_v6 = vadd.f32 %v5351_v50, %v5197_v32  ;;  %v6385_v15 = vld [vmem:[#allocation75_spill] sm:$0xff]  ;;  %v6386_v29 = vld [vmem:[#allocation86_spill] sm:$0xff] }
 0x3b9   : > { %v5454_v30 = vadd.f32 %v5444_v55, %v2755_v58  ;;  %6379 = vst [vmem:[#allocation19_spill] sm:$0xff] %v5456_v43  ;;  %v1549_v58 = vadd.f32 %v1538_v14, %v826_v2  ;;  %v1529_v62 = vadd.f32 %v6382_v56, %v5180_v45  ;;  %v6383_v43 = vrot.slane %v5257_v16, 1  ;;  %v6391_v2 = vld [vmem:[#allocation90_spill] sm:$0xff] }
 0x3ba   : > { %v1550_v40 = vadd.f32 %v1540_v37, %v827_v10  ;;  %v1526_v22 = vadd.f32 %v5361_v3, %v5206_v34  ;;  %v1547_v51 = vadd.f32 %v1535_v13, %v824_v39  ;;  %v1527_v45 = vadd.f32 %v5366_v33, %v5215_v31  ;;  %v5487_v34 = vpop.permute.xlu2 %2650  ;;  %v5492_v31 = vld [vmem:[#allocation2 + $0x30] sm:$0x7] }
 0x3bb   : > { %6378 = vst [vmem:[#allocation18_spill] sm:$0xff] %v5454_v30  ;;  %v1551_v30 = vadd.f32 %v1537_v47, %v828_v24  ;;  %v1518_v1 = vsel %vm1508_vm6, %v6384_v59, %v6383_v43  ;;  %v1000_v24 = vadd.f32 %v6385_v15, %v959_v27  ;;  %v1548_v16 = vadd.f32 %v1536_v17, %v825_v25  ;;  %v6395_v25 = vld [vmem:[#allocation112_spill] sm:$0xff] }
 0x3bc   : > { %v990_v47 = vsel %vm316_vm4, %v6386_v29, %v6385_v15  ;;  %v1066_v37 = vadd.f32 %v6387_v26, %v1043_v36  ;;  %v1589_v14 = vrot.slane %v1549_v58, 2  ;;  %v1596_v32 = vrot.slane %v1552_v21, 2  ;;  %v6390_v36 = vld [vmem:[#allocation81_spill] sm:$0xff]  ;;  %v6396_v15 = vld [vmem:[#allocation91_spill] sm:$0xff] }
 0x3bd   : > { %v1594_v52 = vrot.slane %v1551_v30, 2  ;;  %v1065_v50 = vadd.f32 %v6387_v26, %v1042_v63  ;;  %v1528_v39 = vadd.f32 %v1518_v1, %v5224_v12  ;;  %v1592_v13 = vrot.slane %v1550_v40, 2  ;;  %v5500_v30 = vld [vmem:[#allocation2 + $0x38] sm:$0x7] }
 0x3be   : > { %v962_v33 = vmul.f32 %v5492_v31, %v5421_v4  ;;  %v1139_v17 = vstv %s5451_s27  ;;  %v1041_v8 = vadd.f32 %v6390_v36, %v1000_v24  ;;  %v1588_v21 = vrot.slane %v1547_v51, 2  ;;  %v6397_v24 = vld [vmem:[#allocation78_spill] sm:$0xff]  ;;  %v6398_v51 = vld [vmem:[#allocation92_spill] sm:$0xff] }
 0x3bf   : > { %v963_v63 = vmul.f32 %v5500_v30, %v5421_v4  ;;  %v1143_v43 = vmul.f32 %v5067_v20, %v1139_v17  ;;  %v1591_v12 = vrot.slane %v1548_v16, 2  ;;  %v999_v5 = vadd.f32 %v990_v47, %v958_v23  ;;  %v6394_v23 = vld [vmem:[#allocation113_spill] sm:$0xff] }
 0x3c0   : > { %v5489_v3 = vpop.permute.xlu0 %2782  ;;  %v5497_v42 = vpop.permute.xlu1 %2784  ;;  %v1089_v27 = vadd.f32 %v6391_v2, %v1066_v37  ;;  %v1141_v35 = vmul.f32 %v5114_v44, %v1139_v17  ;;  %v1595_v41 = vsel %vm1587_vm7, %v1589_v14, %v1594_v52  ;;  %v5510_v10 = vadd.f32 %v1594_v52, %v1529_v62  ;;  %v6400_v37 = vld [vmem:[#allocation93_spill] sm:$0xff]  ;;  %v6401_v52 = vld [vmem:[#allocation119_spill] sm:$0xff] }
 0x3c1   : > { %6388 = vst [vmem:[#allocation20_spill] sm:$0xff] %v5489_v3  ;;  %v5513_v58 = vadd.f32 %v1596_v32, %v5348_v61  ;;  %v1088_v56 = vadd.f32 %v6391_v2, %v1065_v50  ;;  %v1590_v4 = vsel %vm1587_vm7, %v1588_v21, %v1589_v14  ;;  %v1593_v59 = vsel %vm1587_vm7, %v1591_v12, %v1592_v13  ;;  %v6403_v21 = vld [vmem:[#allocation97_spill] sm:$0xff]  ;;  %v6404_v12 = vld [vmem:[#allocation84_spill] sm:$0xff] }
 0x3c2   : > { %6389 = vst [vmem:[#allocation25_spill] sm:$0xff] %v5497_v42  ;;  %v1597_v1 = vsel %vm1587_vm7, %v1592_v13, %v1596_v32  ;;  %v1173_v40 = vsel %vm316_vm4, %v6395_v25, %v6394_v23  ;;  %v992_v62 = vsel %vm316_vm4, %v6397_v24, %v6396_v15  ;;  %v1031_v61 = vsel %vm358_vm5, %v6398_v51, %v6390_v36  ;;  %v6402_v32 = vld [vmem:[#allocation118_spill] sm:$0xff]  ;;  %v6433_v3 = vld [vmem:[#allocation140_spill] sm:$0xff] }
 0x3c3   : > { %6392 = vst [vmem:[#allocation24_spill] sm:$0xff] %v5510_v10  ;;  %v1140_v16 = vmul.f32 %v5440_v7, %v1139_v17  ;;  %v1184_v29 = vadd.f32 %v6394_v23, %v1143_v43  ;;  %v5530_v47 = vadd.f32 %v1595_v41, %v1527_v45  ;;  %v1004_v26 = vadd.f32 %v6396_v15, %v963_v63 }
 0x3c4   : > { %6393 = vst [vmem:[#allocation22_spill] sm:$0xff] %v5513_v58  ;;  %v1112_v14 = vadd.f32 %v6400_v37, %v1089_v27  ;;  %v1214_v50 = vsel %vm358_vm5, %v6402_v32, %v6401_v52  ;;  %v1111_v13 = vadd.f32 %v6400_v37, %v1088_v56  ;;  %v1033_v36 = vsel %vm358_vm5, %v6404_v12, %v6403_v21  ;;  %v6415_v32 = vld [vmem:[#allocation100_spill] sm:$0xff]  ;;  %v6425_v58 = vld [vmem:[#allocation114_spill] sm:$0xff] }
 0x3c5   : > { %6399 = vst [vmem:[#allocation27_spill] sm:$0xff] %v5530_v47  ;;  %v1183_v2 = vadd.f32 %v1173_v40, %v1140_v16  ;;  %v1225_v43 = vadd.f32 %v6401_v52, %v1184_v29  ;;  %v5544_v41 = vadd.f32 %v1597_v1, %v1528_v39  ;;  %v1003_v63 = vadd.f32 %v992_v62, %v962_v33  ;;  %v5556_v40 = vpop.permute.xlu2 %2809  ;;  %v6409_v29 = vld [vmem:[#allocation96_spill] sm:$0xff]  ;;  %v6410_v1 = vld [vmem:[#allocation98_spill] sm:$0xff]  ;;  %v6413_v52 = vld [vmem:[#allocation137_spill] sm:$0xff] }
 0x3c6   : > { %v1040_v23 = vadd.f32 %v1031_v61, %v999_v5  ;;  %v5546_v27 = vadd.f32 %v1590_v4, %v1525_v6  ;;  %v1045_v15 = vadd.f32 %v6403_v21, %v1004_v26  ;;  %v5552_v24 = vstv %s5505_s24  ;;  %6408 = vst [vmem:[#allocation29_spill] sm:$0xff] %v5556_v40  ;;  %v6411_v4 = vld [vmem:[#allocation99_spill] sm:$0xff]  ;;  %v6416_v21 = vld [vmem:[#allocation101_spill] sm:$0xff]  ;;  %v6427_v47 = vld [vmem:[#allocation108_spill] sm:$0xff] }
 0x3c7   : > { %6405 = vst [vmem:[#allocation16_spill] sm:$0xff] %v5544_v41  ;;  %v1224_v56 = vadd.f32 %v1214_v50, %v1183_v2  ;;  %v5554_v51 = vadd.f32 %v1593_v59, %v1526_v22  ;;  %v5559_v37 = vadd.f32 %v6409_v29, %v1112_v14  ;;  %v1044_v39 = vadd.f32 %v1033_v36, %v1003_v63  ;;  %v6412_v61 = vld [vmem:[#allocation111_spill] sm:$0xff]  ;;  %v6414_v22 = vld [vmem:[#allocation136_spill] sm:$0xff]  ;;  %v6419_v63 = vld [vmem:[#allocation142_spill] sm:$0xff] }
 0x3c8   : > { %v5542_v45 = vpop.permute.xlu0 %2629  ;;  %6406 = vst [vmem:[#allocation28_spill] sm:$0xff] %v5546_v27  ;;  %v5548_v25 = vpop.permute.xlu1 %2631  ;;  %v1063_v33 = vadd.f32 %v6410_v1, %v1040_v23  ;;  %v1064_v6 = vadd.f32 %v6410_v1, %v1041_v8  ;;  %v5564_v5 = vadd.f32 %v6409_v29, %v1111_v13  ;;  %v1182_v62 = vadd.f32 %v6411_v4, %v1141_v35  ;;  %v6417_v13 = vld [vmem:[#allocation110_spill] sm:$0xff] }
 0x3c9   : > { %6407 = vst [vmem:[#allocation30_spill] sm:$0xff] %v5554_v51  ;;  %v1248_v26 = vadd.f32 %v6412_v61, %v1225_v43  ;;  %v1355_v59 = vsel %vm316_vm4, %v6414_v22, %v6413_v52  ;;  %v1067_v50 = vadd.f32 %v6415_v32, %v1044_v39  ;;  %v1068_v14 = vadd.f32 %v6415_v32, %v1045_v15  ;;  %v6418_v43 = vld [vmem:[#allocation143_spill] sm:$0xff]  ;;  %v6429_v27 = vld [vmem:[#allocation134_spill] sm:$0xff] }
 0x3ca   : > { %v1086_v12 = vadd.f32 %v6416_v21, %v1063_v33  ;;  %v1322_v8 = vmul.f32 %v5440_v7, %v5552_v24  ;;  %v1172_v36 = vsel %vm316_vm4, %v6417_v13, %v6411_v4  ;;  %v1247_v35 = vadd.f32 %v6412_v61, %v1224_v56  ;;  %v6420_v33 = vld [vmem:[#allocation103_spill] sm:$0xff]  ;;  %v6422_v4 = vld [vmem:[#allocation102_spill] sm:$0xff]  ;;  %v6423_v61 = vld [vmem:[#allocation105_spill] sm:$0xff] }
 0x3cb   : > { %v1325_v2 = vmul.f32 %v5067_v20, %v5552_v24  ;;  %v1396_v23 = vsel %vm358_vm5, %v6419_v63, %v6418_v43  ;;  %v1087_v15 = vadd.f32 %v6416_v21, %v1064_v6  ;;  %v1144_v29 = vmul.f32 %v5492_v31, %v1139_v17  ;;  %v6421_v32 = vld [vmem:[#allocation115_spill] sm:$0xff]  ;;  %v6424_v13 = vld [vmem:[#allocation116_spill] sm:$0xff] }
 0x3cc   : > { %v1145_v39 = vmul.f32 %v5500_v30, %v1139_v17  ;;  %v1365_v1 = vadd.f32 %v1355_v59, %v1322_v8  ;;  %v1090_v22 = vadd.f32 %v6420_v33, %v1067_v50  ;;  %v1174_v56 = vsel %vm316_vm4, %v6422_v4, %v6421_v32  ;;  %v6426_v4 = vld [vmem:[#allocation121_spill] sm:$0xff] }
 0x3cd   : > { %v1213_v20 = vsel %vm358_vm5, %v6424_v13, %v6423_v61  ;;  %v1271_v10 = vadd.f32 %v6425_v58, %v1248_v26  ;;  %v1091_v6 = vadd.f32 %v6420_v33, %v1068_v14  ;;  %v1181_v21 = vadd.f32 %v1172_v36, %v1140_v16  ;;  %v6428_v13 = vld [vmem:[#allocation123_spill] sm:$0xff]  ;;  %v6430_v14 = vld [vmem:[#allocation104_spill] sm:$0xff]  ;;  %v6432_v33 = vld [vmem:[#allocation129_spill] sm:$0xff] }
 0x3ce   : > { %v1323_v17 = vmul.f32 %v5114_v44, %v5552_v24  ;;  %v1406_v59 = vadd.f32 %v1396_v23, %v1365_v1  ;;  %v1270_v41 = vadd.f32 %v6425_v58, %v1247_v35  ;;  %v1215_v51 = vsel %vm358_vm5, %v6427_v47, %v6426_v4  ;;  %v6431_v58 = vld [vmem:[#allocation117_spill] sm:$0xff] }
 0x3cf   : > { %v1354_v26 = vsel %vm316_vm4, %v6429_v27, %v6428_v13  ;;  %v1366_v40 = vadd.f32 %v6413_v52, %v1325_v2  ;;  %v5612_v16 = vadd.f32 %v6430_v14, %v1086_v12  ;;  %v1223_v44 = vadd.f32 %v6423_v61, %v1182_v62  ;;  %v5621_v27 = vpop.permute.xlu2 %2673  ;;  %v6434_v2 = vld [vmem:[#allocation122_spill] sm:$0xff] }
 0x3d0   : > { %v5596_v63 = vpop.permute.xlu0 %2652  ;;  %v5601_v50 = vpop.permute.xlu1 %2654  ;;  %v1185_v36 = vadd.f32 %v1174_v56, %v1144_v29  ;;  %v1222_v23 = vadd.f32 %v1213_v20, %v1181_v21  ;;  %v1186_v1 = vadd.f32 %v6421_v32, %v1145_v39  ;;  %v1294_v35 = vadd.f32 %v6431_v58, %v1271_v10  ;;  %v6436_v56 = vld [vmem:[#allocation124_spill] sm:$0xff] }
 0x3d1   : > { %v1395_v47 = vsel %vm358_vm5, %v6433_v3, %v6432_v33  ;;  %v1407_v42 = vadd.f32 %v6418_v43, %v1366_v40  ;;  %v1363_v49 = vadd.f32 %v1354_v26, %v1322_v8  ;;  %v1429_v62 = vadd.f32 %v6435_v57, %v1406_v59  ;;  %v6437_v43 = vld [vmem:[#allocation125_spill] sm:$0xff]  ;;  %v6438_v20 = vld [vmem:[#allocation120_spill] sm:$0xff]  ;;  %v6439_v26 = vld [vmem:[#allocation127_spill] sm:$0xff] }
 0x3d2   : > { %v1226_v52 = vadd.f32 %v1215_v51, %v1185_v36  ;;  %v1245_v12 = vadd.f32 %v6434_v2, %v1222_v23  ;;  %v1293_v29 = vadd.f32 %v6431_v58, %v1270_v41  ;;  %v1227_v39 = vadd.f32 %v6426_v4, %v1186_v1  ;;  %v6442_v36 = vld [vmem:[#allocation146_spill] sm:$0xff] }
 0x3d3   : > { %v1246_v10 = vadd.f32 %v6434_v2, %v1223_v44  ;;  %v1364_v32 = vadd.f32 %v6428_v13, %v1323_v17  ;;  %v1110_v3 = vadd.f32 %v6430_v14, %v1087_v15  ;;  %v1404_v51 = vadd.f32 %v1395_v47, %v1363_v49  ;;  %v6440_v13 = vld [vmem:[#allocation128_spill] sm:$0xff]  ;;  %v6441_v14 = vld [vmem:[#allocation138_spill] sm:$0xff] }
 0x3d4   : > { %v1249_v40 = vadd.f32 %v6436_v56, %v1226_v52  ;;  %v1268_v61 = vadd.f32 %v6437_v43, %v1245_v12  ;;  %v5633_v21 = vadd.f32 %v6438_v20, %v1294_v35  ;;  %v1250_v8 = vadd.f32 %v6436_v56, %v1227_v39  ;;  %v6444_v52 = vld [vmem:[#allocation131_spill] sm:$0xff] }
 0x3d5   : > { %v1269_v41 = vadd.f32 %v6437_v43, %v1246_v10  ;;  %v1430_v59 = vadd.f32 %v6435_v57, %v1407_v42  ;;  %v1452_v44 = vadd.f32 %v6441_v14, %v1429_v62  ;;  %v1427_v23 = vadd.f32 %v6442_v36, %v1404_v51  ;;  %v6443_v42 = vld [vmem:[#allocation130_spill] sm:$0xff]  ;;  %v6445_v62 = vld [vmem:[#allocation148_spill] sm:$0xff]  ;;  %v6446_v43 = vld [vmem:[#allocation133_spill] sm:$0xff] }
 0x3d6   : > { %v1272_v17 = vadd.f32 %v6439_v26, %v1249_v40  ;;  %v1291_v15 = vadd.f32 %v6440_v13, %v1268_v61  ;;  %v1316_v1 = vadd.f32 %v6438_v20, %v1293_v29  ;;  %v1273_v58 = vadd.f32 %v6439_v26, %v1250_v8  ;;  %v6449_v20 = vld [vmem:[#allocation141_spill] sm:$0xff]  ;;  %v6451_v26 = vld [vmem:[#allocation106_spill] sm:$0xff] }
 0x3d7   : > { %v1292_v35 = vadd.f32 %v6440_v13, %v1269_v41  ;;  %v1405_v57 = vadd.f32 %v6432_v33, %v1364_v32  ;;  %v1326_v12 = vmul.f32 %v5492_v31, %v5552_v24  ;;  %v1450_v39 = vadd.f32 %v6445_v62, %v1427_v23  ;;  %v6447_v33 = vld [vmem:[#allocation139_spill] sm:$0xff]  ;;  %v6448_v32 = vld [vmem:[#allocation126_spill] sm:$0xff] }
 0x3d8   : > { %v5638_v4 = vpop.permute.xlu0 %2811  ;;  %v5644_v49 = vpop.permute.xlu1 %2813  ;;  %v1295_v47 = vadd.f32 %v6443_v42, %v1272_v17  ;;  %v1314_v2 = vadd.f32 %v6444_v52, %v1291_v15  ;;  %v1296_v10 = vadd.f32 %v6443_v42, %v1273_v58  ;;  %v1453_v29 = vadd.f32 %v6441_v14, %v1430_v59  ;;  %v6450_v41 = vld [vmem:[#allocation150_spill] sm:$0xff]  ;;  %v6452_v58 = vld [vmem:[#allocation145_spill] sm:$0xff] }
 0x3d9   : > { %v1315_v56 = vadd.f32 %v6444_v52, %v1292_v35  ;;  %v1428_v40 = vadd.f32 %v6442_v36, %v1405_v57  ;;  %v1356_v51 = vsel %vm316_vm4, %v6448_v32, %v6447_v33  ;;  %v1475_v8 = vadd.f32 %v6449_v20, %v1452_v44  ;;  %v5670_v14 = vpop.permute.xlu2 %2832  ;;  %v6453_v35 = vld [vmem:[#allocation132_spill] sm:$0xff] }
 0x3da   : > { %v1318_v61 = vadd.f32 %v6446_v43, %v1295_v47  ;;  %v1473_v31 = vadd.f32 %v6450_v41, %v1450_v39  ;;  %v1113_v17 = vadd.f32 %v6451_v26, %v1090_v22  ;;  %v1319_v13 = vadd.f32 %v6446_v43, %v1296_v10  ;;  %v6454_v57 = vld [vmem:[#allocation152_spill] sm:$0xff] }
 0x3db   : > { %v1327_v15 = vmul.f32 %v5500_v30, %v5552_v24  ;;  %v1451_v59 = vadd.f32 %v6445_v62, %v1428_v40  ;;  %v1114_v36 = vadd.f32 %v6451_v26, %v1091_v6  ;;  %v1559_v23 = vrot.slane %v1314_v2, 1  ;;  %v6455_v6 = vld [vmem:[#allocation144_spill] sm:$0xff]  ;;  %v6458_v26 = vld [vmem:[#allocation109_spill] sm:$0xff] }
 0x3dc   : > { %v1397_v44 = vsel %vm358_vm5, %v6453_v35, %v6452_v58  ;;  %v1496_v42 = vadd.f32 %v6454_v57, %v1473_v31  ;;  %v1562_v47 = vrot.slane %v1315_v56, 1  ;;  %v1367_v22 = vadd.f32 %v1356_v51, %v1326_v12  ;;  %v6457_v31 = vld [vmem:[#allocation147_spill] sm:$0xff]  ;;  %v6459_v35 = vld [vmem:[#allocation149_spill] sm:$0xff] }
 0x3dd   : > { %v1476_v52 = vadd.f32 %v6449_v20, %v1453_v29  ;;  %v1474_v39 = vadd.f32 %v6450_v41, %v1451_v59  ;;  %v1560_v24 = vrot.slane %v1316_v1, 1  ;;  %v1563_v62 = vrot.slane %v5633_v21, 1  ;;  %v6456_v29 = vld [vmem:[#allocation107_spill] sm:$0xff] }
 0x3de   : > { %v1565_v10 = vrot.slane %v1318_v61, 1  ;;  %v5683_v2 = vadd.f32 %v6455_v6, %v1475_v8  ;;  %v1567_v43 = vrot.slane %v1319_v13, 1  ;;  %v1368_v32 = vadd.f32 %v6447_v33, %v1327_v15 }
 0x3df   : > { %v1408_v56 = vadd.f32 %v1397_v44, %v1367_v22  ;;  %v1497_v12 = vadd.f32 %v6454_v57, %v1474_v39  ;;  %v1132_v51 = vadd.f32 %v6456_v29, %v5612_v16  ;;  %v1133_v20 = vadd.f32 %v6456_v29, %v1110_v3  ;;  %v6460_v39 = vld [vmem:[#allocation151_spill] sm:$0xff] }
 0x3e0   : > { %v5679_v30 = vpop.permute.xlu0 %2675  ;;  %v5685_v40 = vpop.permute.xlu1 %2677  ;;  %v1561_v1 = vsel %vm1508_vm6, %v1559_v23, %v1560_v24  ;;  %v1616_v21 = vrot.slane %v1496_v42, 2  ;;  %v1564_v61 = vsel %vm1508_vm6, %v1562_v47, %v1563_v62  ;;  %v5695_v8 = vadd.f32 %v6455_v6, %v1476_v52 }
 0x3e1   : > { %v1409_v41 = vadd.f32 %v6452_v58, %v1368_v32  ;;  %v1431_v33 = vadd.f32 %v6457_v31, %v1408_v56  ;;  %v1136_v13 = vadd.f32 %v6458_v26, %v1113_v17  ;;  %v1137_v15 = vadd.f32 %v6458_v26, %v1114_v36 }
 0x3e2   : > { %v1566_v16 = vsel %vm1508_vm6, %v1560_v24, %v1565_v10  ;;  %v1617_v3 = vrot.slane %v5683_v2, 2  ;;  %v1568_v59 = vsel %vm1508_vm6, %v1563_v62, %v1567_v43  ;;  %v1619_v57 = vrot.slane %v1497_v12, 2  ;;  %v2697_v62 = vpop.permute.xlu2 %2696  ;;  %v6476_v2 = vld [vmem:[#allocation18_spill] sm:$0xff] }
 0x3e3   : > { %v1432_v23 = vadd.f32 %v6457_v31, %v1409_v41  ;;  %v1454_v44 = vadd.f32 %v6459_v35, %v1431_v33  ;;  %v1575_v42 = vadd.f32 %v1561_v1, %v1132_v51  ;;  %v5706_v47 = vadd.f32 %v1564_v61, %v1133_v20  ;;  %v6461_v20 = vld [vmem:[#allocation153_spill] sm:$0xff]  ;;  %v3552_v61 = vld [vmem:[#allocation3 + $0x28] sm:$0xff] }
 0x3e4   : > { %v5708_v58 = vadd.f32 %v1565_v10, %v1136_v13  ;;  %v1618_v17 = vsel %vm1587_vm7, %v1616_v21, %v1617_v3  ;;  %v5713_v36 = vadd.f32 %v1567_v43, %v1137_v15  ;;  %v1620_v22 = vrot.slane %v5695_v8, 2 }
 0x3e5   : > { %v1455_v52 = vadd.f32 %v6459_v35, %v1432_v23  ;;  %v1477_v24 = vadd.f32 %v6460_v39, %v1454_v44  ;;  %v5721_v32 = vadd.f32 %v1566_v16, %v5564_v5  ;;  %v5724_v10 = vadd.f32 %v1568_v59, %v5559_v37 }
 0x3e6   : > { %v2636_v56 = vadd.f32 %v5431_v48, %v5246_v60  ;;  %v2637_v43 = vadd.f32 %v5431_v48, %v5242_v19  ;;  %v5736_v51 = vsel %vm1587_vm7, %v1619_v57, %v1620_v22  ;;  %v5738_v5 = vadd.f32 %v1618_v17, %v1575_v42 }
 0x3e7   : > { %v1478_v29 = vadd.f32 %v6460_v39, %v1455_v52  ;;  %v5741_v37 = vadd.f32 %v6461_v20, %v1477_v24  ;;  %v2638_v19 = vadd.f32 %v5542_v45, %v5254_v9  ;;  %v2639_v48 = vadd.f32 %v5542_v45, %v5092_v53  ;;  %v3553_v52 = vld [vmem:[#allocation3 + $0x38] sm:$0x7] }
 0x3e8   : > { %v5718_v6 = vpop.permute.xlu0 %2834  ;;  %v5730_v12 = vpop.permute.xlu1 %2836  ;;  %v2659_v1 = vadd.f32 %v5487_v34, %v2636_v56  ;;  %v2660_v60 = vadd.f32 %v5487_v34, %v2637_v43  ;;  %v2716_v41 = vmul.f32 %v3552_v61, %v5400_v11  ;;  %v2640_v31 = vadd.f32 %v5548_v25, %v5312_v28 }
 0x3e9   : > { %v5750_v21 = vadd.f32 %v6461_v20, %v1478_v29  ;;  %v2641_v33 = vadd.f32 %v5548_v25, %v5305_v54  ;;  %v2661_v9 = vadd.f32 %v5596_v63, %v2638_v19  ;;  %v2662_v53 = vadd.f32 %v5596_v63, %v2639_v48  ;;  %v6466_v48 = vld [vmem:[#allocation20_spill] sm:$0xff] }
 0x3ea   : > { %v2682_v34 = vadd.f32 %v5621_v27, %v2659_v1  ;;  %v2683_v26 = vadd.f32 %v5621_v27, %v2660_v60  ;;  %v1622_v45 = vrot.slane %v5741_v37, 2  ;;  %v2713_v13 = vmul.f32 %v5440_v7, %v5400_v11  ;;  %v2856_v39 = vpop.permute.xlu2 %2855  ;;  %v6464_v60 = vld [vmem:[#allocation19_spill] sm:$0xff] }
 0x3eb   : > { %v2663_v15 = vadd.f32 %v5601_v50, %v2640_v31  ;;  %v2664_v28 = vadd.f32 %v5601_v50, %v2641_v33  ;;  %v2684_v54 = vadd.f32 %v5679_v30, %v2661_v9  ;;  %v2685_v25 = vadd.f32 %v5679_v30, %v2662_v53  ;;  %v6467_v31 = vld [vmem:[#allocation161_spill] sm:$0xff] }
 0x3ec   : > { %v2705_v16 = vadd.f32 %v2697_v62, %v2682_v34  ;;  %v2706_v59 = vadd.f32 %v2697_v62, %v2683_v26  ;;  %v1624_v27 = vrot.slane %v5750_v21, 2  ;;  %v2757_v23 = vadd.f32 %v5236_v46, %v2716_v41  ;;  %v6468_v34 = vld [vmem:[#allocation160_spill] sm:$0xff] }
 0x3ed   : > { %v2686_v63 = vadd.f32 %v5685_v40, %v2663_v15  ;;  %v2687_v35 = vadd.f32 %v5685_v40, %v2664_v28  ;;  %v2717_v7 = vmul.f32 %v5266_v0, %v5400_v11  ;;  %v2786_v50 = vsel %vm358_vm5, %v5302_v18, %v5444_v55  ;;  %v6462_v0 = vld [vmem:[#allocation15_spill] sm:$0xff]  ;;  %v6463_v55 = vld [vmem:[#allocation14_spill] sm:$0xff] }
 0x3ee   : > { %v2754_v30 = vadd.f32 %v5343_v38, %v2713_v13  ;;  %v2718_v46 = vmul.f32 %v3553_v52, %v5400_v11  ;;  %v2949_v40 = vrot.slane %v2705_v16, 1  ;;  %v2952_v56 = vrot.slane %v2706_v59, 1  ;;  %v6465_v38 = vld [vmem:[#allocation25_spill] sm:$0xff]  ;;  %v6470_v28 = vld [vmem:[#allocation163_spill] sm:$0xff]  ;;  %v6471_v59 = vld [vmem:[#allocation164_spill] sm:$0xff] }
 0x3ef   : > { %v2756_v20 = vadd.f32 %v6462_v0, %v2713_v13  ;;  %v2787_v19 = vsel %vm358_vm5, %v6464_v60, %v6463_v55  ;;  %v2788_v11 = vsel %vm358_vm5, %v6466_v48, %v6465_v38  ;;  %v6469_v13 = vld [vmem:[#allocation162_spill] sm:$0xff]  ;;  %v2798_v52 = vadd.f32 %v6463_v55, %v2757_v23 }
 0x3f0   : > { %v2699_v44 = vpop.permute.xlu0 %2698  ;;  %v2701_v17 = vpop.permute.xlu1 %2700  ;;  %v2795_v37 = vadd.f32 %v2786_v50, %v2754_v30  ;;  %v6473_v50 = vld [vmem:[#allocation26_spill] sm:$0xff]  ;;  %v1633_v8 = vadd.f32 %v5736_v51, %v5706_v47 }
 0x3f1   : > { %v2707_v57 = vadd.f32 %v2699_v44, %v2684_v54  ;;  %v2708_v42 = vadd.f32 %v2699_v44, %v2685_v25  ;;  %v2709_v24 = vadd.f32 %v2701_v17, %v2686_v63  ;;  %v2710_v62 = vadd.f32 %v2701_v17, %v2687_v35  ;;  %v6472_v25 = vld [vmem:[#allocation165_spill] sm:$0xff] }
 0x3f2   : > { %v1623_v35 = vsel %vm1587_vm7, %v1617_v3, %v1622_v45  ;;  %v1625_v44 = vsel %vm1587_vm7, %v1620_v22, %v1624_v27  ;;  %v1636_v22 = vadd.f32 %v1622_v45, %v5708_v58  ;;  %v2821_v0 = vadd.f32 %v5638_v4, %v2798_v52  ;;  %v2879_v58 = vpop.permute.xlu2 %2878 }
 0x3f3   : > { %v2950_v43 = vrot.slane %v2707_v57, 1  ;;  %v2953_v29 = vrot.slane %v2708_v42, 1  ;;  %v2955_v1 = vrot.slane %v2709_v24, 1  ;;  %v2957_v18 = vrot.slane %v2710_v62, 1  ;;  %v6474_v42 = vld [vmem:[#allocation17_spill] sm:$0xff] }
 0x3f4   : > { %v2758_v57 = vadd.f32 %v6473_v50, %v2717_v7  ;;  %v2759_v17 = vadd.f32 %v6474_v42, %v2718_v46  ;;  %v2797_v24 = vadd.f32 %v2787_v19, %v2756_v20  ;;  %v6475_v62 = vld [vmem:[#allocation29_spill] sm:$0xff]  ;;  %v1634_v20 = vadd.f32 %v1623_v35, %v5721_v32 }
 0x3f5   : > { %v2951_v61 = vsel %vm1508_vm6, %v2949_v40, %v2950_v43  ;;  %v2954_v41 = vsel %vm1508_vm6, %v2952_v56, %v2953_v29  ;;  %v2956_v9 = vsel %vm1508_vm6, %v2950_v43, %v2955_v1  ;;  %v2958_v53 = vsel %vm1508_vm6, %v2953_v29, %v2957_v18 }
 0x3f6   : > { %v5789_v33 = vadd.f32 %v2951_v61, %v6467_v31  ;;  %v5792_v26 = vadd.f32 %v2954_v41, %v6468_v34  ;;  %v5797_v15 = vadd.f32 %v2956_v9, %v6469_v13  ;;  %v5800_v16 = vadd.f32 %v2958_v53, %v6470_v28  ;;  %v6477_v53 = vld [vmem:[#allocation28_spill] sm:$0xff] }
 0x3f7   : > { %v5803_v54 = vadd.f32 %v2955_v1, %v6471_v59  ;;  %v5806_v63 = vadd.f32 %v2957_v18, %v6472_v25  ;;  %v2818_v40 = vadd.f32 %v6475_v62, %v2795_v37  ;;  %v2819_v3 = vadd.f32 %v6475_v62, %v6476_v2 }
 0x3f8   : > { %v2858_v30 = vpop.permute.xlu0 %2857  ;;  %v2860_v56 = vpop.permute.xlu1 %2859  ;;  %v2799_v43 = vadd.f32 %v2788_v11, %v2758_v57  ;;  %v2800_v7 = vadd.f32 %v6465_v38, %v2759_v17  ;;  %v2820_v23 = vadd.f32 %v5638_v4, %v2797_v24  ;;  %v1635_v37 = vadd.f32 %v1625_v44, %v5724_v10 }
 0x3f9   : > { %v2841_v46 = vadd.f32 %v5670_v14, %v2818_v40  ;;  %v2842_v29 = vadd.f32 %v5670_v14, %v2819_v3  ;;  %v2844_v55 = vadd.f32 %v5718_v6, %v2821_v0  ;;  %v1645_v14 = vrot.slane %v5738_v5, 4 }
 0x3fa   : > { %v2822_v1 = vadd.f32 %v5644_v49, %v2799_v43  ;;  %v2823_v47 = vadd.f32 %v5644_v49, %v2800_v7  ;;  %v2843_v18 = vadd.f32 %v5718_v6, %v2820_v23  ;;  %v1646_v60 = vrot.slane %v1633_v8, 4 }
 0x3fb   : > { %v2864_v51 = vadd.f32 %v2856_v39, %v2841_v46  ;;  %v2865_v45 = vadd.f32 %v2856_v39, %v2842_v29  ;;  %v2867_v48 = vadd.f32 %v2858_v30, %v2844_v55  ;;  %v1637_v49 = vadd.f32 %v1624_v27, %v5713_v36  ;;  %v6479_v46 = vld [vmem:[#allocation27_spill] sm:$0xff] }
 0x3fc   : > { %v2845_v4 = vadd.f32 %v5730_v12, %v2822_v1  ;;  %v2846_v32 = vadd.f32 %v5730_v12, %v2823_v47  ;;  %v2866_v38 = vadd.f32 %v2858_v30, %v2843_v18  ;;  %v1647_v39 = vrot.slane %v1634_v20, 4  ;;  %v6478_v12 = vld [vmem:[#allocation30_spill] sm:$0xff]  ;;  %v6480_v1 = vld [vmem:[#allocation16_spill] sm:$0xff] }
 0x3fd   : > { %v2887_v19 = vadd.f32 %v2879_v58, %v2864_v51  ;;  %v2888_v10 = vadd.f32 %v2879_v58, %v2865_v45  ;;  %v1649_v6 = vrot.slane %v1635_v37, 4  ;;  %v1651_v31 = vrot.slane %v1636_v22, 4 }
 0x3fe   : > { %v2868_v11 = vadd.f32 %v2860_v56, %v2845_v4  ;;  %v2869_v61 = vadd.f32 %v2860_v56, %v2846_v32  ;;  %v1661_v13 = vadd.f32 %v1645_v14, %v6477_v53  ;;  %v1662_v28 = vadd.f32 %v1646_v60, %v6478_v12  ;;  %v6483_v4 = vld [vmem:[#allocation156_spill] sm:$0xff] }
 0x3ff   : > { %v3005_v35 = vrot.slane %v2887_v19, 2  ;;  %v3008_v21 = vrot.slane %v2888_v10, 2  ;;  %v1648_v44 = vsel %vm1644_vm8, %v1645_v14, %v1647_v39  ;;  %v1653_v50 = vrot.slane %v1637_v49, 4  ;;  %v6484_v19 = vld [vmem:[#allocation157_spill] sm:$0xff]  ;;  %v6486_v49 = vld [vmem:[#allocation22_spill] sm:$0xff] }
 0x400   : > { %v2881_v41 = vpop.permute.xlu0 %2880  ;;  %v2883_v9 = vpop.permute.xlu1 %2882  ;;  %v1650_v17 = vsel %vm1644_vm8, %v1646_v60, %v1649_v6  ;;  %v1652_v30 = vsel %vm1644_vm8, %v1647_v39, %v1651_v31  ;;  %v1663_v29 = vadd.f32 %v1648_v44, %v6479_v46  ;;  %v3062_v58 = vstv %s5844_s5 }
 0x401   : > { %v2889_v5 = vadd.f32 %v2881_v41, %v2866_v38  ;;  %v2890_v34 = vadd.f32 %v2881_v41, %v2867_v48  ;;  %v2891_v59 = vadd.f32 %v2883_v9, %v2868_v11  ;;  %v2892_v25 = vadd.f32 %v2883_v9, %v2869_v61  ;;  %v6485_v38 = vld [vmem:[#allocation24_spill] sm:$0xff]  ;;  %v6487_v11 = vld [vmem:[#allocation154_spill] sm:$0xff]  ;;  %v6488_v41 = vld [vmem:[#allocation155_spill] sm:$0xff] }
 0x402   : > { %v1654_v7 = vsel %vm1644_vm8, %v1649_v6, %v1653_v50  ;;  %v1664_v47 = vadd.f32 %v1650_v17, %v6480_v1  ;;  %v1665_v48 = vadd.f32 %v1652_v30, %v6485_v38 }
 0x403   : > { %v3006_v36 = vrot.slane %v2889_v5, 2  ;;  %v3009_v27 = vrot.slane %v2890_v34, 2  ;;  %v3011_v57 = vrot.slane %v2891_v59, 2  ;;  %v3013_v42 = vrot.slane %v2892_v25, 2 }
 0x404   : > { %v1666_v39 = vadd.f32 %v1654_v7, %v6486_v49 }
 0x405   : > { %v3007_v52 = vsel %vm1587_vm7, %v3005_v35, %v3006_v36  ;;  %v3010_v24 = vsel %vm1587_vm7, %v3008_v21, %v3009_v27  ;;  %v3012_v2 = vsel %vm1587_vm7, %v3006_v36, %v3011_v57  ;;  %v3014_v3 = vsel %vm1587_vm7, %v3009_v27, %v3013_v42 }
 0x406   : > { %v3021_v62 = vadd.f32 %v3007_v52, %v5789_v33  ;;  %v3022_v40 = vadd.f32 %v3010_v24, %v5792_v26  ;;  %v3023_v56 = vadd.f32 %v3012_v2, %v5797_v15  ;;  %v3024_v8 = vadd.f32 %v3014_v3, %v5800_v16  ;;  %v6481_v15 = vld [vmem:[#allocation158_spill] sm:$0xff]  ;;  %v6482_v16 = vld [vmem:[#allocation159_spill] sm:$0xff] }
 0x407   : > { %v3025_v22 = vadd.f32 %v3011_v57, %v5803_v54  ;;  %v3026_v43 = vadd.f32 %v3013_v42, %v5806_v63 }
 0x408   : > { %v3033_v33 = vrot.slane %v3021_v62, 4  ;;  %v3034_v23 = vrot.slane %v3022_v40, 4  ;;  %v3035_v26 = vrot.slane %v3023_v56, 4  ;;  %v3037_v0 = vrot.slane %v3024_v8, 4 }
 0x409   : > { %v3039_v20 = vrot.slane %v3025_v22, 4  ;;  %v3041_v37 = vrot.slane %v3026_v43, 4 }
 0x40a   : > { %v3049_v51 = vadd.f32 %v3033_v33, %v6481_v15  ;;  %v3050_v45 = vadd.f32 %v3034_v23, %v6482_v16  ;;  %v3036_v54 = vsel %vm1644_vm8, %v3033_v33, %v3035_v26  ;;  %v3038_v63 = vsel %vm1644_vm8, %v3034_v23, %v3037_v0 }
 0x40b   : > { %v3040_v18 = vsel %vm1644_vm8, %v3035_v26, %v3039_v20  ;;  %v3042_v55 = vsel %vm1644_vm8, %v3037_v0, %v3041_v37  ;;  %v3051_v32 = vadd.f32 %v3036_v54, %v6483_v4  ;;  %v3052_v10 = vadd.f32 %v3038_v63, %v6484_v19 }
 0x40c   : > { %v3055_v14 = vadd.f32 %v3049_v51, %v1661_v13  ;;  %v3056_v60 = vadd.f32 %v3050_v45, %v1662_v28  ;;  %v3053_v61 = vadd.f32 %v3040_v18, %v6487_v11  ;;  %v3054_v6 = vadd.f32 %v3042_v55, %v6488_v41 }
 0x40d   : > { %v3057_v34 = vadd.f32 %v3051_v32, %v1663_v29  ;;  %v3058_v9 = vadd.f32 %v3052_v10, %v1664_v47  ;;  %v3556_v10 = vld [vmem:[%s3819_s13 + $0x18] sm:$0xff] }
 0x40e   : > { %v3063_v31 = vadd.f32 %v3062_v58, %v3055_v14  ;;  %v3064_v5 = vadd.f32 %v3062_v58, %v3056_v60  ;;  %v3059_v53 = vadd.f32 %v3053_v61, %v1665_v48  ;;  %v3060_v12 = vadd.f32 %v3054_v6, %v1666_v39  ;;  %v3559_v61 = vld [vmem:[%s3819_s13 + $0x10] sm:$0xff] }
 0x40f   : > { %v3065_v59 = vadd.f32 %v3062_v58, %v3057_v34  ;;  %v3066_v25 = vadd.f32 %v3062_v58, %v3058_v9 }
 0x410   : > { %v3069_v13 = vsub.f32 0.0, %v3063_v31  ;;  %v3070_v28 = vsub.f32 0.0, %v3064_v5  ;;  %v3067_v35 = vadd.f32 %v3062_v58, %v3059_v53  ;;  %v3068_v21 = vadd.f32 %v3062_v58, %v3060_v12 }
 0x411   : > { %v3071_v44 = vsub.f32 0.0, %v3065_v59  ;;  %v3072_v50 = vsub.f32 0.0, %v3066_v25 }
 0x412   : > { %v3075_v36 = vmul.f32 1.442695, %v3069_v13  ;;  %v3077_v27 = vmul.f32 1.442695, %v3070_v28  ;;  %v3073_v57 = vsub.f32 0.0, %v3067_v35  ;;  %v3074_v42 = vsub.f32 0.0, %v3068_v21 }
 0x413   : > { %v3079_v17 = vmul.f32 1.442695, %v3071_v44  ;;  %v3081_v30 = vmul.f32 1.442695, %v3072_v50 }
 0x414   : > { %3517 = vpow2.f32 %v3075_v36  ;;  %v3083_v52 = vmul.f32 1.442695, %v3073_v57  ;;  %v3085_v24 = vmul.f32 1.442695, %v3074_v42 }
 0x415   : > { %3519 = vpow2.f32 %v3077_v27 }
 0x416   : > { %3521 = vpow2.f32 %v3079_v17 }
 0x417   : > { %3523 = vpow2.f32 %v3081_v30 }
 0x418   : > { %3525 = vpow2.f32 %v3083_v52 }
 0x419   : > { %3527 = vpow2.f32 %v3085_v24 }
 0x41a   : > { %v3518_v62 = vpop.eup %3517 }
 0x41b   : > { %v3520_v40 = vpop.eup %3519  ;;  %v5875_v2 = vadd.f32 1.0, %v3518_v62 }
 0x41c   : > { %v3522_v3 = vpop.eup %3521  ;;  %v5877_v56 = vadd.f32 1.0, %v3520_v40 }
 0x41d   : > { %v3524_v8 = vpop.eup %3523  ;;  %3529 = vrcp.f32 %v5875_v2  ;;  %v5880_v22 = vadd.f32 1.0, %v3522_v3  ;;  %v3102_v33 = vand.u32 2147483647, %v5875_v2  ;;  %v3104_v0 = vand.u32 2147483648, %v5875_v2 }
 0x41e   : > { %v3526_v43 = vpop.eup %3525  ;;  %3531 = vrcp.f32 %v5877_v56  ;;  %v5883_v7 = vadd.f32 1.0, %v3524_v8  ;;  %vm3098_vm9 = vweird.f32 %v5875_v2  ;;  %vm3113_vm10 = vweird.f32 %v5877_v56 }
 0x41f   : > { %v3528_v46 = vpop.eup %3527  ;;  %v5885_v29 = vadd.f32 1.0, %v3526_v43  ;;  %3533 = vrcp.f32 %v5880_v22  ;;  %v3134_v26 = vand.u32 2147483648, %v5880_v22  ;;  %v3132_v20 = vand.u32 2147483647, %v5880_v22 }
 0x420   : > { %v5889_v23 = vadd.f32 1.0, %v3528_v46  ;;  %3535 = vrcp.f32 %v5883_v7  ;;  %v3117_v15 = vand.u32 2147483647, %v5877_v56  ;;  %v3119_v51 = vand.u32 2147483648, %v5877_v56 }
 0x421   : > { %3537 = vrcp.f32 %v5885_v29  ;;  %v3164_v37 = vand.u32 2147483648, %v5885_v29  ;;  %v5899_v47 = vor.u32 1.1754944e-38, %v3134_v26  ;;  %v3162_v58 = vand.u32 2147483647, %v5885_v29 }
 0x422   : > { %3539 = vrcp.f32 %v5889_v23  ;;  %vm3128_vm11 = vweird.f32 %v5880_v22  ;;  %vm5909_vm12 = vcmp.eq.f32.partialorder %v3102_v33, 8.507059e+37  ;;  %v3105_v18 = vor.u32 1.1754944e-38, %v3104_v0 }
 0x423   : > { %v3530_v1 = vpop.eup %3529  ;;  %v5906_v45 = vor.u32 1.1754944e-38, %v3164_v37  ;;  %v3147_v55 = vand.u32 2147483647, %v5883_v7  ;;  %vm5915_vm15 = vcmp.eq.f32.partialorder %v3117_v15, 8.507059e+37  ;;  %vm5921_vm3 = vcmp.eq.f32.partialorder %v3132_v20, 8.507059e+37 }
 0x424   : > { %v3532_v16 = vpop.eup %3531  ;;  %v3094_v54 = vmul.f32 %v3530_v1, %v5875_v2  ;;  %vm3099_vm13 = vweird.f32 %v3530_v1  ;;  %v3120_v48 = vor.u32 1.1754944e-38, %v3119_v51  ;;  %v3149_v41 = vand.u32 2147483648, %v5883_v7 }
 0x425   : > { %v3534_v14 = vpop.eup %3533  ;;  %v3109_v60 = vmul.f32 %v3532_v16, %v5877_v56  ;;  %vm3114_vm14 = vweird.f32 %v3532_v16  ;;  %vm5927_vm6 = vcmp.eq.f32.partialorder %v3147_v55, 8.507059e+37  ;;  %vm5933_vm7 = vcmp.eq.f32.partialorder %v3162_v58, 8.507059e+37  ;;  %vm3100_vm5 = vmor %vm3098_vm9, %vm3099_vm13 }
 0x426   : > { %v3536_v32 = vpop.eup %3535  ;;  %v3124_v19 = vmul.f32 %v3534_v14, %v5880_v22  ;;  %vm3129_vm2 = vweird.f32 %v3534_v14  ;;  %v3095_v38 = vsub.f32 1.0, %v3094_v54  ;;  %v3150_v35 = vor.u32 1.1754944e-38, %v3149_v41  ;;  %vm3115_vm0 = vmor %vm3113_vm10, %vm3114_vm14 }
 0x427   : > { %v3538_v49 = vpop.eup %3537  ;;  %v3110_v39 = vsub.f32 1.0, %v3109_v60  ;;  %v3139_v11 = vmul.f32 %v3536_v32, %v5883_v7  ;;  %vm3173_vm4 = vweird.f32 %v5889_v23  ;;  %vm3130_vm8 = vmor %vm3128_vm11, %vm3129_vm2  ;;  %vm6499_vm9 = vweird.f32 %v3536_v32  ;;  %v3554_v60 = vld [vmem:[%s3819_s13] sm:$0xff] }
 0x428   : > { %v3540_v6 = vpop.eup %3539  ;;  %v3125_v31 = vsub.f32 1.0, %v3124_v19  ;;  %v3154_v5 = vmul.f32 %v3538_v49, %v5885_v29  ;;  %v3096_v9 = vmul.f32 %v3530_v1, %v3095_v38  ;;  %vm6500_vm10 = vweird.f32 %v5883_v7 }
 0x429   : > { %v3111_v53 = vmul.f32 %v3532_v16, %v3110_v39  ;;  %v3140_v12 = vsub.f32 1.0, %v3139_v11  ;;  %v3169_v13 = vmul.f32 %v3540_v6, %v5889_v23  ;;  %vm3174_vm1 = vweird.f32 %v3540_v6  ;;  %vm3145_vm13 = vmor %vm6500_vm10, %vm6499_vm9  ;;  %v3558_v39 = vld [vmem:[%s3819_s13 + $0x38] sm:$0xff] }
 0x42a   : > { %v3126_v28 = vmul.f32 %v3534_v14, %v3125_v31  ;;  %v3155_v59 = vsub.f32 1.0, %v3154_v5  ;;  %v3097_v25 = vadd.f32 %v3530_v1, %v3096_v9  ;;  %vm6501_vm11 = vweird.f32 %v3538_v49  ;;  %vm3175_vm14 = vmor %vm3173_vm4, %vm3174_vm1  ;;  %v3561_v5 = vld [vmem:[%s3819_s13 + $0x30] sm:$0xff] }
 0x42b   : > { %v3112_v21 = vadd.f32 %v3532_v16, %v3111_v53  ;;  %v3141_v36 = vmul.f32 %v3536_v32, %v3140_v12  ;;  %v3170_v27 = vsub.f32 1.0, %v3169_v13  ;;  %v3177_v26 = vand.u32 2147483647, %v5889_v23 }
 0x42c   : > { %v3127_v44 = vadd.f32 %v3534_v14, %v3126_v28  ;;  %v3156_v50 = vmul.f32 %v3538_v49, %v3155_v59  ;;  %v3101_v57 = vsel %vm3100_vm5, %v3530_v1, %v3097_v25  ;;  %vm3208_vm4 = vcmask 23552  }
 0x42d   : > { %v3106_v42 = vsel %vm5909_vm12, %v3105_v18, %v3101_v57  ;;  %v3116_v17 = vsel %vm3115_vm0, %v3532_v16, %v3112_v21  ;;  %v3142_v30 = vadd.f32 %v3536_v32, %v3141_v36  ;;  %v3171_v52 = vmul.f32 %v3540_v6, %v3170_v27 }
 0x42e   : > { %v3131_v24 = vsel %vm3130_vm8, %v3534_v14, %v3127_v44  ;;  %v3157_v62 = vadd.f32 %v3538_v49, %v3156_v50  ;;  %v3190_v40 = vrot.slane %v3106_v42, 5  ;;  %v3121_v2 = vsel %vm5915_vm15, %v3120_v48, %v3116_v17  ;;  %v3557_v48 = vld [vmem:[%s3819_s13 + $0x28] sm:$0xff] }
 0x42f   : > { %v3136_v3 = vsel %vm5921_vm3, %v5899_v47, %v3131_v24  ;;  %vm6502_vm12 = vweird.f32 %v5885_v29  ;;  %v3146_v56 = vsel %vm3145_vm13, %v3536_v32, %v3142_v30  ;;  %v3193_v8 = vrot.slane %v3121_v2, 5  ;;  %v3555_v32 = vld [vmem:[%s3819_s13 + $0x8] sm:$0xff] }
 0x430   : > { %vm3160_vm0 = vmor %vm6502_vm12, %vm6501_vm11  ;;  %v3172_v22 = vadd.f32 %v3540_v6, %v3171_v52  ;;  %v3191_v46 = vrot.slane %v3136_v3, 5  ;;  %v3151_v33 = vsel %vm5927_vm6, %v3150_v35, %v3146_v56  ;;  %v3179_v29 = vand.u32 2147483648, %v5889_v23 }
 0x431   : > { %v3161_v43 = vsel %vm3160_vm0, %v3538_v49, %v3157_v62  ;;  %v3194_v0 = vrot.slane %v3151_v33, 5  ;;  %vm6503_vm15 = vcmask 1042432   ;;  %vm3178_vm5 = vcmp.eq.f32.partialorder %v3177_v26, 8.507059e+37 }
 0x432   : > { %v3166_v7 = vsel %vm5933_vm7, %v5906_v45, %v3161_v43  ;;  %v3192_v37 = vsel %vm6503_vm15, %v3190_v40, %v3191_v46  ;;  %v3176_v1 = vsel %vm3175_vm14, %v3540_v6, %v3172_v22  ;;  %vm6504_vm2 = vmmov %vm6503_vm15  ;;  %v3180_v58 = vor.u32 1.1754944e-38, %v3179_v29  ;;  %v3560_v6 = vld [vmem:[%s3819_s13 + $0x20] sm:$0xff] }
 0x433   : > { %v3196_v20 = vrot.slane %v3166_v7, 5  ;;  %3200 = vrot.lane.b32.xlu2 %v3192_v37, %s3690_s18  ;;  %v3195_v47 = vsel %vm6504_vm2, %v3193_v8, %v3194_v0  ;;  %vm6505_vm3 = vmmov %vm6504_vm2  ;;  %vm6507_vm6 = vcmask 130048  }
 0x434   : > { %3202 = vrot.lane.b32.xlu0 %v3195_v47, %s3690_s18  ;;  %v3181_v51 = vsel %vm3178_vm5, %v3180_v58, %v3176_v1  ;;  %vm6506_vm1 = vmmov %vm6504_vm2 }
 0x435   : > { %v3197_v15 = vsel %vm6505_vm3, %v3191_v46, %v3196_v20  ;;  %v3198_v16 = vrot.slane %v3181_v51, 5  ;;  %vm6508_vm7 = vmmov %vm6507_vm6 }
 0x436   : > { %3204 = vrot.lane.b32.xlu1 %v3197_v15, %s3690_s18  ;;  %vm6509_vm8 = vmmov %vm6507_vm6 }
 0x437   : > { %v3199_v23 = vsel %vm6506_vm1, %v3194_v0, %v3198_v16  ;;  %vm6510_vm9 = vmmov %vm6507_vm6 }
 0x438   : > { %vm6511_vm10 = vmmov %vm6507_vm6 }
 0x439   : > { %vm6512_vm13 = vmmov %vm6507_vm6 }
 0x43a   : > { %vm6513_vm11 = vmmov %vm6507_vm6 }
 0x43b   : > { %3206 = vrot.lane.b32.xlu2 %v3199_v23, %s3690_s18  ;;  %vm6514_vm12 = vmmov %vm6507_vm6 }
 0x48d   : > { %v3201_v45 = vpop.permute.xlu2 %3200 }
 0x495   : > { %v3207_v63 = vpop.permute.xlu2 %3206 }
 0x4a6   : > { %v3203_v54 = vpop.permute.xlu0 %3202 }
 0x4a7   : > { %v3209_v55 = vsel %vm3208_vm4, %v3201_v45, %v3203_v54 }
 0x4a8   : > { %v3205_v18 = vpop.permute.xlu1 %3204  ;;  %v3213_v4 = vmul.f32 %v3554_v60, %v3209_v55  ;;  %v3215_v41 = vmul.f32 %v3559_v61, %v3209_v55  ;;  %v3217_v31 = vmul.f32 %v3560_v6, %v3209_v55  ;;  %v3219_v34 = vmul.f32 %v3561_v5, %v3209_v55 }
 0x4a9   : > { %v3210_v14 = vsel %vm3208_vm4, %v3205_v18, %v3207_v63 }
 0x4aa   : > { %v3214_v19 = vmul.f32 %v3555_v32, %v3210_v14  ;;  %v3216_v38 = vmul.f32 %v3556_v10, %v3210_v14  ;;  %v3218_v49 = vmul.f32 %v3557_v48, %v3210_v14  ;;  %v3220_v11 = vmul.f32 %v3558_v39, %v3210_v14  ;;  %3221 = vst.msk [vmem:[%s205_s2] sm:$0xff] %vm6507_vm6, %v3213_v4 }
 0x4ab   : > { %3223 = vst.msk [vmem:[%s205_s2 + $0x10] sm:$0xff] %vm6512_vm13, %v3215_v41 }
 0x4ac   : > { %3222 = vst.msk [vmem:[%s205_s2 + $0x8] sm:$0xff] %vm6508_vm7, %v3214_v19 }
 0x4ad   : > { %3224 = vst.msk [vmem:[%s205_s2 + $0x18] sm:$0xff] %vm6509_vm8, %v3216_v38 }
 0x4ae   : > { %3226 = vst.msk [vmem:[%s205_s2 + $0x28] sm:$0xff] %vm6510_vm9, %v3218_v49 }
 0x4af   : > { %3228 = vst.msk [vmem:[%s205_s2 + $0x38] sm:$0xff] %vm6511_vm10, %v3220_v11 }
 0x4b0   : > { %3225 = vst.msk [vmem:[%s205_s2 + $0x20] sm:$0xff] %vm6513_vm11, %v3217_v31 }
 0x4b1   : > { %3227 = vst.msk [vmem:[%s205_s2 + $0x30] sm:$0xff] %vm6514_vm12, %v3219_v34 }
 0x4b2   : > { %3634 = shalt.err (!%p3631_p8)
}
 0x4b3   : > { %s3691_s9 = smov 128   ;;  %s3692_s27 = smov 8  }
 0x4b4   : > { %3451 = dma.vmem_to_hbm [thread:$0]  (%p3768_p11), %s3243_s6, 1024, %s3245_s21, %s3230_s11, %s3691_s9, %s3691_s9, %s3692_s27  }
 0x4b5 PF: > { %s3259_s24 = sand.u32 1, %s3665_s14   ;;  %p6515_p9 = scmp.ge.s32.totalorder %s3677_s17, 2 }
 0x4b6   : > { %s3260_s5 = scalar_lea.sflag [#allocation7], %s3259_s24 }
 0x4b7   : > { %p3462_p10 = pnand %p6515_p9, %p3772_p12 }
 0x4b9   : > { %p3463_p1 = pneg %p3462_p10 }
 0x4bb   : > { %3660 = dma.done.wait (%p3463_p1), %s3260_s5, 1024  }
 0x4bc   : > { %3662 = vsyncadd (%p3463_p1), %s3260_s5, 4294966272  ;;  %p18_p2 = scmp.ge.s32.totalorder %s3741_s19, 4   ;;  %s6516_s14 = smov %s3669_s15 }
 0x4bd   : > { %s6517_s15 = smov %s3673_s16  ;;  %s6518_s16 = smov %s3753_s22 }
 0x4be   : > { %s6519_s17 = smov %s3741_s19  ;;  %20 = sbr.rel (!%p18_p2) target bundleno = 8 (0x8), region = 82 }
 0x4c3   :  { %3266 = vsyncpa [#allocation6], 1 }
 0x4c4   :  { %3268 = vsyncpa [#allocation6 + $0x1], 1 }
 0x4c5   :  { %3269 = vsyncpa [#allocation7], 1 }
 0x4c6   :  { %3271 = vsyncpa [#allocation7 + $0x1], 1 }
 0x4c7   :  { %3272 = vsyncpa [#allocation8], 1 }
 0x4c8   :  { %3274 = vsyncpa [#allocation8 + $0x1], 1 }

</bundles_post_ra>
